<compile_context>
chip_gen: v7x
topology: tpu7x:2x2x1
jax: 0.10.0
libtpu: 0.0.40
codegen_flags: <defaults>
</compile_context>

<pallas_src>
import jax
import jax.numpy as jnp
from jax.experimental import pallas as pl
from jax.experimental.pallas import tpu as pltpu

BLOCK_B = 128  # lane-dense batch block (full vreg width)


def make_seq2seq_kernel(T, H):
    """Build the kernel as a closure over the static problem sizes."""

    def kernel(x_ref,          # (T, I+1, Bblk) lane-major batch, ones row appended
               enc_wih_ref,    # (4H, I+1)  enc bias folded into last column, g-rows x2
               enc_whh_ref,    # (4H, H)    g-rows x2
               dec_whh_ref,    # (4H, H)    g-rows x2
               dec_b_ref,      # (4H, 1)    dec bias + folded one-hot input, g-rows x2
               lin_w_ref,      # (O, H)
               lin_b_ref,      # (O, 1)
               out_ref):       # (O, Bblk)
        B = out_ref.shape[1]

        wih = enc_wih_ref[...]            # (4H, I+1)
        whh = enc_whh_ref[...]            # (4H, H)

        def lstm_cell(gates, c):
            # One full-slab sigmoid (single EUP pass); tanh on the g gate is
            # recovered as 2*sigmoid(2z)-1 (the x2 is pre-folded into weights).
            sig = jax.nn.sigmoid(gates)                  # (4H, B)
            i_g = sig[0 * H:1 * H, :]                    # sublane-aligned slices
            f_g = sig[1 * H:2 * H, :]
            g_g = 2.0 * sig[2 * H:3 * H, :] - 1.0        # == tanh(z_g)
            o_g = sig[3 * H:4 * H, :]
            c_new = i_g * g_g if c is None else f_g * c + i_g * g_g
            h_new = o_g * jnp.tanh(c_new)
            return h_new, c_new

        # ---- encoder recurrence: h/c live in vregs, loop fully unrolled ----
        # step 0: h = c = 0, so the recurrent matmul is skipped entirely.
        gates0 = jnp.dot(wih, x_ref[0], preferred_element_type=jnp.float32)
        h, c = lstm_cell(gates0, None)
        for t in range(1, T):                            # T static & small
            # input projection (bias included via the ones row); independent
            # of h, so it does not sit on the serial dependency chain
            xp_t = jnp.dot(wih, x_ref[t], preferred_element_type=jnp.float32)
            gates = xp_t + jnp.dot(whh, h, preferred_element_type=jnp.float32)
            h, c = lstm_cell(gates, c)

        # ---- decoder: one step, h0 = encoder final h, c0 = zeros;
        #      constant one-hot input already folded into dec_b_ref ----
        dec_gates = (jnp.dot(dec_whh_ref[...], h,
                             preferred_element_type=jnp.float32)
                     + dec_b_ref[...])
        h_dec, _ = lstm_cell(dec_gates, None)

        # ---- output head: Linear(relu(h_dec)), lane-dense (O, B) store ----
        out_ref[...] = (jnp.dot(lin_w_ref[...], jax.nn.relu(h_dec),
                                preferred_element_type=jnp.float32)
                        + lin_b_ref[...])

    return kernel


def _prep_weights(params):
    """Transpose to batch-on-lanes layout, fold biases / one-hot decoder input,
    and pre-scale the g-gate rows by 2 (tanh -> 2*sigmoid(2z)-1 trick)."""
    H = params["enc_whh"].shape[0]

    enc_wih_T = params["enc_wih"].T                       # (4H, I)
    enc_b_col = params["enc_b"].T                         # (4H, 1)
    enc_wih_aug = jnp.concatenate([enc_wih_T, enc_b_col], axis=1)  # (4H, I+1)
    enc_whh_T = params["enc_whh"].T                       # (4H, H)

    # Fixed decoder input [0,0,0,0,1,0] is a one-hot selecting row 4 of W_ih;
    # fold it into the decoder bias at trace time.
    dec_b_eff = (params["dec_b"] + params["dec_wih"][4:5, :]).T    # (4H, 1)
    dec_whh_T = params["dec_whh"].T                       # (4H, H)

    scale = jnp.ones((4 * H, 1), jnp.float32).at[2 * H:3 * H].set(2.0)
    enc_wih_aug = enc_wih_aug * scale
    enc_whh_T = enc_whh_T * scale
    dec_whh_T = dec_whh_T * scale
    dec_b_eff = dec_b_eff * scale

    lin_w_T = params["lin_w"].T                           # (O, H)
    lin_b_T = params["lin_b"].T                           # (O, 1)
    return enc_wih_aug, enc_whh_T, dec_whh_T, dec_b_eff, lin_w_T, lin_b_T


def seq2seq_forward(x, params):
    """x: (B, T, I) float32.  Returns (B, 1, O)."""
    B, T, I = x.shape
    H = params["enc_whh"].shape[0]
    O = params["lin_w"].shape[1]
    assert I == 6, "decoder one-hot input [0,0,0,0,1,0] implies input_size == 6"

    enc_wih_aug, enc_whh_T, dec_whh_T, dec_b_eff, lin_w_T, lin_b_T = \
        _prep_weights(params)

    # Pad batch up to a multiple of BLOCK_B so every block is lane-dense.
    Bp = ((B + BLOCK_B - 1) // BLOCK_B) * BLOCK_B
    n_blocks = Bp // BLOCK_B

    # lane-major layout (T, I+1, Bp); trailing ones row carries the encoder
    # bias through the input-projection matmul.
    x_t = jnp.transpose(x, (1, 2, 0))                     # (T, I, B)
    x_aug = jnp.concatenate([x_t, jnp.ones((T, 1, B), jnp.float32)], axis=1)
    if Bp != B:
        x_aug = jnp.pad(x_aug, ((0, 0), (0, 0), (0, Bp - B)))

    # advisory cost estimate so XLA overlaps this small call with HBM work
    flops = n_blocks * BLOCK_B * (T * 2 * 4 * H * (I + 1)
                                  + T * 2 * 4 * H * H
                                  + 2 * O * H
                                  + (T + 1) * 16 * H)
    transcendentals = n_blocks * BLOCK_B * (T + 1) * 5 * H
    bytes_accessed = 4 * (T * (I + 1) * Bp + O * Bp
                          + 4 * H * (I + 1) + 2 * 4 * H * H + 4 * H
                          + O * H + O)

    out = pl.pallas_call(
        make_seq2seq_kernel(T, H),
        out_shape=jax.ShapeDtypeStruct((O, Bp), jnp.float32),
        grid=(n_blocks,),
        in_specs=[
            pl.BlockSpec((T, I + 1, BLOCK_B), lambda i: (0, 0, i)),
            pl.BlockSpec((4 * H, I + 1), lambda i: (0, 0)),
            pl.BlockSpec((4 * H, H), lambda i: (0, 0)),
            pl.BlockSpec((4 * H, H), lambda i: (0, 0)),
            pl.BlockSpec((4 * H, 1), lambda i: (0, 0)),
            pl.BlockSpec((O, H), lambda i: (0, 0)),
            pl.BlockSpec((O, 1), lambda i: (0, 0)),
        ],
        out_specs=pl.BlockSpec((O, BLOCK_B), lambda i: (0, i)),
        compiler_params=pltpu.CompilerParams(
            dimension_semantics=("parallel",)),
        cost_estimate=pl.CostEstimate(flops=int(flops),
                                      transcendentals=int(transcendentals),
                                      bytes_accessed=int(bytes_accessed)),
    )(x_aug, enc_wih_aug, enc_whh_T, dec_whh_T, dec_b_eff, lin_w_T, lin_b_T)

    return out[:, :B].T[:, None, :]                       # (B, 1, O)


def seq2seq_reference(x, params):
    """Pure-JAX reference mirroring the PyTorch forward (no folding/tricks)."""
    B, T, I = x.shape
    H = params["enc_whh"].shape[0]

    def lstm_step(x_t, h, c, wih, whh, b):
        g = x_t @ wih + h @ whh + b
        i_g = jax.nn.sigmoid(g[:, 0 * H:1 * H])
        f_g = jax.nn.sigmoid(g[:, 1 * H:2 * H])
        g_g = jnp.tanh(g[:, 2 * H:3 * H])
        o_g = jax.nn.sigmoid(g[:, 3 * H:4 * H])
        c = f_g * c + i_g * g_g
        h = o_g * jnp.tanh(c)
        return h, c

    h = jnp.zeros((B, H), jnp.float32)
    c = jnp.zeros((B, H), jnp.float32)
    for t in range(T):
        h, c = lstm_step(x[:, t, :], h, c,
                         params["enc_wih"], params["enc_whh"], params["enc_b"])
    dec_in = jnp.tile(jnp.array([[0.0, 0.0, 0.0, 0.0, 1.0, 0.0]],
                                dtype=jnp.float32), (B, 1))
    c = jnp.zeros((B, H), jnp.float32)
    h, c = lstm_step(dec_in, h, c,
                     params["dec_wih"], params["dec_whh"], params["dec_b"])
    out = jax.nn.relu(h) @ params["lin_w"] + params["lin_b"]
    return out[:, None, :]


def init_params(key, input_size, hidden_size, output_size):
    """Deterministic init; PyTorch-style U(-1/sqrt(H), 1/sqrt(H)).
    Biases are the sum b_ih + b_hh, matching a loaded PyTorch LSTM checkpoint."""
    H, I, O = hidden_size, input_size, output_size
    bound = 1.0 / jnp.sqrt(jnp.float32(H))
    ks = jax.random.split(key, 10)
    u = lambda k, shape: jax.random.uniform(k, shape, jnp.float32, -bound, bound)
    return {
        # pre-transposed to (in_features, 4H) / (H, 4H); gate order i, f, g, o
        "enc_wih": u(ks[0], (I, 4 * H)),
        "enc_whh": u(ks[1], (H, 4 * H)),
        "enc_b":   u(ks[2], (1, 4 * H)) + u(ks[3], (1, 4 * H)),
        "dec_wih": u(ks[4], (I, 4 * H)),
        "dec_whh": u(ks[5], (H, 4 * H)),
        "dec_b":   u(ks[6], (1, 4 * H)) + u(ks[7], (1, 4 * H)),
        "lin_w":   u(ks[8], (H, O)),
        "lin_b":   jnp.zeros((1, O), jnp.float32),
    }


if __name__ == "__main__":
    # shapes consistent with the module: input_size=6 (forced by the fixed
    # decoder input vector), output_size=6, hidden=32, seq len=8.  Batch=192
    # (many tracks per call, multiple of 8; pads to 256 -> 2 lane-dense
    # blocks of 128, exercising the grid / padding path).
    B, T, I, H, O = 192, 8, 6, 32, 6

    key = jax.random.PRNGKey(0)
    pkey, xkey = jax.random.split(key)
    params = init_params(pkey, I, H, O)
    x = jax.random.normal(xkey, (B, T, I), jnp.float32)

    fwd = jax.jit(seq2seq_forward)
    out = jax.block_until_ready(fwd(x, params))

    ref = seq2seq_reference(x, params)
    assert out.shape == (B, 1, O)
    assert jnp.allclose(out, ref, rtol=1e-3, atol=1e-3), "mismatch vs reference"

    print("KERNEL_OK")
</pallas_src>

<mosaic_0001>
module attributes {stable_mosaic.version = 11 : i64} {
  func.func @kernel(%arg0: i32, %arg1: memref<8x7x128xf32, #tpu.memory_space<vmem>>, %arg2: memref<128x7xf32, #tpu.memory_space<vmem>>, %arg3: memref<128x32xf32, #tpu.memory_space<vmem>>, %arg4: memref<128x32xf32, #tpu.memory_space<vmem>>, %arg5: memref<128x1xf32, #tpu.memory_space<vmem>>, %arg6: memref<6x32xf32, #tpu.memory_space<vmem>>, %arg7: memref<6x1xf32, #tpu.memory_space<vmem>>, %arg8: memref<6x128xf32, #tpu.memory_space<vmem>>) attributes {dimension_semantics = [#tpu.dimension_semantics<parallel>], iteration_bounds = array<i64: 2>, scalar_prefetch = 0 : i64, scratch_operands = 0 : i64, tpu.core_type = #tpu.core_type<tc>, window_params = [{transform_indices = @transform_0, window_bounds = array<i64: 8, 7, 128>}, {pipeline_mode = #tpu.pipeline_mode<synchronous>, transform_indices = @transform_1, window_bounds = array<i64: 128, 7>}, {pipeline_mode = #tpu.pipeline_mode<synchronous>, transform_indices = @transform_2, window_bounds = array<i64: 128, 32>}, {pipeline_mode = #tpu.pipeline_mode<synchronous>, transform_indices = @transform_3, window_bounds = array<i64: 128, 32>}, {pipeline_mode = #tpu.pipeline_mode<synchronous>, transform_indices = @transform_4, window_bounds = array<i64: 128, 1>}, {pipeline_mode = #tpu.pipeline_mode<synchronous>, transform_indices = @transform_5, window_bounds = array<i64: 6, 32>}, {pipeline_mode = #tpu.pipeline_mode<synchronous>, transform_indices = @transform_6, window_bounds = array<i64: 6, 1>}, {transform_indices = @transform_7, window_bounds = array<i64: 6, 128>}]} {
    %c0 = arith.constant 0 : index
    %c0_0 = arith.constant 0 : index
    %0 = vector.load %arg2[%c0, %c0_0] : memref<128x7xf32, #tpu.memory_space<vmem>>, vector<128x7xf32>
    %c0_1 = arith.constant 0 : index
    %c0_2 = arith.constant 0 : index
    %1 = vector.load %arg3[%c0_1, %c0_2] : memref<128x32xf32, #tpu.memory_space<vmem>>, vector<128x32xf32>
    %c0_3 = arith.constant 0 : index
    %c0_4 = arith.constant 0 : index
    %c0_5 = arith.constant 0 : index
    %2 = vector.load %arg1[%c0_3, %c0_4, %c0_5] : memref<8x7x128xf32, #tpu.memory_space<vmem>>, vector<1x7x128xf32>
    %3 = vector.shape_cast %2 : vector<1x7x128xf32> to vector<7x128xf32>
    %cst = arith.constant dense<0.000000e+00> : vector<128x128xf32>
    %4 = tpu.matmul %0, %3, %cst {dimension_numbers = #tpu.dot_dimension_numbers<[1], [0], [0], [1], [0, 0, 1, 1], [], []>} : vector<128x7xf32>, vector<7x128xf32>, vector<128x128xf32> -> vector<128x128xf32>
    %5 = arith.negf %4 : vector<128x128xf32>
    %6 = math.exp %5 : vector<128x128xf32>
    %cst_6 = arith.constant 1.000000e+00 : f32
    %7 = vector.broadcast %cst_6 : f32 to vector<128x128xf32>
    %8 = arith.addf %7, %6 : vector<128x128xf32>
    %9 = arith.divf %7, %8 : vector<128x128xf32>
    %10 = vector.extract_strided_slice %9 {offsets = [0, 0], sizes = [32, 128], strides = [1, 1]} : vector<128x128xf32> to vector<32x128xf32>
    %11 = vector.extract_strided_slice %9 {offsets = [64, 0], sizes = [32, 128], strides = [1, 1]} : vector<128x128xf32> to vector<32x128xf32>
    %cst_7 = arith.constant 2.000000e+00 : f32
    %12 = vector.broadcast %cst_7 : f32 to vector<32x128xf32>
    %13 = arith.mulf %12, %11 : vector<32x128xf32>
    %cst_8 = arith.constant 1.000000e+00 : f32
    %14 = vector.broadcast %cst_8 : f32 to vector<32x128xf32>
    %15 = arith.subf %13, %14 : vector<32x128xf32>
    %16 = vector.extract_strided_slice %9 {offsets = [96, 0], sizes = [32, 128], strides = [1, 1]} : vector<128x128xf32> to vector<32x128xf32>
    %17 = arith.mulf %10, %15 : vector<32x128xf32>
    %18 = math.tanh %17 : vector<32x128xf32>
    %19 = arith.mulf %16, %18 : vector<32x128xf32>
    %c1 = arith.constant 1 : index
    %c0_9 = arith.constant 0 : index
    %c0_10 = arith.constant 0 : index
    %20 = vector.load %arg1[%c1, %c0_9, %c0_10] : memref<8x7x128xf32, #tpu.memory_space<vmem>>, vector<1x7x128xf32>
    %21 = vector.shape_cast %20 : vector<1x7x128xf32> to vector<7x128xf32>
    %cst_11 = arith.constant dense<0.000000e+00> : vector<128x128xf32>
    %22 = tpu.matmul %0, %21, %cst_11 {dimension_numbers = #tpu.dot_dimension_numbers<[1], [0], [0], [1], [0, 0, 1, 1], [], []>} : vector<128x7xf32>, vector<7x128xf32>, vector<128x128xf32> -> vector<128x128xf32>
    %cst_12 = arith.constant dense<0.000000e+00> : vector<128x128xf32>
    %23 = tpu.matmul %1, %19, %cst_12 {dimension_numbers = #tpu.dot_dimension_numbers<[1], [0], [0], [1], [0, 0, 1, 1], [], []>} : vector<128x32xf32>, vector<32x128xf32>, vector<128x128xf32> -> vector<128x128xf32>
    %24 = arith.addf %22, %23 : vector<128x128xf32>
    %25 = arith.negf %24 : vector<128x128xf32>
    %26 = math.exp %25 : vector<128x128xf32>
    %cst_13 = arith.constant 1.000000e+00 : f32
    %27 = vector.broadcast %cst_13 : f32 to vector<128x128xf32>
    %28 = arith.addf %27, %26 : vector<128x128xf32>
    %29 = arith.divf %27, %28 : vector<128x128xf32>
    %30 = vector.extract_strided_slice %29 {offsets = [0, 0], sizes = [32, 128], strides = [1, 1]} : vector<128x128xf32> to vector<32x128xf32>
    %31 = vector.extract_strided_slice %29 {offsets = [32, 0], sizes = [32, 128], strides = [1, 1]} : vector<128x128xf32> to vector<32x128xf32>
    %32 = vector.extract_strided_slice %29 {offsets = [64, 0], sizes = [32, 128], strides = [1, 1]} : vector<128x128xf32> to vector<32x128xf32>
    %cst_14 = arith.constant 2.000000e+00 : f32
    %33 = vector.broadcast %cst_14 : f32 to vector<32x128xf32>
    %34 = arith.mulf %33, %32 : vector<32x128xf32>
    %cst_15 = arith.constant 1.000000e+00 : f32
    %35 = vector.broadcast %cst_15 : f32 to vector<32x128xf32>
    %36 = arith.subf %34, %35 : vector<32x128xf32>
    %37 = vector.extract_strided_slice %29 {offsets = [96, 0], sizes = [32, 128], strides = [1, 1]} : vector<128x128xf32> to vector<32x128xf32>
    %38 = arith.mulf %31, %17 : vector<32x128xf32>
    %39 = arith.mulf %30, %36 : vector<32x128xf32>
    %40 = arith.addf %38, %39 : vector<32x128xf32>
    %41 = math.tanh %40 : vector<32x128xf32>
    %42 = arith.mulf %37, %41 : vector<32x128xf32>
    %c2 = arith.constant 2 : index
    %c0_16 = arith.constant 0 : index
    %c0_17 = arith.constant 0 : index
    %43 = vector.load %arg1[%c2, %c0_16, %c0_17] : memref<8x7x128xf32, #tpu.memory_space<vmem>>, vector<1x7x128xf32>
    %44 = vector.shape_cast %43 : vector<1x7x128xf32> to vector<7x128xf32>
    %cst_18 = arith.constant dense<0.000000e+00> : vector<128x128xf32>
    %45 = tpu.matmul %0, %44, %cst_18 {dimension_numbers = #tpu.dot_dimension_numbers<[1], [0], [0], [1], [0, 0, 1, 1], [], []>} : vector<128x7xf32>, vector<7x128xf32>, vector<128x128xf32> -> vector<128x128xf32>
    %cst_19 = arith.constant dense<0.000000e+00> : vector<128x128xf32>
    %46 = tpu.matmul %1, %42, %cst_19 {dimension_numbers = #tpu.dot_dimension_numbers<[1], [0], [0], [1], [0, 0, 1, 1], [], []>} : vector<128x32xf32>, vector<32x128xf32>, vector<128x128xf32> -> vector<128x128xf32>
    %47 = arith.addf %45, %46 : vector<128x128xf32>
    %48 = arith.negf %47 : vector<128x128xf32>
    %49 = math.exp %48 : vector<128x128xf32>
    %cst_20 = arith.constant 1.000000e+00 : f32
    %50 = vector.broadcast %cst_20 : f32 to vector<128x128xf32>
    %51 = arith.addf %50, %49 : vector<128x128xf32>
    %52 = arith.divf %50, %51 : vector<128x128xf32>
    %53 = vector.extract_strided_slice %52 {offsets = [0, 0], sizes = [32, 128], strides = [1, 1]} : vector<128x128xf32> to vector<32x128xf32>
    %54 = vector.extract_strided_slice %52 {offsets = [32, 0], sizes = [32, 128], strides = [1, 1]} : vector<128x128xf32> to vector<32x128xf32>
    %55 = vector.extract_strided_slice %52 {offsets = [64, 0], sizes = [32, 128], strides = [1, 1]} : vector<128x128xf32> to vector<32x128xf32>
    %cst_21 = arith.constant 2.000000e+00 : f32
    %56 = vector.broadcast %cst_21 : f32 to vector<32x128xf32>
    %57 = arith.mulf %56, %55 : vector<32x128xf32>
    %cst_22 = arith.constant 1.000000e+00 : f32
    %58 = vector.broadcast %cst_22 : f32 to vector<32x128xf32>
    %59 = arith.subf %57, %58 : vector<32x128xf32>
    %60 = vector.extract_strided_slice %52 {offsets = [96, 0], sizes = [32, 128], strides = [1, 1]} : vector<128x128xf32> to vector<32x128xf32>
    %61 = arith.mulf %54, %40 : vector<32x128xf32>
    %62 = arith.mulf %53, %59 : vector<32x128xf32>
    %63 = arith.addf %61, %62 : vector<32x128xf32>
    %64 = math.tanh %63 : vector<32x128xf32>
    %65 = arith.mulf %60, %64 : vector<32x128xf32>
    %c3 = arith.constant 3 : index
    %c0_23 = arith.constant 0 : index
    %c0_24 = arith.constant 0 : index
    %66 = vector.load %arg1[%c3, %c0_23, %c0_24] : memref<8x7x128xf32, #tpu.memory_space<vmem>>, vector<1x7x128xf32>
    %67 = vector.shape_cast %66 : vector<1x7x128xf32> to vector<7x128xf32>
    %cst_25 = arith.constant dense<0.000000e+00> : vector<128x128xf32>
    %68 = tpu.matmul %0, %67, %cst_25 {dimension_numbers = #tpu.dot_dimension_numbers<[1], [0], [0], [1], [0, 0, 1, 1], [], []>} : vector<128x7xf32>, vector<7x128xf32>, vector<128x128xf32> -> vector<128x128xf32>
    %cst_26 = arith.constant dense<0.000000e+00> : vector<128x128xf32>
    %69 = tpu.matmul %1, %65, %cst_26 {dimension_numbers = #tpu.dot_dimension_numbers<[1], [0], [0], [1], [0, 0, 1, 1], [], []>} : vector<128x32xf32>, vector<32x128xf32>, vector<128x128xf32> -> vector<128x128xf32>
    %70 = arith.addf %68, %69 : vector<128x128xf32>
    %71 = arith.negf %70 : vector<128x128xf32>
    %72 = math.exp %71 : vector<128x128xf32>
    %cst_27 = arith.constant 1.000000e+00 : f32
    %73 = vector.broadcast %cst_27 : f32 to vector<128x128xf32>
    %74 = arith.addf %73, %72 : vector<128x128xf32>
    %75 = arith.divf %73, %74 : vector<128x128xf32>
    %76 = vector.extract_strided_slice %75 {offsets = [0, 0], sizes = [32, 128], strides = [1, 1]} : vector<128x128xf32> to vector<32x128xf32>
    %77 = vector.extract_strided_slice %75 {offsets = [32, 0], sizes = [32, 128], strides = [1, 1]} : vector<128x128xf32> to vector<32x128xf32>
    %78 = vector.extract_strided_slice %75 {offsets = [64, 0], sizes = [32, 128], strides = [1, 1]} : vector<128x128xf32> to vector<32x128xf32>
    %cst_28 = arith.constant 2.000000e+00 : f32
    %79 = vector.broadcast %cst_28 : f32 to vector<32x128xf32>
    %80 = arith.mulf %79, %78 : vector<32x128xf32>
    %cst_29 = arith.constant 1.000000e+00 : f32
    %81 = vector.broadcast %cst_29 : f32 to vector<32x128xf32>
    %82 = arith.subf %80, %81 : vector<32x128xf32>
    %83 = vector.extract_strided_slice %75 {offsets = [96, 0], sizes = [32, 128], strides = [1, 1]} : vector<128x128xf32> to vector<32x128xf32>
    %84 = arith.mulf %77, %63 : vector<32x128xf32>
    %85 = arith.mulf %76, %82 : vector<32x128xf32>
    %86 = arith.addf %84, %85 : vector<32x128xf32>
    %87 = math.tanh %86 : vector<32x128xf32>
    %88 = arith.mulf %83, %87 : vector<32x128xf32>
    %c4 = arith.constant 4 : index
    %c0_30 = arith.constant 0 : index
    %c0_31 = arith.constant 0 : index
    %89 = vector.load %arg1[%c4, %c0_30, %c0_31] : memref<8x7x128xf32, #tpu.memory_space<vmem>>, vector<1x7x128xf32>
    %90 = vector.shape_cast %89 : vector<1x7x128xf32> to vector<7x128xf32>
    %cst_32 = arith.constant dense<0.000000e+00> : vector<128x128xf32>
    %91 = tpu.matmul %0, %90, %cst_32 {dimension_numbers = #tpu.dot_dimension_numbers<[1], [0], [0], [1], [0, 0, 1, 1], [], []>} : vector<128x7xf32>, vector<7x128xf32>, vector<128x128xf32> -> vector<128x128xf32>
    %cst_33 = arith.constant dense<0.000000e+00> : vector<128x128xf32>
    %92 = tpu.matmul %1, %88, %cst_33 {dimension_numbers = #tpu.dot_dimension_numbers<[1], [0], [0], [1], [0, 0, 1, 1], [], []>} : vector<128x32xf32>, vector<32x128xf32>, vector<128x128xf32> -> vector<128x128xf32>
    %93 = arith.addf %91, %92 : vector<128x128xf32>
    %94 = arith.negf %93 : vector<128x128xf32>
    %95 = math.exp %94 : vector<128x128xf32>
    %cst_34 = arith.constant 1.000000e+00 : f32
    %96 = vector.broadcast %cst_34 : f32 to vector<128x128xf32>
    %97 = arith.addf %96, %95 : vector<128x128xf32>
    %98 = arith.divf %96, %97 : vector<128x128xf32>
    %99 = vector.extract_strided_slice %98 {offsets = [0, 0], sizes = [32, 128], strides = [1, 1]} : vector<128x128xf32> to vector<32x128xf32>
    %100 = vector.extract_strided_slice %98 {offsets = [32, 0], sizes = [32, 128], strides = [1, 1]} : vector<128x128xf32> to vector<32x128xf32>
    %101 = vector.extract_strided_slice %98 {offsets = [64, 0], sizes = [32, 128], strides = [1, 1]} : vector<128x128xf32> to vector<32x128xf32>
    %cst_35 = arith.constant 2.000000e+00 : f32
    %102 = vector.broadcast %cst_35 : f32 to vector<32x128xf32>
    %103 = arith.mulf %102, %101 : vector<32x128xf32>
    %cst_36 = arith.constant 1.000000e+00 : f32
    %104 = vector.broadcast %cst_36 : f32 to vector<32x128xf32>
    %105 = arith.subf %103, %104 : vector<32x128xf32>
    %106 = vector.extract_strided_slice %98 {offsets = [96, 0], sizes = [32, 128], strides = [1, 1]} : vector<128x128xf32> to vector<32x128xf32>
    %107 = arith.mulf %100, %86 : vector<32x128xf32>
    %108 = arith.mulf %99, %105 : vector<32x128xf32>
    %109 = arith.addf %107, %108 : vector<32x128xf32>
    %110 = math.tanh %109 : vector<32x128xf32>
    %111 = arith.mulf %106, %110 : vector<32x128xf32>
    %c5 = arith.constant 5 : index
    %c0_37 = arith.constant 0 : index
    %c0_38 = arith.constant 0 : index
    %112 = vector.load %arg1[%c5, %c0_37, %c0_38] : memref<8x7x128xf32, #tpu.memory_space<vmem>>, vector<1x7x128xf32>
    %113 = vector.shape_cast %112 : vector<1x7x128xf32> to vector<7x128xf32>
    %cst_39 = arith.constant dense<0.000000e+00> : vector<128x128xf32>
    %114 = tpu.matmul %0, %113, %cst_39 {dimension_numbers = #tpu.dot_dimension_numbers<[1], [0], [0], [1], [0, 0, 1, 1], [], []>} : vector<128x7xf32>, vector<7x128xf32>, vector<128x128xf32> -> vector<128x128xf32>
    %cst_40 = arith.constant dense<0.000000e+00> : vector<128x128xf32>
    %115 = tpu.matmul %1, %111, %cst_40 {dimension_numbers = #tpu.dot_dimension_numbers<[1], [0], [0], [1], [0, 0, 1, 1], [], []>} : vector<128x32xf32>, vector<32x128xf32>, vector<128x128xf32> -> vector<128x128xf32>
    %116 = arith.addf %114, %115 : vector<128x128xf32>
    %117 = arith.negf %116 : vector<128x128xf32>
    %118 = math.exp %117 : vector<128x128xf32>
    %cst_41 = arith.constant 1.000000e+00 : f32
    %119 = vector.broadcast %cst_41 : f32 to vector<128x128xf32>
    %120 = arith.addf %119, %118 : vector<128x128xf32>
    %121 = arith.divf %119, %120 : vector<128x128xf32>
    %122 = vector.extract_strided_slice %121 {offsets = [0, 0], sizes = [32, 128], strides = [1, 1]} : vector<128x128xf32> to vector<32x128xf32>
    %123 = vector.extract_strided_slice %121 {offsets = [32, 0], sizes = [32, 128], strides = [1, 1]} : vector<128x128xf32> to vector<32x128xf32>
    %124 = vector.extract_strided_slice %121 {offsets = [64, 0], sizes = [32, 128], strides = [1, 1]} : vector<128x128xf32> to vector<32x128xf32>
    %cst_42 = arith.constant 2.000000e+00 : f32
    %125 = vector.broadcast %cst_42 : f32 to vector<32x128xf32>
    %126 = arith.mulf %125, %124 : vector<32x128xf32>
    %cst_43 = arith.constant 1.000000e+00 : f32
    %127 = vector.broadcast %cst_43 : f32 to vector<32x128xf32>
    %128 = arith.subf %126, %127 : vector<32x128xf32>
    %129 = vector.extract_strided_slice %121 {offsets = [96, 0], sizes = [32, 128], strides = [1, 1]} : vector<128x128xf32> to vector<32x128xf32>
    %130 = arith.mulf %123, %109 : vector<32x128xf32>
    %131 = arith.mulf %122, %128 : vector<32x128xf32>
    %132 = arith.addf %130, %131 : vector<32x128xf32>
    %133 = math.tanh %132 : vector<32x128xf32>
    %134 = arith.mulf %129, %133 : vector<32x128xf32>
    %c6 = arith.constant 6 : index
    %c0_44 = arith.constant 0 : index
    %c0_45 = arith.constant 0 : index
    %135 = vector.load %arg1[%c6, %c0_44, %c0_45] : memref<8x7x128xf32, #tpu.memory_space<vmem>>, vector<1x7x128xf32>
    %136 = vector.shape_cast %135 : vector<1x7x128xf32> to vector<7x128xf32>
    %cst_46 = arith.constant dense<0.000000e+00> : vector<128x128xf32>
    %137 = tpu.matmul %0, %136, %cst_46 {dimension_numbers = #tpu.dot_dimension_numbers<[1], [0], [0], [1], [0, 0, 1, 1], [], []>} : vector<128x7xf32>, vector<7x128xf32>, vector<128x128xf32> -> vector<128x128xf32>
    %cst_47 = arith.constant dense<0.000000e+00> : vector<128x128xf32>
    %138 = tpu.matmul %1, %134, %cst_47 {dimension_numbers = #tpu.dot_dimension_numbers<[1], [0], [0], [1], [0, 0, 1, 1], [], []>} : vector<128x32xf32>, vector<32x128xf32>, vector<128x128xf32> -> vector<128x128xf32>
    %139 = arith.addf %137, %138 : vector<128x128xf32>
    %140 = arith.negf %139 : vector<128x128xf32>
    %141 = math.exp %140 : vector<128x128xf32>
    %cst_48 = arith.constant 1.000000e+00 : f32
    %142 = vector.broadcast %cst_48 : f32 to vector<128x128xf32>
    %143 = arith.addf %142, %141 : vector<128x128xf32>
    %144 = arith.divf %142, %143 : vector<128x128xf32>
    %145 = vector.extract_strided_slice %144 {offsets = [0, 0], sizes = [32, 128], strides = [1, 1]} : vector<128x128xf32> to vector<32x128xf32>
    %146 = vector.extract_strided_slice %144 {offsets = [32, 0], sizes = [32, 128], strides = [1, 1]} : vector<128x128xf32> to vector<32x128xf32>
    %147 = vector.extract_strided_slice %144 {offsets = [64, 0], sizes = [32, 128], strides = [1, 1]} : vector<128x128xf32> to vector<32x128xf32>
    %cst_49 = arith.constant 2.000000e+00 : f32
    %148 = vector.broadcast %cst_49 : f32 to vector<32x128xf32>
    %149 = arith.mulf %148, %147 : vector<32x128xf32>
    %cst_50 = arith.constant 1.000000e+00 : f32
    %150 = vector.broadcast %cst_50 : f32 to vector<32x128xf32>
    %151 = arith.subf %149, %150 : vector<32x128xf32>
    %152 = vector.extract_strided_slice %144 {offsets = [96, 0], sizes = [32, 128], strides = [1, 1]} : vector<128x128xf32> to vector<32x128xf32>
    %153 = arith.mulf %146, %132 : vector<32x128xf32>
    %154 = arith.mulf %145, %151 : vector<32x128xf32>
    %155 = arith.addf %153, %154 : vector<32x128xf32>
    %156 = math.tanh %155 : vector<32x128xf32>
    %157 = arith.mulf %152, %156 : vector<32x128xf32>
    %c7 = arith.constant 7 : index
    %c0_51 = arith.constant 0 : index
    %c0_52 = arith.constant 0 : index
    %158 = vector.load %arg1[%c7, %c0_51, %c0_52] : memref<8x7x128xf32, #tpu.memory_space<vmem>>, vector<1x7x128xf32>
    %159 = vector.shape_cast %158 : vector<1x7x128xf32> to vector<7x128xf32>
    %cst_53 = arith.constant dense<0.000000e+00> : vector<128x128xf32>
    %160 = tpu.matmul %0, %159, %cst_53 {dimension_numbers = #tpu.dot_dimension_numbers<[1], [0], [0], [1], [0, 0, 1, 1], [], []>} : vector<128x7xf32>, vector<7x128xf32>, vector<128x128xf32> -> vector<128x128xf32>
    %cst_54 = arith.constant dense<0.000000e+00> : vector<128x128xf32>
    %161 = tpu.matmul %1, %157, %cst_54 {dimension_numbers = #tpu.dot_dimension_numbers<[1], [0], [0], [1], [0, 0, 1, 1], [], []>} : vector<128x32xf32>, vector<32x128xf32>, vector<128x128xf32> -> vector<128x128xf32>
    %162 = arith.addf %160, %161 : vector<128x128xf32>
    %163 = arith.negf %162 : vector<128x128xf32>
    %164 = math.exp %163 : vector<128x128xf32>
    %cst_55 = arith.constant 1.000000e+00 : f32
    %165 = vector.broadcast %cst_55 : f32 to vector<128x128xf32>
    %166 = arith.addf %165, %164 : vector<128x128xf32>
    %167 = arith.divf %165, %166 : vector<128x128xf32>
    %168 = vector.extract_strided_slice %167 {offsets = [0, 0], sizes = [32, 128], strides = [1, 1]} : vector<128x128xf32> to vector<32x128xf32>
    %169 = vector.extract_strided_slice %167 {offsets = [32, 0], sizes = [32, 128], strides = [1, 1]} : vector<128x128xf32> to vector<32x128xf32>
    %170 = vector.extract_strided_slice %167 {offsets = [64, 0], sizes = [32, 128], strides = [1, 1]} : vector<128x128xf32> to vector<32x128xf32>
    %cst_56 = arith.constant 2.000000e+00 : f32
    %171 = vector.broadcast %cst_56 : f32 to vector<32x128xf32>
    %172 = arith.mulf %171, %170 : vector<32x128xf32>
    %cst_57 = arith.constant 1.000000e+00 : f32
    %173 = vector.broadcast %cst_57 : f32 to vector<32x128xf32>
    %174 = arith.subf %172, %173 : vector<32x128xf32>
    %175 = vector.extract_strided_slice %167 {offsets = [96, 0], sizes = [32, 128], strides = [1, 1]} : vector<128x128xf32> to vector<32x128xf32>
    %176 = arith.mulf %169, %155 : vector<32x128xf32>
    %177 = arith.mulf %168, %174 : vector<32x128xf32>
    %178 = arith.addf %176, %177 : vector<32x128xf32>
    %179 = math.tanh %178 : vector<32x128xf32>
    %180 = arith.mulf %175, %179 : vector<32x128xf32>
    %c0_58 = arith.constant 0 : index
    %c0_59 = arith.constant 0 : index
    %181 = vector.load %arg4[%c0_58, %c0_59] : memref<128x32xf32, #tpu.memory_space<vmem>>, vector<128x32xf32>
    %cst_60 = arith.constant dense<0.000000e+00> : vector<128x128xf32>
    %182 = tpu.matmul %181, %180, %cst_60 {dimension_numbers = #tpu.dot_dimension_numbers<[1], [0], [0], [1], [0, 0, 1, 1], [], []>} : vector<128x32xf32>, vector<32x128xf32>, vector<128x128xf32> -> vector<128x128xf32>
    %c0_61 = arith.constant 0 : index
    %c0_62 = arith.constant 0 : index
    %183 = vector.load %arg5[%c0_61, %c0_62] : memref<128x1xf32, #tpu.memory_space<vmem>>, vector<128x1xf32>
    %184 = vector.broadcast %183 : vector<128x1xf32> to vector<128x128xf32>
    %185 = arith.addf %182, %184 : vector<128x128xf32>
    %186 = arith.negf %185 : vector<128x128xf32>
    %187 = math.exp %186 : vector<128x128xf32>
    %cst_63 = arith.constant 1.000000e+00 : f32
    %188 = vector.broadcast %cst_63 : f32 to vector<128x128xf32>
    %189 = arith.addf %188, %187 : vector<128x128xf32>
    %190 = arith.divf %188, %189 : vector<128x128xf32>
    %191 = vector.extract_strided_slice %190 {offsets = [0, 0], sizes = [32, 128], strides = [1, 1]} : vector<128x128xf32> to vector<32x128xf32>
    %192 = vector.extract_strided_slice %190 {offsets = [64, 0], sizes = [32, 128], strides = [1, 1]} : vector<128x128xf32> to vector<32x128xf32>
    %cst_64 = arith.constant 2.000000e+00 : f32
    %193 = vector.broadcast %cst_64 : f32 to vector<32x128xf32>
    %194 = arith.mulf %193, %192 : vector<32x128xf32>
    %cst_65 = arith.constant 1.000000e+00 : f32
    %195 = vector.broadcast %cst_65 : f32 to vector<32x128xf32>
    %196 = arith.subf %194, %195 : vector<32x128xf32>
    %197 = vector.extract_strided_slice %190 {offsets = [96, 0], sizes = [32, 128], strides = [1, 1]} : vector<128x128xf32> to vector<32x128xf32>
    %198 = arith.mulf %191, %196 : vector<32x128xf32>
    %199 = math.tanh %198 : vector<32x128xf32>
    %200 = arith.mulf %197, %199 : vector<32x128xf32>
    %c0_66 = arith.constant 0 : index
    %c0_67 = arith.constant 0 : index
    %201 = vector.load %arg6[%c0_66, %c0_67] : memref<6x32xf32, #tpu.memory_space<vmem>>, vector<6x32xf32>
    %cst_68 = arith.constant 0.000000e+00 : f32
    %202 = vector.broadcast %cst_68 : f32 to vector<32x128xf32>
    %203 = arith.maximumf %200, %202 : vector<32x128xf32>
    %cst_69 = arith.constant dense<0.000000e+00> : vector<6x128xf32>
    %204 = tpu.matmul %201, %203, %cst_69 {dimension_numbers = #tpu.dot_dimension_numbers<[1], [0], [0], [1], [0, 0, 1, 1], [], []>} : vector<6x32xf32>, vector<32x128xf32>, vector<6x128xf32> -> vector<6x128xf32>
    %c0_70 = arith.constant 0 : index
    %c0_71 = arith.constant 0 : index
    %205 = vector.load %arg7[%c0_70, %c0_71] : memref<6x1xf32, #tpu.memory_space<vmem>>, vector<6x1xf32>
    %206 = vector.broadcast %205 : vector<6x1xf32> to vector<6x128xf32>
    %207 = arith.addf %204, %206 : vector<6x128xf32>
    %c0_72 = arith.constant 0 : index
    %c0_73 = arith.constant 0 : index
    %208 = vector.load %arg8[%c0_72, %c0_73] : memref<6x128xf32, #tpu.memory_space<vmem>>, vector<6x128xf32>
    tpu.vector_store %arg8[%c0_72, %c0_73], %207 {strides = array<i32>} : memref<6x128xf32, #tpu.memory_space<vmem>>, vector<6x128xf32>,
    return
  }
  func.func @transform_0(%arg0: i32) -> (i32, i32, i32) {
    %c0_i32 = arith.constant 0 : i32
    %c0_i32_0 = arith.constant 0 : i32
    %c0_i32_1 = arith.constant 0 : i32
    return %c0_i32, %c0_i32_0, %arg0 : i32, i32, i32
  }
  func.func @transform_1(%arg0: i32) -> (i32, i32) {
    %c0_i32 = arith.constant 0 : i32
    %c0_i32_0 = arith.constant 0 : i32
    %c0_i32_1 = arith.constant 0 : i32
    return %c0_i32, %c0_i32_0 : i32, i32
  }
  func.func @transform_2(%arg0: i32) -> (i32, i32) {
    %c0_i32 = arith.constant 0 : i32
    %c0_i32_0 = arith.constant 0 : i32
    %c0_i32_1 = arith.constant 0 : i32
    return %c0_i32, %c0_i32_0 : i32, i32
  }
  func.func @transform_3(%arg0: i32) -> (i32, i32) {
    %c0_i32 = arith.constant 0 : i32
    %c0_i32_0 = arith.constant 0 : i32
    %c0_i32_1 = arith.constant 0 : i32
    return %c0_i32, %c0_i32_0 : i32, i32
  }
  func.func @transform_4(%arg0: i32) -> (i32, i32) {
    %c0_i32 = arith.constant 0 : i32
    %c0_i32_0 = arith.constant 0 : i32
    %c0_i32_1 = arith.constant 0 : i32
    return %c0_i32, %c0_i32_0 : i32, i32
  }
  func.func @transform_5(%arg0: i32) -> (i32, i32) {
    %c0_i32 = arith.constant 0 : i32
    %c0_i32_0 = arith.constant 0 : i32
    %c0_i32_1 = arith.constant 0 : i32
    return %c0_i32, %c0_i32_0 : i32, i32
  }
  func.func @transform_6(%arg0: i32) -> (i32, i32) {
    %c0_i32 = arith.constant 0 : i32
    %c0_i32_0 = arith.constant 0 : i32
    %c0_i32_1 = arith.constant 0 : i32
    return %c0_i32, %c0_i32_0 : i32, i32
  }
  func.func @transform_7(%arg0: i32) -> (i32, i32) {
    %c0_i32 = arith.constant 0 : i32
    %c0_i32_0 = arith.constant 0 : i32
    return %c0_i32, %arg0 : i32, i32
  }
}

</mosaic_0001>

<bundles_post_ra>
// kernel: seq2seq_forward.1
= control target key start
LH: loop header
LB: loop body
LE: loop exit
PB: predicated region body
PF: predicated region fallthrough
CT: control target
= control target key end

     0   :  { %s6363_s24 = smov 0   ;;  %s6365_s25 = smov 0   ;;  %s7574_s0 = inlined_call_operand.vmem [shape: f32[8,7,256], index: 0, kind: input, shape index: {}]   ;;  %s7575_s1 = inlined_call_operand.vmem [shape: f32[128,7], index: 1, kind: input, shape index: {}]   ;;  %s7576_s2 = inlined_call_operand.vmem [shape: f32[128,32], index: 2, kind: input, shape index: {}]   ;;  %s7577_s3 = inlined_call_operand.vmem [shape: f32[128,32], index: 3, kind: input, shape index: {}]   ;;  %s7578_s4 = inlined_call_operand.vmem [shape: f32[128,1], index: 4, kind: input, shape index: {}]   ;;  %s7579_s5 = inlined_call_operand.vmem [shape: f32[6,32], index: 5, kind: input, shape index: {}]   ;;  %s7580_s6 = inlined_call_operand.vmem [shape: f32[6,1], index: 6, kind: input, shape index: {}]   ;;  %s7581_s7 = inlined_call_operand.vmem [shape: f32[6,256], index: 7, kind: output, shape index: {}]  }
   0x1   :  { %s6367_s26 = smov 0  }
   0x2 LB: > { %s4173_s27 = sadd.s32 4294967295, %s6317_s26   ;;  %s6380_s28 = sadd.s32 1, %s6317_s26   ;;  %s6317_s26 = sphi %s6367_s26, %s7584_s26   ;;  %s6313_s25 = sphi %s6365_s25, %s7583_s25   ;;  %s6309_s24 = sphi %s6363_s24, %s7582_s24  }
   0x3   : > { %s21_s29 = ssub.s32 %s6317_s26, %s6380_s28  ;;  %s24_s30 = sadd.s32 1, %s6313_s25 }
   0x4   : > { %p22_p0 = scmp.eq.s32.totalorder %s21_s29, 0  ;;  %p31_p1 = scmp.ne.s32.totalorder %s6313_s25, %s6309_s24 }
   0x5   : > { %p32_p2 = scmp.eq.s32.totalorder %s6317_s26, 0  ;;  %p4176_p4 = scmp.ge.s32.totalorder %s6317_s26, 2 }
   0x6   : > { %s6389_s8 = scalar_select %p22_p0, %s6313_s25, %s24_s30  }
   0x7   : > { %p33_p3 = por %p32_p2, %p31_p1  ;;  %227 = sbr.rel (%p4176_p4) target bundleno = 22 (0x16), region = 40 }
   0xe   : > { %230 = sbr.rel (!%p33_p3) target bundleno = 22 (0x16), region = 44  ;;  %s232_s9 = sand.u32 (%p33_p3), 1, %s6313_s25  }
   0xf   : > { %s4178_s10 = sshll.u32 (%p33_p3), %s6317_s26, 3  ;;  %s4177_s11 = sshll.u32 (%p33_p3), %s232_s9, 6 }
  0x10   : > { %s236_s14 = scalar_lea.vmem (%p33_p3), %s7574_s0, %s4178_s10  ;;  %s234_s15 = scalar_lea.vmem (%p33_p3), [#allocation2], %s4177_s11 }
  0x11   : > { %v278_v0 = vld [vmem:[%s236_s14] sm:$0xff] (%p33_p3)  ;;  %v280_v1 = vld [vmem:[%s236_s14 + $0x10] sm:$0xff] (%p33_p3) }
  0x12   : > { %v282_v2 = vld [vmem:[%s236_s14 + $0x20] sm:$0xff] (%p33_p3)  ;;  %279 = vst [vmem:[%s234_s15] sm:$0xff] (%p33_p3), %v278_v0  ;;  %281 = vst [vmem:[%s234_s15 + $0x8] sm:$0xff] (%p33_p3), %v280_v1  ;;  %v284_v3 = vld [vmem:[%s236_s14 + $0x30] sm:$0xff] (%p33_p3) }
  0x13   : > { %283 = vst [vmem:[%s234_s15 + $0x10] sm:$0xff] (%p33_p3), %v282_v2  ;;  %v286_v4 = vld [vmem:[%s236_s14 + $0x40] sm:$0xff] (%p33_p3)  ;;  %v288_v5 = vld [vmem:[%s236_s14 + $0x50] sm:$0xff] (%p33_p3)  ;;  %285 = vst [vmem:[%s234_s15 + $0x18] sm:$0xff] (%p33_p3), %v284_v3 }
  0x14   : > { %287 = vst [vmem:[%s234_s15 + $0x20] sm:$0xff] (%p33_p3), %v286_v4  ;;  %289 = vst [vmem:[%s234_s15 + $0x28] sm:$0xff] (%p33_p3), %v288_v5  ;;  %v290_v6 = vld [vmem:[%s236_s14 + $0x60] sm:$0xff] (%p33_p3)  ;;  %v292_v7 = vld [vmem:[%s236_s14 + $0x70] sm:$0xff] (%p33_p3) }
  0x15   : > { %291 = vst [vmem:[%s234_s15 + $0x30] sm:$0xff] %v290_v6  ;;  %293 = vst [vmem:[%s234_s15 + $0x38] sm:$0xff] %v292_v7 }
  0x16 PF: > { %p4179_p5 = scmp.ge.s32.totalorder %s6317_s26, 1  ;;  %p298_p6 = scmp.lt.s32.totalorder %s6317_s26, 3 }
  0x18   : > { %p299_p7 = pnand %p4179_p5, %p298_p6 }
  0x19   : > { %s305_s16 = sand.u32 (!%p299_p7), 1, %s6309_s24   ;;  %v6403_v8 = vld [vmem:[%s7575_s1] sm:$0xff] (!%p299_p7)  ;;  %vm372_vm0 = vcmask (!%p299_p7), 56320   ;;  %vm421_vm1 = vcmask (!%p299_p7), 1046528   ;;  %v6413_v10 = vld [vmem:[%s7575_s1 + $0x8] sm:$0xff] (!%p299_p7)  ;;  %v6419_v11 = vld [vmem:[%s7575_s1 + $0x10] sm:$0xff] (!%p299_p7) }
  0x1a   : > { %302 = sbr.rel (%p299_p7) target bundleno = 3061 (0xbf5), region = 82  ;;  %s4180_s19 = sshll.u32 (!%p299_p7), %s305_s16, 6  ;;  %4931 = vmatprep.mubr.msk.f32.mxu0 (!%p299_p7), %vm372_vm0, %v6403_v8  ;;  %v6429_v12 = vld [vmem:[%s7575_s1 + $0x18] sm:$0xff] (!%p299_p7)  ;;  %v6434_v13 = vld [vmem:[%s7575_s1 + $0x20] sm:$0xff] (!%p299_p7)  ;;  %v6443_v14 = vld [vmem:[%s7575_s1 + $0x28] sm:$0xff] (!%p299_p7)  ;;  %vm660_vm2 = vcmask (!%p299_p7), 261120  }
  0x1b   : > { %s6407_s20 = scalar_lea.vmem (!%p299_p7), [#allocation2], %s4180_s19  ;;  %v6448_v15 = vld [vmem:[%s7575_s1 + $0x30] sm:$0xff] (!%p299_p7)  ;;  %v6457_v16 = vld [vmem:[%s7575_s1 + $0x38] sm:$0xff] (!%p299_p7)  ;;  %v6462_v17 = vld [vmem:[%s7575_s1 + $0x40] sm:$0xff] (!%p299_p7)  ;;  %vm6321_vm3 = vmmov (!%p299_p7), 0   ;;  %p335_p8 = scmp.lt.s32.totalorder (!%p299_p7), %s4173_s27, 1 }
  0x1c   : > { %v371_v9 = vld [vmem:[%s6407_s20] sm:$0x7f] (!%p299_p7)  ;;  %v6471_v18 = vld [vmem:[%s7575_s1 + $0x48] sm:$0xff] (!%p299_p7)  ;;  %v6476_v19 = vld [vmem:[%s7575_s1 + $0x50] sm:$0xff] (!%p299_p7) }
  0x1d   : > { %4929 = vmatprep.subr.msk.mxu0 (!%p299_p7), %vm421_vm1, %v371_v9  ;;  %v6485_v20 = vld [vmem:[%s7575_s1 + $0x58] sm:$0xff] (!%p299_p7)  ;;  %v6490_v21 = vld [vmem:[%s7575_s1 + $0x60] sm:$0xff] (!%p299_p7)  ;;  %v6499_v22 = vld [vmem:[%s7575_s1 + $0x68] sm:$0xff] (!%p299_p7) }
  0x1e   : > { %4930 = vmatpush3.msk.msra.mxu0 (!%p299_p7), %vm421_vm1, %v371_v9  ;;  %v6504_v23 = vld [vmem:[%s7575_s1 + $0x70] sm:$0xff] (!%p299_p7)  ;;  %v6513_v24 = vld [vmem:[%s7575_s1 + $0x78] sm:$0xff] (!%p299_p7)  ;;  %v6520_v25 = vld [vmem:[%s7576_s2] sm:$0xff] (!%p299_p7) }
  0x1f   : > { %4932 = vmatmul.mubr.msk.f32.vlgmr.msra.gmra.mrb[0].mxu0 (!%p299_p7), %vm372_vm0, %v6413_v10  ;;  %4963 = vmatprep.mubr.msk.f32.mxu1 (!%p299_p7), %vm660_vm2, %v6520_v25 }
  0x20   : > { %4934 = vmatprep.mubr.msk.f32.mxu0 (!%p299_p7), %vm372_vm0, %v6419_v11 }
  0x21   : > { %s7586_s27 = smov (!%p335_p8, %s4173_s27), 1 }
  0x22   : > { %s4181_s30 = sshll.u32 %s7586_s27, 3 }
  0x23   : > { %4935 = vmatmul.mubr.msk.f32.gmra.mrb[2].mxu0 %vm372_vm0, %v6429_v12  ;;  %s338_s11 = scalar_lea.vmem %s7581_s7, %s4181_s30 }
  0x24   : > { %4937 = vmatprep.mubr.msk.f32.mxu0 %vm372_vm0, %v6434_v13 }
  0x27   : > { %4938 = vmatmul.mubr.msk.f32.gmra.mrb[4].mxu0 %vm372_vm0, %v6443_v14 }
  0x28   : > { %4940 = vmatprep.mubr.msk.f32.mxu0 %vm372_vm0, %v6448_v15 }
  0x2b   : > { %4941 = vmatmul.mubr.msk.f32.gmra.mrb[6].mxu0 %vm372_vm0, %v6457_v16 }
  0x2c   : > { %4943 = vmatprep.mubr.msk.f32.mxu0 %vm372_vm0, %v6462_v17 }
  0x2f   : > { %4944 = vmatmul.mubr.msk.f32.gmra.mrb[8].mxu0 %vm372_vm0, %v6471_v18 }
  0x30   : > { %4946 = vmatprep.mubr.msk.f32.mxu0 %vm372_vm0, %v6476_v19 }
  0x33   : > { %4947 = vmatmul.mubr.msk.f32.gmra.mrb[10].mxu0 %vm372_vm0, %v6485_v20 }
  0x34   : > { %4949 = vmatprep.mubr.msk.f32.mxu0 %vm372_vm0, %v6490_v21 }
  0x37   : > { %4950 = vmatmul.mubr.msk.f32.gmra.mrb[12].mxu0 %vm372_vm0, %v6499_v22 }
  0x38   : > { %4952 = vmatprep.mubr.msk.f32.mxu0 %vm372_vm0, %v6504_v23 }
  0x3b   : > { %4953 = vmatmul.mubr.msk.f32.gmra.mrb[14].mxu0 %vm372_vm0, %v6513_v24 }
  0x3c   : > { %5021 = vmatprep.mubr.msk.f32.mxu0 %vm660_vm2, %v6520_v25 }
  0xf2   : > { %v4933_v26 = vpop.f32.mrb[0].mxu0 }
  0xf3   : > { %v491_v27 = vpop.f32.mrb[1].mxu0  ;;  %v4200_v30 = vmul.f32 -1.442695, %v4933_v26 }
  0xf4   : > { %v4199_v35 = vmul.f32 -1.442695, %v491_v27 }
  0xf5   : > { %5616 = vpow2.f32 %v4200_v30 }
  0xf6   : > { %v4936_v28 = vpop.f32.mrb[2].mxu0  ;;  %5618 = vpow2.f32 %v4199_v35 }
  0xf7   : > { %v501_v29 = vpop.f32.mrb[3].mxu0  ;;  %v4202_v36 = vmul.f32 -1.442695, %v4936_v28 }
  0xf8   : > { %v4201_v38 = vmul.f32 -1.442695, %v501_v29 }
  0xfa   : > { %v4939_v31 = vpop.f32.mrb[4].mxu0 }
  0xfb   : > { %v511_v32 = vpop.f32.mrb[5].mxu0 }
  0xfe   : > { %v4942_v33 = vpop.f32.mrb[6].mxu0 }
  0xff   : > { %v519_v34 = vpop.f32.mrb[7].mxu0  ;;  %v5617_v45 = vpop.eup %5616 }
 0x100   : > { %v603_v48 = vadd.f32 1.0, %v5617_v45  ;;  %v5619_v52 = vpop.eup %5618 }
 0x101   : > { %v602_v2 = vadd.f32 1.0, %v5619_v52 }
 0x102   : > { %v4945_v37 = vpop.f32.mrb[8].mxu0 }
 0x103   : > { %v4204_v39 = vmul.f32 -1.442695, %v4945_v37  ;;  %v527_v40 = vpop.f32.mrb[9].mxu0 }
 0x104   : > { %v4203_v41 = vmul.f32 -1.442695, %v527_v40 }
 0x105   : > { %5620 = vpow2.f32 %v4204_v39 }
 0x106   : > { %5622 = vpow2.f32 %v4202_v36  ;;  %v4948_v42 = vpop.f32.mrb[10].mxu0 }
 0x107   : > { %5624 = vpow2.f32 %v4201_v38  ;;  %v4206_v43 = vmul.f32 -1.442695, %v4948_v42  ;;  %v537_v44 = vpop.f32.mrb[11].mxu0 }
 0x108   : > { %5626 = vpow2.f32 %v4203_v41  ;;  %v4205_v46 = vmul.f32 -1.442695, %v537_v44 }
 0x109   : > { %5628 = vpow2.f32 %v4206_v43 }
 0x10a   : > { %5630 = vpow2.f32 %v4205_v46  ;;  %v4951_v47 = vpop.f32.mrb[12].mxu0 }
 0x10b   : > { %v547_v49 = vpop.f32.mrb[13].mxu0  ;;  %v4208_v50 = vmul.f32 -1.442695, %v4951_v47  ;;  %5632 = vrcp.f32 %v603_v48 }
 0x10c   : > { %v4207_v51 = vmul.f32 -1.442695, %v547_v49 }
 0x10d   : > { %5634 = vpow2.f32 %v4208_v50 }
 0x10e   : > { %v4954_v53 = vpop.f32.mrb[14].mxu0  ;;  %5636 = vpow2.f32 %v4207_v51 }
 0x10f   : > { %v5621_v54 = vpop.eup %5620  ;;  %v4210_v55 = vmul.f32 -1.442695, %v4954_v53  ;;  %v557_v56 = vpop.f32.mrb[15].mxu0 }
 0x110   : > { %v5623_v57 = vpop.eup %5622  ;;  %v607_v58 = vadd.f32 1.0, %v5621_v54  ;;  %v4209_v59 = vmul.f32 -1.442695, %v557_v56 }
 0x111   : > { %v5625_v60 = vpop.eup %5624  ;;  %v605_v4 = vadd.f32 1.0, %v5623_v57 }
 0x112   : > { %v5627_v61 = vpop.eup %5626  ;;  %5638 = vrcp.f32 %v607_v58  ;;  %v604_v5 = vadd.f32 1.0, %v5625_v60 }
 0x113   : > { %v5629_v62 = vpop.eup %5628  ;;  %v606_v63 = vadd.f32 1.0, %v5627_v61  ;;  %5640 = vpow2.f32 %v4210_v55 }
 0x114   : > { %v5631_v0 = vpop.eup %5630  ;;  %v609_v1 = vadd.f32 1.0, %v5629_v62  ;;  %5642 = vpow2.f32 %v4209_v59 }
 0x115   : > { %5644 = vrcp.f32 %v606_v63  ;;  %v608_v3 = vadd.f32 1.0, %v5631_v0  ;;  %v5633_v6 = vpop.eup %5632 }
 0x116   : > { %5646 = vrcp.f32 %v609_v1  ;;  %v4215_v1 = vld [vmem:[%s6407_s20 + $0x8] sm:$0x7f] }
 0x117   : > { %5648 = vrcp.f32 %v608_v3  ;;  %v5635_v7 = vpop.eup %5634  ;;  %v6547_v3 = vld [vmem:[%s7576_s2 + $0x10] sm:$0xff] }
 0x118   : > { %5650 = vrcp.f32 %v602_v2  ;;  %v5637_v9 = vpop.eup %5636  ;;  %v611_v29 = vadd.f32 1.0, %v5635_v7  ;;  %v6542_v2 = vld [vmem:[%s7576_s2 + $0x8] sm:$0xff]  ;;  %v6577_v7 = vld [vmem:[%s7576_s2 + $0x30] sm:$0xff] }
 0x119   : > { %5652 = vrcp.f32 %v605_v4  ;;  %v610_v31 = vadd.f32 1.0, %v5637_v9  ;;  %v6557_v4 = vld [vmem:[%s7576_s2 + $0x18] sm:$0xff] }
 0x11a   : > { %5654 = vrcp.f32 %v604_v5  ;;  %v6563_v5 = vld [vmem:[%s7576_s2 + $0x20] sm:$0xff]  ;;  %v6586_v9 = vld [vmem:[%s7576_s2 + $0x38] sm:$0xff] }
 0x11b   : > { %5656 = vrcp.f32 %v611_v29  ;;  %v6614_v29 = vld [vmem:[%s7576_s2 + $0x58] sm:$0xff] }
 0x11c   : > { %v5639_v26 = vpop.eup %5638  ;;  %5658 = vrcp.f32 %v610_v31  ;;  %v6628_v31 = vld [vmem:[%s7576_s2 + $0x68] sm:$0xff] }
 0x11d   : > { %v5641_v27 = vpop.eup %5640  ;;  %v639_v28 = vmul.f32 2.0, %v5639_v26  ;;  %v6591_v26 = vld [vmem:[%s7576_s2 + $0x40] sm:$0xff] }
 0x11e   : > { %v5643_v30 = vpop.eup %5642  ;;  %v613_v36 = vadd.f32 1.0, %v5641_v27  ;;  %v6600_v27 = vld [vmem:[%s7576_s2 + $0x48] sm:$0xff] }
 0x11f   : > { %v5645_v32 = vpop.eup %5644  ;;  %v4212_v33 = vadd.f32 -1.0, %v639_v28  ;;  %v612_v40 = vadd.f32 1.0, %v5643_v30  ;;  %v6605_v28 = vld [vmem:[%s7576_s2 + $0x50] sm:$0xff]  ;;  %v6619_v30 = vld [vmem:[%s7576_s2 + $0x60] sm:$0xff] }
 0x120   : > { %v5647_v34 = vpop.eup %5646  ;;  %v638_v35 = vmul.f32 2.0, %v5645_v32  ;;  %v6633_v32 = vld [vmem:[%s7576_s2 + $0x70] sm:$0xff] }
 0x121   : > { %v5649_v37 = vpop.eup %5648  ;;  %v6526_v38 = vmul.f32 %v5633_v6, %v4212_v33  ;;  %v641_v39 = vmul.f32 2.0, %v5647_v34  ;;  %v6572_v6 = vld [vmem:[%s7576_s2 + $0x28] sm:$0xff]  ;;  %v6642_v33 = vld [vmem:[%s7576_s2 + $0x78] sm:$0xff] }
 0x122   : > { %v4211_v41 = vadd.f32 -1.0, %v638_v35  ;;  %v640_v42 = vmul.f32 2.0, %v5649_v37  ;;  %v5651_v43 = vpop.eup %5650 }
 0x123   : > { %5660 = vtanh.f32 %v6526_v38  ;;  %v4214_v44 = vadd.f32 -1.0, %v641_v39  ;;  %v5653_v45 = vpop.eup %5652 }
 0x124   : > { %v6529_v46 = vmul.f32 %v5651_v43, %v4211_v41  ;;  %v4213_v47 = vadd.f32 -1.0, %v640_v42  ;;  %5662 = vrcp.f32 %v613_v36  ;;  %v5655_v48 = vpop.eup %5654 }
 0x125   : > { %v6531_v49 = vmul.f32 %v5653_v45, %v4214_v44  ;;  %5664 = vrcp.f32 %v612_v40  ;;  %v5657_v51 = vpop.eup %5656 }
 0x126   : > { %5666 = vtanh.f32 %v6529_v46  ;;  %v6534_v50 = vmul.f32 %v5655_v48, %v4213_v47  ;;  %v5659_v52 = vpop.eup %5658 }
 0x127   : > { %5668 = vtanh.f32 %v6531_v49 }
 0x128   : > { %5670 = vtanh.f32 %v6534_v50 }
 0x12d   : > { %v5661_v53 = vpop.eup %5660 }
 0x12e   : > { %v5663_v54 = vpop.eup %5662  ;;  %v655_v56 = vmul.f32 %v5661_v53, %v5657_v51 }
 0x12f   : > { %v5665_v55 = vpop.eup %5664 }
 0x130   : > { %v5667_v57 = vpop.eup %5666 }
 0x131   : > { %v5669_v58 = vpop.eup %5668  ;;  %v654_v59 = vmul.f32 %v5667_v57, %v5659_v52 }
 0x132   : > { %v5671_v60 = vpop.eup %5670  ;;  %v657_v61 = vmul.f32 %v5669_v58, %v5663_v54 }
 0x133   : > { %v5404_v62 = vpack.c.bf16 %v655_v56, %v654_v59  ;;  %v656_v63 = vmul.f32 %v5671_v60, %v5665_v55 }
 0x135   : > { %5405 = vmatprep.subr.bf16.mxu1 %v5404_v62  ;;  %v5408_v0 = vpack.c.bf16 %v657_v61, %v656_v63 }
 0x136   : > { %5407 = vmatpush3.bf16.msra.mxu1 %v5404_v62 }
 0x137   : > { %5409 = vmatprep.subr.bf16.mxu1 %v5408_v0 }
 0x13a   : > { %5411 = vmatpush3.bf16.msra.mxu1 %v5408_v0 }
 0x13b   : > { %4987 = vmatprep.subr.msk.mxu1 %vm421_vm1, %v4215_v1 }
 0x13d   : > { %4964 = vmatmul.mubr.msk.f32.vlgmr.msra.gmra.mrb[0].mxu1 %vm660_vm2, %v6542_v2 }
 0x13e   : > { %4966 = vmatprep.mubr.msk.f32.mxu1 %vm660_vm2, %v6547_v3  ;;  %4988 = vmatpush3.msk.msra.mxu1 %vm421_vm1, %v4215_v1 }
 0x141   : > { %4967 = vmatmul.mubr.msk.f32.gmra.mrb[2].mxu1 %vm660_vm2, %v6557_v4 }
 0x142   : > { %4969 = vmatprep.mubr.msk.f32.mxu1 %vm660_vm2, %v6563_v5 }
 0x145   : > { %4970 = vmatmul.mubr.msk.f32.gmra.mrb[4].mxu1 %vm660_vm2, %v6572_v6 }
 0x146   : > { %4972 = vmatprep.mubr.msk.f32.mxu1 %vm660_vm2, %v6577_v7 }
 0x149   : > { %4973 = vmatmul.mubr.msk.f32.gmra.mrb[6].mxu1 %vm660_vm2, %v6586_v9 }
 0x14a   : > { %4975 = vmatprep.mubr.msk.f32.mxu1 %vm660_vm2, %v6591_v26 }
 0x14d   : > { %4976 = vmatmul.mubr.msk.f32.gmra.mrb[8].mxu1 %vm660_vm2, %v6600_v27 }
 0x14e   : > { %4978 = vmatprep.mubr.msk.f32.mxu1 %vm660_vm2, %v6605_v28 }
 0x151   : > { %4979 = vmatmul.mubr.msk.f32.gmra.mrb[10].mxu1 %vm660_vm2, %v6614_v29 }
 0x152   : > { %4981 = vmatprep.mubr.msk.f32.mxu1 %vm660_vm2, %v6619_v30 }
 0x155   : > { %4982 = vmatmul.mubr.msk.f32.gmra.mrb[12].mxu1 %vm660_vm2, %v6628_v31 }
 0x156   : > { %4984 = vmatprep.mubr.msk.f32.mxu1 %vm660_vm2, %v6633_v32 }
 0x159   : > { %4985 = vmatmul.mubr.msk.f32.gmra.mrb[14].mxu1 %vm660_vm2, %v6642_v33 }
 0x15a   : > { %4989 = vmatprep.mubr.msk.f32.mxu1 %vm372_vm0, %v6403_v8 }
 0x15d   : > { %4990 = vmatmul.mubr.msk.f32.vlgmr.msra.gmra.mrb[0].mxu1 %vm372_vm0, %v6413_v10 }
 0x15e   : > { %4992 = vmatprep.mubr.msk.f32.mxu1 %vm372_vm0, %v6419_v11 }
 0x161   : > { %4993 = vmatmul.mubr.msk.f32.gmra.mrb[2].mxu1 %vm372_vm0, %v6429_v12 }
 0x162   : > { %4995 = vmatprep.mubr.msk.f32.mxu1 %vm372_vm0, %v6434_v13 }
 0x165   : > { %4996 = vmatmul.mubr.msk.f32.gmra.mrb[4].mxu1 %vm372_vm0, %v6443_v14 }
 0x166   : > { %4998 = vmatprep.mubr.msk.f32.mxu1 %vm372_vm0, %v6448_v15 }
 0x169   : > { %4999 = vmatmul.mubr.msk.f32.gmra.mrb[6].mxu1 %vm372_vm0, %v6457_v16 }
 0x16a   : > { %5001 = vmatprep.mubr.msk.f32.mxu1 %vm372_vm0, %v6462_v17 }
 0x16d   : > { %5002 = vmatmul.mubr.msk.f32.gmra.mrb[8].mxu1 %vm372_vm0, %v6471_v18 }
 0x16e   : > { %5004 = vmatprep.mubr.msk.f32.mxu1 %vm372_vm0, %v6476_v19 }
 0x171   : > { %5005 = vmatmul.mubr.msk.f32.gmra.mrb[10].mxu1 %vm372_vm0, %v6485_v20 }
 0x172   : > { %5007 = vmatprep.mubr.msk.f32.mxu1 %vm372_vm0, %v6490_v21 }
 0x175   : > { %5008 = vmatmul.mubr.msk.f32.gmra.mrb[12].mxu1 %vm372_vm0, %v6499_v22 }
 0x176   : > { %5010 = vmatprep.mubr.msk.f32.mxu1 %vm372_vm0, %v6504_v23 }
 0x179   : > { %5011 = vmatmul.mubr.msk.f32.gmra.mrb[14].mxu1 %vm372_vm0, %v6513_v24 }
 0x17a   : > { %5079 = vmatprep.mubr.msk.f32.mxu1 %vm660_vm2, %v6520_v25 }
 0x230   : > { %v4991_v34 = vpop.f32.mrb[0].mxu1 }
 0x231   : > { %v923_v35 = vpop.f32.mrb[1].mxu1  ;;  %v4250_v39 = vmul.f32 -1.442695, %v4991_v34 }
 0x232   : > { %v4249_v40 = vmul.f32 -1.442695, %v923_v35 }
 0x233   : > { %5672 = vpow2.f32 %v4250_v39 }
 0x234   : > { %v4994_v36 = vpop.f32.mrb[2].mxu1  ;;  %5674 = vpow2.f32 %v4249_v40 }
 0x235   : > { %v933_v37 = vpop.f32.mrb[3].mxu1  ;;  %v4252_v41 = vmul.f32 -1.442695, %v4994_v36 }
 0x236   : > { %v4251_v60 = vmul.f32 -1.442695, %v933_v37 }
 0x237   : > { %5676 = vpow2.f32 %v4252_v41 }
 0x238   : > { %v4997_v42 = vpop.f32.mrb[4].mxu1 }
 0x239   : > { %v4254_v43 = vmul.f32 -1.442695, %v4997_v42  ;;  %v943_v44 = vpop.f32.mrb[5].mxu1 }
 0x23a   : > { %v4253_v45 = vmul.f32 -1.442695, %v943_v44 }
 0x23b   : > { %5678 = vpow2.f32 %v4254_v43 }
 0x23c   : > { %v5000_v47 = vpop.f32.mrb[6].mxu1  ;;  %5680 = vpow2.f32 %v4253_v45 }
 0x23d   : > { %v953_v48 = vpop.f32.mrb[7].mxu1  ;;  %v4256_v51 = vmul.f32 -1.442695, %v5000_v47  ;;  %v5673_v56 = vpop.eup %5672 }
 0x23e   : > { %v4255_v57 = vmul.f32 -1.442695, %v953_v48  ;;  %v5675_v59 = vpop.eup %5674  ;;  %v1051_v34 = vadd.f32 1.0, %v5673_v56 }
 0x23f   : > { %v1050_v36 = vadd.f32 1.0, %v5675_v59 }
 0x240   : > { %v5003_v52 = vpop.f32.mrb[8].mxu1 }
 0x241   : > { %v4258_v53 = vmul.f32 -1.442695, %v5003_v52  ;;  %v963_v54 = vpop.f32.mrb[9].mxu1  ;;  %v5677_v63 = vpop.eup %5676 }
 0x242   : > { %v4257_v55 = vmul.f32 -1.442695, %v963_v54  ;;  %v1053_v40 = vadd.f32 1.0, %v5677_v63 }
 0x243   : > { %5682 = vpow2.f32 %v4258_v53 }
 0x244   : > { %5684 = vpow2.f32 %v4256_v51  ;;  %v5006_v58 = vpop.f32.mrb[10].mxu1 }
 0x245   : > { %v4260_v61 = vmul.f32 -1.442695, %v5006_v58  ;;  %v973_v62 = vpop.f32.mrb[11].mxu1  ;;  %5686 = vpow2.f32 %v4257_v55  ;;  %v5679_v1 = vpop.eup %5678 }
 0x246   : > { %v4259_v0 = vmul.f32 -1.442695, %v973_v62  ;;  %v5681_v35 = vpop.eup %5680  ;;  %v1055_v42 = vadd.f32 1.0, %v5679_v1 }
 0x247   : > { %5688 = vpow2.f32 %v4260_v61  ;;  %v1054_v43 = vadd.f32 1.0, %v5681_v35 }
 0x248   : > { %5690 = vpow2.f32 %v4255_v57  ;;  %v5009_v39 = vpop.f32.mrb[12].mxu1 }
 0x249   : > { %5692 = vpow2.f32 %v4251_v60  ;;  %v983_v41 = vpop.f32.mrb[13].mxu1  ;;  %v4262_v45 = vmul.f32 -1.442695, %v5009_v39 }
 0x24a   : > { %5694 = vpow2.f32 %v4259_v0  ;;  %v4261_v52 = vmul.f32 -1.442695, %v983_v41 }
 0x24b   : > { %5696 = vrcp.f32 %v1051_v34 }
 0x24c   : > { %5698 = vrcp.f32 %v1050_v36  ;;  %v5012_v37 = vpop.f32.mrb[14].mxu1 }
 0x24d   : > { %v5683_v44 = vpop.eup %5682  ;;  %5700 = vrcp.f32 %v1053_v40  ;;  %v993_v47 = vpop.f32.mrb[15].mxu1  ;;  %v4264_v59 = vmul.f32 -1.442695, %v5012_v37 }
 0x24e   : > { %v5685_v48 = vpop.eup %5684  ;;  %5702 = vrcp.f32 %v1055_v42  ;;  %v1059_v51 = vadd.f32 1.0, %v5683_v44  ;;  %v4263_v62 = vmul.f32 -1.442695, %v993_v47 }
 0x24f   : > { %5704 = vrcp.f32 %v1054_v43  ;;  %v5687_v53 = vpop.eup %5686  ;;  %v1057_v55 = vadd.f32 1.0, %v5685_v48 }
 0x250   : > { %5706 = vrcp.f32 %v1059_v51  ;;  %v1058_v56 = vadd.f32 1.0, %v5687_v53 }
 0x251   : > { %v5689_v54 = vpop.eup %5688  ;;  %5708 = vpow2.f32 %v4262_v45 }
 0x252   : > { %v5691_v57 = vpop.eup %5690  ;;  %v1061_v58 = vadd.f32 1.0, %v5689_v54  ;;  %5710 = vpow2.f32 %v4261_v52 }
 0x253   : > { %v5693_v60 = vpop.eup %5692  ;;  %5712 = vrcp.f32 %v1058_v56  ;;  %v1056_v0 = vadd.f32 1.0, %v5691_v57 }
 0x254   : > { %v5695_v61 = vpop.eup %5694  ;;  %5714 = vrcp.f32 %v1061_v58  ;;  %v1052_v36 = vadd.f32 1.0, %v5693_v60 }
 0x255   : > { %v5697_v63 = vpop.eup %5696  ;;  %5716 = vrcp.f32 %v1057_v55  ;;  %v1060_v1 = vadd.f32 1.0, %v5695_v61 }
 0x256   : > { %v5699_v34 = vpop.eup %5698  ;;  %5718 = vpow2.f32 %v4264_v59 }
 0x257   : > { %v5701_v35 = vpop.eup %5700  ;;  %5720 = vrcp.f32 %v1060_v1 }
 0x258   : > { %v5703_v39 = vpop.eup %5702  ;;  %5722 = vpow2.f32 %v4263_v62 }
 0x259   : > { %v5705_v40 = vpop.eup %5704  ;;  %5724 = vrcp.f32 %v1056_v0  ;;  %v1107_v52 = vmul.f32 %v5703_v39, %v6526_v38 }
 0x25a   : > { %v5707_v41 = vpop.eup %5706  ;;  %5726 = vrcp.f32 %v1052_v36  ;;  %v1106_v0 = vmul.f32 %v5705_v40, %v6529_v46 }
 0x25b   : > { %v5709_v42 = vpop.eup %5708  ;;  %v1099_v43 = vmul.f32 2.0, %v5707_v41 }
 0x25c   : > { %v5711_v37 = vpop.eup %5710  ;;  %v1063_v57 = vadd.f32 1.0, %v5709_v42 }
 0x25d   : > { %v5713_v44 = vpop.eup %5712  ;;  %v4266_v45 = vadd.f32 -1.0, %v1099_v43  ;;  %v1062_v61 = vadd.f32 1.0, %v5711_v37 }
 0x25e   : > { %v5715_v47 = vpop.eup %5714  ;;  %v1098_v48 = vmul.f32 2.0, %v5713_v44 }
 0x25f   : > { %v5717_v51 = vpop.eup %5716  ;;  %v1111_v53 = vmul.f32 %v5697_v63, %v4266_v45  ;;  %v1101_v54 = vmul.f32 2.0, %v5715_v47 }
 0x260   : > { %v5719_v55 = vpop.eup %5718  ;;  %v4265_v56 = vadd.f32 -1.0, %v1098_v48  ;;  %v1109_v38 = vmul.f32 %v5717_v51, %v6531_v49 }
 0x261   : > { %v5721_v58 = vpop.eup %5720  ;;  %v6681_v59 = vadd.f32 %v1111_v53, %v1107_v52  ;;  %v4268_v60 = vadd.f32 -1.0, %v1101_v54  ;;  %v1065_v42 = vadd.f32 1.0, %v5719_v55 }
 0x262   : > { %v5723_v62 = vpop.eup %5722  ;;  %v1110_v1 = vmul.f32 %v5699_v34, %v4265_v56  ;;  %v1100_v36 = vmul.f32 2.0, %v5721_v58 }
 0x263   : > { %v5725_v41 = vpop.eup %5724  ;;  %5728 = vtanh.f32 %v6681_v59  ;;  %v1113_v63 = vmul.f32 %v5701_v35, %v4268_v60  ;;  %v1064_v37 = vadd.f32 1.0, %v5723_v62 }
 0x264   : > { %v6686_v39 = vadd.f32 %v1110_v1, %v1106_v0  ;;  %v4267_v43 = vadd.f32 -1.0, %v1100_v36  ;;  %5730 = vrcp.f32 %v1063_v57  ;;  %v5727_v44 = vpop.eup %5726  ;;  %v1108_v46 = vmul.f32 %v5725_v41, %v6534_v50 }
 0x265   : > { %v6688_v45 = vadd.f32 %v1113_v63, %v1109_v38  ;;  %5732 = vrcp.f32 %v1062_v61  ;;  %v4269_v61 = vld [vmem:[%s6407_s20 + $0x10] sm:$0x7f] }
 0x266   : > { %5734 = vtanh.f32 %v6686_v39  ;;  %v1112_v34 = vmul.f32 %v5727_v44, %v4267_v43 }
 0x267   : > { %5736 = vtanh.f32 %v6688_v45 }
 0x268   : > { %v6693_v40 = vadd.f32 %v1112_v34, %v1108_v46  ;;  %5738 = vrcp.f32 %v1065_v42 }
 0x269   : > { %5740 = vrcp.f32 %v1064_v37 }
 0x26a   : > { %5742 = vtanh.f32 %v6693_v40 }
 0x26d   : > { %v5729_v49 = vpop.eup %5728 }
 0x26e   : > { %v5731_v35 = vpop.eup %5730 }
 0x26f   : > { %v5733_v47 = vpop.eup %5732  ;;  %v1123_v48 = vmul.f32 %v5731_v35, %v5729_v49 }
 0x270   : > { %v5735_v51 = vpop.eup %5734 }
 0x271   : > { %v5737_v52 = vpop.eup %5736  ;;  %v1122_v53 = vmul.f32 %v5735_v51, %v5733_v47 }
 0x272   : > { %v5739_v54 = vpop.eup %5738 }
 0x273   : > { %v5741_v55 = vpop.eup %5740  ;;  %v5412_v50 = vpack.c.bf16 %v1123_v48, %v1122_v53  ;;  %v1125_v56 = vmul.f32 %v5739_v54, %v5737_v52 }
 0x274   : > { %v5743_v57 = vpop.eup %5742 }
 0x275   : > { %5413 = vmatprep.subr.bf16.mxu0 %v5412_v50  ;;  %v1124_v58 = vmul.f32 %v5743_v57, %v5741_v55 }
 0x276   : > { %5415 = vmatpush3.bf16.msra.mxu0 %v5412_v50 }
 0x277   : > { %v5416_v60 = vpack.c.bf16 %v1125_v56, %v1124_v58 }
 0x279   : > { %5417 = vmatprep.subr.bf16.mxu0 %v5416_v60 }
 0x27a   : > { %5419 = vmatpush3.bf16.msra.mxu0 %v5416_v60 }
 0x27b   : > { %5045 = vmatprep.subr.msk.mxu0 %vm421_vm1, %v4269_v61 }
 0x27d   : > { %5022 = vmatmul.mubr.msk.f32.vlgmr.msra.gmra.mrb[16].mxu0 %vm660_vm2, %v6542_v2 }
 0x27e   : > { %5024 = vmatprep.mubr.msk.f32.mxu0 %vm660_vm2, %v6547_v3  ;;  %5046 = vmatpush3.msk.msra.mxu0 %vm421_vm1, %v4269_v61 }
 0x281   : > { %5025 = vmatmul.mubr.msk.f32.gmra.mrb[18].mxu0 %vm660_vm2, %v6557_v4 }
 0x282   : > { %5027 = vmatprep.mubr.msk.f32.mxu0 %vm660_vm2, %v6563_v5 }
 0x285   : > { %5028 = vmatmul.mubr.msk.f32.gmra.mrb[20].mxu0 %vm660_vm2, %v6572_v6 }
 0x286   : > { %5030 = vmatprep.mubr.msk.f32.mxu0 %vm660_vm2, %v6577_v7 }
 0x289   : > { %5031 = vmatmul.mubr.msk.f32.gmra.mrb[22].mxu0 %vm660_vm2, %v6586_v9 }
 0x28a   : > { %5033 = vmatprep.mubr.msk.f32.mxu0 %vm660_vm2, %v6591_v26 }
 0x28d   : > { %5034 = vmatmul.mubr.msk.f32.gmra.mrb[24].mxu0 %vm660_vm2, %v6600_v27 }
 0x28e   : > { %5036 = vmatprep.mubr.msk.f32.mxu0 %vm660_vm2, %v6605_v28 }
 0x291   : > { %5037 = vmatmul.mubr.msk.f32.gmra.mrb[26].mxu0 %vm660_vm2, %v6614_v29 }
 0x292   : > { %5039 = vmatprep.mubr.msk.f32.mxu0 %vm660_vm2, %v6619_v30 }
 0x295   : > { %5040 = vmatmul.mubr.msk.f32.gmra.mrb[28].mxu0 %vm660_vm2, %v6628_v31 }
 0x296   : > { %5042 = vmatprep.mubr.msk.f32.mxu0 %vm660_vm2, %v6633_v32 }
 0x299   : > { %5043 = vmatmul.mubr.msk.f32.gmra.mrb[30].mxu0 %vm660_vm2, %v6642_v33 }
 0x29a   : > { %5047 = vmatprep.mubr.msk.f32.mxu0 %vm372_vm0, %v6403_v8 }
 0x29d   : > { %5048 = vmatmul.mubr.msk.f32.vlgmr.msra.gmra.mrb[16].mxu0 %vm372_vm0, %v6413_v10 }
 0x29e   : > { %5050 = vmatprep.mubr.msk.f32.mxu0 %vm372_vm0, %v6419_v11 }
 0x2a1   : > { %5051 = vmatmul.mubr.msk.f32.gmra.mrb[18].mxu0 %vm372_vm0, %v6429_v12 }
 0x2a2   : > { %5053 = vmatprep.mubr.msk.f32.mxu0 %vm372_vm0, %v6434_v13 }
 0x2a5   : > { %5054 = vmatmul.mubr.msk.f32.gmra.mrb[20].mxu0 %vm372_vm0, %v6443_v14 }
 0x2a6   : > { %5056 = vmatprep.mubr.msk.f32.mxu0 %vm372_vm0, %v6448_v15 }
 0x2a9   : > { %5057 = vmatmul.mubr.msk.f32.gmra.mrb[22].mxu0 %vm372_vm0, %v6457_v16 }
 0x2aa   : > { %5059 = vmatprep.mubr.msk.f32.mxu0 %vm372_vm0, %v6462_v17 }
 0x2ad   : > { %5060 = vmatmul.mubr.msk.f32.gmra.mrb[24].mxu0 %vm372_vm0, %v6471_v18 }
 0x2ae   : > { %5062 = vmatprep.mubr.msk.f32.mxu0 %vm372_vm0, %v6476_v19 }
 0x2b1   : > { %5063 = vmatmul.mubr.msk.f32.gmra.mrb[26].mxu0 %vm372_vm0, %v6485_v20 }
 0x2b2   : > { %5065 = vmatprep.mubr.msk.f32.mxu0 %vm372_vm0, %v6490_v21 }
 0x2b5   : > { %5066 = vmatmul.mubr.msk.f32.gmra.mrb[28].mxu0 %vm372_vm0, %v6499_v22 }
 0x2b6   : > { %5068 = vmatprep.mubr.msk.f32.mxu0 %vm372_vm0, %v6504_v23 }
 0x2b9   : > { %5069 = vmatmul.mubr.msk.f32.gmra.mrb[30].mxu0 %vm372_vm0, %v6513_v24 }
 0x2ba   : > { %5137 = vmatprep.mubr.msk.f32.mxu0 %vm660_vm2, %v6520_v25 }
 0x370   : > { %v5049_v8 = vpop.f32.mrb[16].mxu0 }
 0x371   : > { %v1342_v10 = vpop.f32.mrb[17].mxu0  ;;  %v4304_v13 = vmul.f32 -1.442695, %v5049_v8 }
 0x372   : > { %v4303_v14 = vmul.f32 -1.442695, %v1342_v10 }
 0x373   : > { %5744 = vpow2.f32 %v4304_v13 }
 0x374   : > { %v5052_v11 = vpop.f32.mrb[18].mxu0  ;;  %5746 = vpow2.f32 %v4303_v14 }
 0x375   : > { %v1352_v12 = vpop.f32.mrb[19].mxu0  ;;  %v4306_v15 = vmul.f32 -1.442695, %v5052_v11 }
 0x376   : > { %v4305_v38 = vmul.f32 -1.442695, %v1352_v12 }
 0x377   : > { %5748 = vpow2.f32 %v4306_v15 }
 0x378   : > { %v5055_v16 = vpop.f32.mrb[20].mxu0 }
 0x379   : > { %v4308_v17 = vmul.f32 -1.442695, %v5055_v16  ;;  %v1362_v18 = vpop.f32.mrb[21].mxu0 }
 0x37a   : > { %v4307_v19 = vmul.f32 -1.442695, %v1362_v18 }
 0x37b   : > { %5750 = vpow2.f32 %v4308_v17 }
 0x37c   : > { %v5058_v20 = vpop.f32.mrb[22].mxu0  ;;  %5752 = vpow2.f32 %v4307_v19 }
 0x37d   : > { %v1372_v21 = vpop.f32.mrb[23].mxu0  ;;  %v4310_v22 = vmul.f32 -1.442695, %v5058_v20  ;;  %v5745_v0 = vpop.eup %5744 }
 0x37e   : > { %v4309_v1 = vmul.f32 -1.442695, %v1372_v21  ;;  %v5747_v41 = vpop.eup %5746  ;;  %v1470_v46 = vadd.f32 1.0, %v5745_v0 }
 0x37f   : > { %v1469_v49 = vadd.f32 1.0, %v5747_v41 }
 0x380   : > { %v5061_v23 = vpop.f32.mrb[24].mxu0 }
 0x381   : > { %v4312_v24 = vmul.f32 -1.442695, %v5061_v23  ;;  %v1382_v25 = vpop.f32.mrb[25].mxu0  ;;  %v5749_v42 = vpop.eup %5748 }
 0x382   : > { %v4311_v62 = vmul.f32 -1.442695, %v1382_v25  ;;  %v1472_v47 = vadd.f32 1.0, %v5749_v42 }
 0x383   : > { %5754 = vpow2.f32 %v4312_v24 }
 0x384   : > { %5756 = vpow2.f32 %v4310_v22  ;;  %v5064_v36 = vpop.f32.mrb[26].mxu0 }
 0x385   : > { %v4314_v63 = vmul.f32 -1.442695, %v5064_v36  ;;  %v1392_v43 = vpop.f32.mrb[27].mxu0  ;;  %5758 = vpow2.f32 %v4311_v62  ;;  %v5751_v37 = vpop.eup %5750 }
 0x386   : > { %v4313_v44 = vmul.f32 -1.442695, %v1392_v43  ;;  %v5753_v34 = vpop.eup %5752  ;;  %v1474_v51 = vadd.f32 1.0, %v5751_v37 }
 0x387   : > { %5760 = vpow2.f32 %v4314_v63  ;;  %v1473_v52 = vadd.f32 1.0, %v5753_v34 }
 0x388   : > { %5762 = vpow2.f32 %v4309_v1  ;;  %v5067_v35 = vpop.f32.mrb[28].mxu0 }
 0x389   : > { %5764 = vpow2.f32 %v4305_v38  ;;  %v1402_v48 = vpop.f32.mrb[29].mxu0  ;;  %v4316_v55 = vmul.f32 -1.442695, %v5067_v35 }
 0x38a   : > { %5766 = vpow2.f32 %v4313_v44  ;;  %v4315_v58 = vmul.f32 -1.442695, %v1402_v48 }
 0x38b   : > { %5768 = vrcp.f32 %v1470_v46 }
 0x38c   : > { %5770 = vrcp.f32 %v1469_v49  ;;  %v5070_v53 = vpop.f32.mrb[30].mxu0 }
 0x38d   : > { %v5755_v54 = vpop.eup %5754  ;;  %5772 = vrcp.f32 %v1472_v47  ;;  %v1412_v50 = vpop.f32.mrb[31].mxu0  ;;  %v4318_v13 = vmul.f32 -1.442695, %v5070_v53 }
 0x38e   : > { %v5757_v56 = vpop.eup %5756  ;;  %5774 = vrcp.f32 %v1474_v51  ;;  %v1478_v57 = vadd.f32 1.0, %v5755_v54  ;;  %v4317_v16 = vmul.f32 -1.442695, %v1412_v50 }
 0x38f   : > { %5776 = vrcp.f32 %v1473_v52  ;;  %v5759_v60 = vpop.eup %5758  ;;  %v1476_v8 = vadd.f32 1.0, %v5757_v56 }
 0x390   : > { %5778 = vrcp.f32 %v1478_v57  ;;  %v1477_v10 = vadd.f32 1.0, %v5759_v60 }
 0x391   : > { %v5761_v61 = vpop.eup %5760  ;;  %5780 = vpow2.f32 %v4316_v55 }
 0x392   : > { %v5763_v11 = vpop.eup %5762  ;;  %v1480_v12 = vadd.f32 1.0, %v5761_v61  ;;  %5782 = vpow2.f32 %v4315_v58 }
 0x393   : > { %v5765_v14 = vpop.eup %5764  ;;  %5784 = vrcp.f32 %v1477_v10  ;;  %v1475_v18 = vadd.f32 1.0, %v5763_v11 }
 0x394   : > { %v5767_v15 = vpop.eup %5766  ;;  %5786 = vrcp.f32 %v1480_v12  ;;  %v1471_v22 = vadd.f32 1.0, %v5765_v14 }
 0x395   : > { %v5769_v17 = vpop.eup %5768  ;;  %5788 = vrcp.f32 %v1476_v8  ;;  %v1479_v19 = vadd.f32 1.0, %v5767_v15 }
 0x396   : > { %v5771_v20 = vpop.eup %5770  ;;  %5790 = vpow2.f32 %v4318_v13 }
 0x397   : > { %v5773_v21 = vpop.eup %5772  ;;  %5792 = vrcp.f32 %v1479_v19 }
 0x398   : > { %v5775_v23 = vpop.eup %5774  ;;  %5794 = vpow2.f32 %v4317_v16 }
 0x399   : > { %v5777_v24 = vpop.eup %5776  ;;  %5796 = vrcp.f32 %v1475_v18  ;;  %v1526_v42 = vmul.f32 %v5775_v23, %v6681_v59 }
 0x39a   : > { %v5779_v25 = vpop.eup %5778  ;;  %5798 = vrcp.f32 %v1471_v22  ;;  %v1525_v53 = vmul.f32 %v5777_v24, %v6686_v39 }
 0x39b   : > { %v5781_v62 = vpop.eup %5780  ;;  %v1518_v0 = vmul.f32 2.0, %v5779_v25  ;;  %v4323_v25 = vld [vmem:[%s6407_s20 + $0x18] sm:$0x7f] }
 0x39c   : > { %v5783_v1 = vpop.eup %5782  ;;  %v1482_v49 = vadd.f32 1.0, %v5781_v62  ;;  %v6920_v62 = vld [vmem:[%s7575_s1 + $0x78] sm:$0xff] }
 0x39d   : > { %v5785_v36 = vpop.eup %5784  ;;  %v4320_v41 = vadd.f32 -1.0, %v1518_v0  ;;  %v1481_v51 = vadd.f32 1.0, %v5783_v1  ;;  %v6927_v0 = vld [vmem:[%s7576_s2] sm:$0xff] }
 0x39e   : > { %v5787_v38 = vpop.eup %5786  ;;  %v1517_v63 = vmul.f32 2.0, %v5785_v36 }
 0x39f   : > { %v5789_v43 = vpop.eup %5788  ;;  %v1530_v44 = vmul.f32 %v5769_v17, %v4320_v41  ;;  %v1520_v37 = vmul.f32 2.0, %v5787_v38 }
 0x3a0   : > { %v5791_v46 = vpop.eup %5790  ;;  %v4319_v34 = vadd.f32 -1.0, %v1517_v63  ;;  %v1528_v59 = vmul.f32 %v5789_v43, %v6688_v45 }
 0x3a1   : > { %v5793_v35 = vpop.eup %5792  ;;  %v6764_v47 = vadd.f32 %v1530_v44, %v1526_v42  ;;  %v4322_v48 = vadd.f32 -1.0, %v1520_v37  ;;  %v1484_v60 = vadd.f32 1.0, %v5791_v46 }
 0x3a2   : > { %v5795_v52 = vpop.eup %5794  ;;  %v1529_v54 = vmul.f32 %v5771_v20, %v4319_v34  ;;  %v1519_v55 = vmul.f32 2.0, %v5793_v35 }
 0x3a3   : > { %v5797_v50 = vpop.eup %5796  ;;  %5800 = vtanh.f32 %v6764_v47  ;;  %v1532_v56 = vmul.f32 %v5773_v21, %v4322_v48  ;;  %v1483_v10 = vadd.f32 1.0, %v5795_v52 }
 0x3a4   : > { %v6769_v57 = vadd.f32 %v1529_v54, %v1525_v53  ;;  %v4321_v58 = vadd.f32 -1.0, %v1519_v55  ;;  %5802 = vrcp.f32 %v1482_v49  ;;  %v5799_v61 = vpop.eup %5798  ;;  %v1527_v39 = vmul.f32 %v5797_v50, %v6693_v40 }
 0x3a5   : > { %v6771_v8 = vadd.f32 %v1532_v56, %v1528_v59  ;;  %5804 = vrcp.f32 %v1481_v51 }
 0x3a6   : > { %5806 = vtanh.f32 %v6769_v57  ;;  %v1531_v11 = vmul.f32 %v5799_v61, %v4321_v58 }
 0x3a7   : > { %5808 = vtanh.f32 %v6771_v8 }
 0x3a8   : > { %v6776_v12 = vadd.f32 %v1531_v11, %v1527_v39  ;;  %5810 = vrcp.f32 %v1484_v60 }
 0x3a9   : > { %5812 = vrcp.f32 %v1483_v10 }
 0x3aa   : > { %5814 = vtanh.f32 %v6776_v12 }
 0x3ad   : > { %v5801_v45 = vpop.eup %5800 }
 0x3ae   : > { %v5803_v13 = vpop.eup %5802 }
 0x3af   : > { %v5805_v14 = vpop.eup %5804  ;;  %v1542_v15 = vmul.f32 %v5803_v13, %v5801_v45 }
 0x3b0   : > { %v5807_v16 = vpop.eup %5806 }
 0x3b1   : > { %v5809_v17 = vpop.eup %5808  ;;  %v1541_v18 = vmul.f32 %v5807_v16, %v5805_v14 }
 0x3b2   : > { %v5811_v19 = vpop.eup %5810 }
 0x3b3   : > { %v5813_v20 = vpop.eup %5812  ;;  %v5420_v40 = vpack.c.bf16 %v1542_v15, %v1541_v18  ;;  %v1544_v21 = vmul.f32 %v5811_v19, %v5809_v17 }
 0x3b4   : > { %v5815_v22 = vpop.eup %5814 }
 0x3b5   : > { %5421 = vmatprep.subr.bf16.mxu1 %v5420_v40  ;;  %v1543_v23 = vmul.f32 %v5815_v22, %v5813_v20 }
 0x3b6   : > { %5423 = vmatpush3.bf16.msra.mxu1 %v5420_v40 }
 0x3b7   : > { %v5424_v24 = vpack.c.bf16 %v1544_v21, %v1543_v23 }
 0x3b9   : > { %5425 = vmatprep.subr.bf16.mxu1 %v5424_v24 }
 0x3ba   : > { %5427 = vmatpush3.bf16.msra.mxu1 %v5424_v24 }
 0x3bb   : > { %5103 = vmatprep.subr.msk.mxu1 %vm421_vm1, %v4323_v25 }
 0x3bd   : > { %5080 = vmatmul.mubr.msk.f32.vlgmr.msra.gmra.mrb[16].mxu1 %vm660_vm2, %v6542_v2  ;;  %v6815_v2 = vld [vmem:[%s7575_s1] sm:$0xff] }
 0x3be   : > { %5082 = vmatprep.mubr.msk.f32.mxu1 %vm660_vm2, %v6547_v3  ;;  %5104 = vmatpush3.msk.msra.mxu1 %vm421_vm1, %v4323_v25  ;;  %v6822_v3 = vld [vmem:[%s7575_s1 + $0x8] sm:$0xff] }
 0x3c1   : > { %5083 = vmatmul.mubr.msk.f32.gmra.mrb[18].mxu1 %vm660_vm2, %v6557_v4  ;;  %v6829_v4 = vld [vmem:[%s7575_s1 + $0x10] sm:$0xff] }
 0x3c2   : > { %5085 = vmatprep.mubr.msk.f32.mxu1 %vm660_vm2, %v6563_v5  ;;  %v6836_v5 = vld [vmem:[%s7575_s1 + $0x18] sm:$0xff] }
 0x3c5   : > { %5086 = vmatmul.mubr.msk.f32.gmra.mrb[20].mxu1 %vm660_vm2, %v6572_v6  ;;  %v6843_v6 = vld [vmem:[%s7575_s1 + $0x20] sm:$0xff] }
 0x3c6   : > { %5088 = vmatprep.mubr.msk.f32.mxu1 %vm660_vm2, %v6577_v7  ;;  %v6850_v7 = vld [vmem:[%s7575_s1 + $0x28] sm:$0xff] }
 0x3c9   : > { %5089 = vmatmul.mubr.msk.f32.gmra.mrb[22].mxu1 %vm660_vm2, %v6586_v9  ;;  %v6857_v9 = vld [vmem:[%s7575_s1 + $0x30] sm:$0xff] }
 0x3ca   : > { %5091 = vmatprep.mubr.msk.f32.mxu1 %vm660_vm2, %v6591_v26  ;;  %v6864_v26 = vld [vmem:[%s7575_s1 + $0x38] sm:$0xff] }
 0x3cd   : > { %5092 = vmatmul.mubr.msk.f32.gmra.mrb[24].mxu1 %vm660_vm2, %v6600_v27  ;;  %v6871_v27 = vld [vmem:[%s7575_s1 + $0x40] sm:$0xff] }
 0x3ce   : > { %5094 = vmatprep.mubr.msk.f32.mxu1 %vm660_vm2, %v6605_v28  ;;  %v6878_v28 = vld [vmem:[%s7575_s1 + $0x48] sm:$0xff] }
 0x3d1   : > { %5095 = vmatmul.mubr.msk.f32.gmra.mrb[26].mxu1 %vm660_vm2, %v6614_v29  ;;  %v6885_v29 = vld [vmem:[%s7575_s1 + $0x50] sm:$0xff] }
 0x3d2   : > { %5097 = vmatprep.mubr.msk.f32.mxu1 %vm660_vm2, %v6619_v30  ;;  %v6892_v30 = vld [vmem:[%s7575_s1 + $0x58] sm:$0xff] }
 0x3d5   : > { %5098 = vmatmul.mubr.msk.f32.gmra.mrb[28].mxu1 %vm660_vm2, %v6628_v31  ;;  %v6899_v31 = vld [vmem:[%s7575_s1 + $0x60] sm:$0xff] }
 0x3d6   : > { %5100 = vmatprep.mubr.msk.f32.mxu1 %vm660_vm2, %v6633_v32  ;;  %v6906_v32 = vld [vmem:[%s7575_s1 + $0x68] sm:$0xff] }
 0x3d9   : > { %5101 = vmatmul.mubr.msk.f32.gmra.mrb[30].mxu1 %vm660_vm2, %v6642_v33  ;;  %v6913_v33 = vld [vmem:[%s7575_s1 + $0x70] sm:$0xff] }
 0x3da   : > { %5105 = vmatprep.mubr.msk.f32.mxu1 %vm372_vm0, %v6815_v2 }
 0x3dd   : > { %5106 = vmatmul.mubr.msk.f32.vlgmr.msra.gmra.mrb[16].mxu1 %vm372_vm0, %v6822_v3 }
 0x3de   : > { %5108 = vmatprep.mubr.msk.f32.mxu1 %vm372_vm0, %v6829_v4 }
 0x3e1   : > { %5109 = vmatmul.mubr.msk.f32.gmra.mrb[18].mxu1 %vm372_vm0, %v6836_v5 }
 0x3e2   : > { %5111 = vmatprep.mubr.msk.f32.mxu1 %vm372_vm0, %v6843_v6 }
 0x3e5   : > { %5112 = vmatmul.mubr.msk.f32.gmra.mrb[20].mxu1 %vm372_vm0, %v6850_v7 }
 0x3e6   : > { %5114 = vmatprep.mubr.msk.f32.mxu1 %vm372_vm0, %v6857_v9 }
 0x3e9   : > { %5115 = vmatmul.mubr.msk.f32.gmra.mrb[22].mxu1 %vm372_vm0, %v6864_v26 }
 0x3ea   : > { %5117 = vmatprep.mubr.msk.f32.mxu1 %vm372_vm0, %v6871_v27 }
 0x3ed   : > { %5118 = vmatmul.mubr.msk.f32.gmra.mrb[24].mxu1 %vm372_vm0, %v6878_v28 }
 0x3ee   : > { %5120 = vmatprep.mubr.msk.f32.mxu1 %vm372_vm0, %v6885_v29 }
 0x3f1   : > { %5121 = vmatmul.mubr.msk.f32.gmra.mrb[26].mxu1 %vm372_vm0, %v6892_v30 }
 0x3f2   : > { %5123 = vmatprep.mubr.msk.f32.mxu1 %vm372_vm0, %v6899_v31 }
 0x3f5   : > { %5124 = vmatmul.mubr.msk.f32.gmra.mrb[28].mxu1 %vm372_vm0, %v6906_v32 }
 0x3f6   : > { %5126 = vmatprep.mubr.msk.f32.mxu1 %vm372_vm0, %v6913_v33 }
 0x3f9   : > { %5127 = vmatmul.mubr.msk.f32.gmra.mrb[30].mxu1 %vm372_vm0, %v6920_v62 }
 0x3fa   : > { %5195 = vmatprep.mubr.msk.f32.mxu1 %vm660_vm2, %v6927_v0 }
 0x4b0   : > { %v5107_v1 = vpop.f32.mrb[16].mxu1 }
 0x4b1   : > { %v1761_v36 = vpop.f32.mrb[17].mxu1  ;;  %v4358_v63 = vmul.f32 -1.442695, %v5107_v1 }
 0x4b2   : > { %v4357_v43 = vmul.f32 -1.442695, %v1761_v36 }
 0x4b3   : > { %5816 = vpow2.f32 %v4358_v63 }
 0x4b4   : > { %v5110_v41 = vpop.f32.mrb[18].mxu1  ;;  %5818 = vpow2.f32 %v4357_v43 }
 0x4b5   : > { %v1771_v38 = vpop.f32.mrb[19].mxu1  ;;  %v4360_v42 = vmul.f32 -1.442695, %v5110_v41 }
 0x4b6   : > { %v4359_v58 = vmul.f32 -1.442695, %v1771_v38 }
 0x4b7   : > { %5820 = vpow2.f32 %v4360_v42 }
 0x4b8   : > { %v5113_v44 = vpop.f32.mrb[20].mxu1 }
 0x4b9   : > { %v4362_v37 = vmul.f32 -1.442695, %v5113_v44  ;;  %v1781_v46 = vpop.f32.mrb[21].mxu1 }
 0x4ba   : > { %v4361_v34 = vmul.f32 -1.442695, %v1781_v46 }
 0x4bb   : > { %5822 = vpow2.f32 %v4362_v37 }
 0x4bc   : > { %v5116_v49 = vpop.f32.mrb[22].mxu1  ;;  %5824 = vpow2.f32 %v4361_v34 }
 0x4bd   : > { %v1791_v35 = vpop.f32.mrb[23].mxu1  ;;  %v4364_v48 = vmul.f32 -1.442695, %v5116_v49  ;;  %v5817_v55 = vpop.eup %5816 }
 0x4be   : > { %v4363_v50 = vmul.f32 -1.442695, %v1791_v35  ;;  %v5819_v56 = vpop.eup %5818  ;;  %v1889_v45 = vadd.f32 1.0, %v5817_v55 }
 0x4bf   : > { %v1888_v14 = vadd.f32 1.0, %v5819_v56 }
 0x4c0   : > { %v5119_v51 = vpop.f32.mrb[24].mxu1 }
 0x4c1   : > { %v4366_v52 = vmul.f32 -1.442695, %v5119_v51  ;;  %v1801_v53 = vpop.f32.mrb[25].mxu1  ;;  %v5821_v10 = vpop.eup %5820 }
 0x4c2   : > { %v4365_v54 = vmul.f32 -1.442695, %v1801_v53  ;;  %v1891_v16 = vadd.f32 1.0, %v5821_v10 }
 0x4c3   : > { %5826 = vpow2.f32 %v4366_v52 }
 0x4c4   : > { %5828 = vpow2.f32 %v4364_v48  ;;  %v5122_v59 = vpop.f32.mrb[26].mxu1 }
 0x4c5   : > { %v4368_v60 = vmul.f32 -1.442695, %v5122_v59  ;;  %v1811_v61 = vpop.f32.mrb[27].mxu1  ;;  %5830 = vpow2.f32 %v4365_v54  ;;  %v5823_v11 = vpop.eup %5822 }
 0x4c6   : > { %v4367_v39 = vmul.f32 -1.442695, %v1811_v61  ;;  %v5825_v13 = vpop.eup %5824  ;;  %v1893_v18 = vadd.f32 1.0, %v5823_v11 }
 0x4c7   : > { %5832 = vpow2.f32 %v4368_v60  ;;  %v1892_v19 = vadd.f32 1.0, %v5825_v13 }
 0x4c8   : > { %5834 = vpow2.f32 %v4363_v50  ;;  %v5125_v15 = vpop.f32.mrb[28].mxu1 }
 0x4c9   : > { %5836 = vpow2.f32 %v4359_v58  ;;  %v1821_v17 = vpop.f32.mrb[29].mxu1  ;;  %v4370_v21 = vmul.f32 -1.442695, %v5125_v15 }
 0x4ca   : > { %5838 = vpow2.f32 %v4367_v39  ;;  %v4369_v25 = vmul.f32 -1.442695, %v1821_v17 }
 0x4cb   : > { %5840 = vrcp.f32 %v1889_v45 }
 0x4cc   : > { %5842 = vrcp.f32 %v1888_v14  ;;  %v5128_v20 = vpop.f32.mrb[30].mxu1 }
 0x4cd   : > { %v5827_v40 = vpop.eup %5826  ;;  %5844 = vrcp.f32 %v1891_v16  ;;  %v1831_v22 = vpop.f32.mrb[31].mxu1  ;;  %v4372_v42 = vmul.f32 -1.442695, %v5128_v20 }
 0x4ce   : > { %v5829_v23 = vpop.eup %5828  ;;  %5846 = vrcp.f32 %v1893_v18  ;;  %v1897_v24 = vadd.f32 1.0, %v5827_v40  ;;  %v4371_v46 = vmul.f32 -1.442695, %v1831_v22 }
 0x4cf   : > { %5848 = vrcp.f32 %v1892_v19  ;;  %v5831_v1 = vpop.eup %5830  ;;  %v1895_v41 = vadd.f32 1.0, %v5829_v23 }
 0x4d0   : > { %5850 = vrcp.f32 %v1897_v24  ;;  %v1896_v38 = vadd.f32 1.0, %v5831_v1 }
 0x4d1   : > { %v5833_v36 = vpop.eup %5832  ;;  %5852 = vpow2.f32 %v4370_v21 }
 0x4d2   : > { %v5835_v63 = vpop.eup %5834  ;;  %v1899_v43 = vadd.f32 1.0, %v5833_v36  ;;  %5854 = vpow2.f32 %v4369_v25 }
 0x4d3   : > { %v5837_v44 = vpop.eup %5836  ;;  %5856 = vrcp.f32 %v1896_v38  ;;  %v1894_v49 = vadd.f32 1.0, %v5835_v63 }
 0x4d4   : > { %v5839_v37 = vpop.eup %5838  ;;  %5858 = vrcp.f32 %v1899_v43  ;;  %v1890_v52 = vadd.f32 1.0, %v5837_v44 }
 0x4d5   : > { %v5841_v34 = vpop.eup %5840  ;;  %5860 = vrcp.f32 %v1895_v41  ;;  %v1898_v35 = vadd.f32 1.0, %v5839_v37 }
 0x4d6   : > { %v5843_v48 = vpop.eup %5842  ;;  %5862 = vpow2.f32 %v4372_v42 }
 0x4d7   : > { %v5845_v51 = vpop.eup %5844  ;;  %5864 = vrcp.f32 %v1898_v35 }
 0x4d8   : > { %v5847_v53 = vpop.eup %5846  ;;  %5866 = vpow2.f32 %v4371_v46 }
 0x4d9   : > { %v5849_v54 = vpop.eup %5848  ;;  %5868 = vrcp.f32 %v1894_v49  ;;  %v1945_v11 = vmul.f32 %v5847_v53, %v6764_v47 }
 0x4da   : > { %v5851_v55 = vpop.eup %5850  ;;  %5870 = vrcp.f32 %v1890_v52  ;;  %v1944_v21 = vmul.f32 %v5849_v54, %v6769_v57 }
 0x4db   : > { %v5853_v50 = vpop.eup %5852  ;;  %v1937_v59 = vmul.f32 2.0, %v5851_v55 }
 0x4dc   : > { %v5855_v56 = vpop.eup %5854  ;;  %v1901_v16 = vadd.f32 1.0, %v5853_v50 }
 0x4dd   : > { %v5857_v58 = vpop.eup %5856  ;;  %v4374_v60 = vadd.f32 -1.0, %v1937_v59  ;;  %v1900_v20 = vadd.f32 1.0, %v5855_v56  ;;  %v4377_v59 = vld [vmem:[%s6407_s20 + $0x20] sm:$0x7f]  ;;  %v6952_v56 = vld [vmem:[%s7576_s2 + $0x8] sm:$0xff] }
 0x4de   : > { %v5859_v61 = vpop.eup %5858  ;;  %v1936_v10 = vmul.f32 2.0, %v5857_v58  ;;  %v6959_v58 = vld [vmem:[%s7576_s2 + $0x10] sm:$0xff] }
 0x4df   : > { %v5861_v39 = vpop.eup %5860  ;;  %v1949_v45 = vmul.f32 %v5841_v34, %v4374_v60  ;;  %v1939_v13 = vmul.f32 2.0, %v5859_v61  ;;  %v6967_v60 = vld [vmem:[%s7576_s2 + $0x18] sm:$0xff]  ;;  %v6974_v61 = vld [vmem:[%s7576_s2 + $0x20] sm:$0xff] }
 0x4e0   : > { %v5863_v14 = vpop.eup %5862  ;;  %v4373_v15 = vadd.f32 -1.0, %v1936_v10  ;;  %v1947_v47 = vmul.f32 %v5861_v39, %v6771_v8  ;;  %v6981_v10 = vld [vmem:[%s7576_s2 + $0x28] sm:$0xff]  ;;  %v6988_v39 = vld [vmem:[%s7576_s2 + $0x30] sm:$0xff] }
 0x4e1   : > { %v5865_v17 = vpop.eup %5864  ;;  %v6932_v18 = vadd.f32 %v1949_v45, %v1945_v11  ;;  %v4376_v19 = vadd.f32 -1.0, %v1939_v13  ;;  %v1903_v41 = vadd.f32 1.0, %v5863_v14  ;;  %v6995_v11 = vld [vmem:[%s7576_s2 + $0x38] sm:$0xff]  ;;  %v7002_v45 = vld [vmem:[%s7576_s2 + $0x40] sm:$0xff]  ;;  %v7009_v13 = vld [vmem:[%s7576_s2 + $0x48] sm:$0xff] }
 0x4e2   : > { %v5867_v40 = vpop.eup %5866  ;;  %v1948_v22 = vmul.f32 %v5843_v48, %v4373_v15  ;;  %v1938_v23 = vmul.f32 2.0, %v5865_v17  ;;  %v7016_v14 = vld [vmem:[%s7576_s2 + $0x50] sm:$0xff]  ;;  %v7023_v15 = vld [vmem:[%s7576_s2 + $0x58] sm:$0xff]  ;;  %v7037_v17 = vld [vmem:[%s7576_s2 + $0x68] sm:$0xff] }
 0x4e3   : > { %v5869_v24 = vpop.eup %5868  ;;  %5872 = vtanh.f32 %v6932_v18  ;;  %v1951_v25 = vmul.f32 %v5845_v51, %v4376_v19  ;;  %v1902_v43 = vadd.f32 1.0, %v5867_v40  ;;  %v7044_v19 = vld [vmem:[%s7576_s2 + $0x70] sm:$0xff] }
 0x4e4   : > { %v6937_v1 = vadd.f32 %v1948_v22, %v1944_v21  ;;  %v4375_v36 = vadd.f32 -1.0, %v1938_v23  ;;  %5874 = vrcp.f32 %v1901_v16  ;;  %v5871_v38 = vpop.eup %5870  ;;  %v1946_v57 = vmul.f32 %v5869_v24, %v6776_v12  ;;  %v7030_v16 = vld [vmem:[%s7576_s2 + $0x60] sm:$0xff] }
 0x4e5   : > { %v6939_v63 = vadd.f32 %v1951_v25, %v1947_v47  ;;  %5876 = vrcp.f32 %v1900_v20  ;;  %v7051_v20 = vld [vmem:[%s7576_s2 + $0x78] sm:$0xff] }
 0x4e6   : > { %5878 = vtanh.f32 %v6937_v1  ;;  %v1950_v42 = vmul.f32 %v5871_v38, %v4375_v36 }
 0x4e7   : > { %5880 = vtanh.f32 %v6939_v63 }
 0x4e8   : > { %v6944_v44 = vadd.f32 %v1950_v42, %v1946_v57  ;;  %5882 = vrcp.f32 %v1903_v41 }
 0x4e9   : > { %5884 = vrcp.f32 %v1902_v43 }
 0x4ea   : > { %5886 = vtanh.f32 %v6944_v44 }
 0x4ed   : > { %v5873_v8 = vpop.eup %5872 }
 0x4ee   : > { %v5875_v37 = vpop.eup %5874 }
 0x4ef   : > { %v5877_v46 = vpop.eup %5876  ;;  %v1961_v34 = vmul.f32 %v5875_v37, %v5873_v8 }
 0x4f0   : > { %v5879_v49 = vpop.eup %5878 }
 0x4f1   : > { %v5881_v35 = vpop.eup %5880  ;;  %v1960_v48 = vmul.f32 %v5879_v49, %v5877_v46 }
 0x4f2   : > { %v5883_v51 = vpop.eup %5882 }
 0x4f3   : > { %v5885_v52 = vpop.eup %5884  ;;  %v5428_v12 = vpack.c.bf16 %v1961_v34, %v1960_v48  ;;  %v1963_v53 = vmul.f32 %v5883_v51, %v5881_v35 }
 0x4f4   : > { %v5887_v54 = vpop.eup %5886 }
 0x4f5   : > { %5429 = vmatprep.subr.bf16.mxu0 %v5428_v12  ;;  %v1962_v55 = vmul.f32 %v5887_v54, %v5885_v52 }
 0x4f6   : > { %5431 = vmatpush3.bf16.msra.mxu0 %v5428_v12 }
 0x4f7   : > { %v5432_v50 = vpack.c.bf16 %v1963_v53, %v1962_v55 }
 0x4f9   : > { %5433 = vmatprep.subr.bf16.mxu0 %v5432_v50 }
 0x4fa   : > { %5435 = vmatpush3.bf16.msra.mxu0 %v5432_v50 }
 0x4fb   : > { %5161 = vmatprep.subr.msk.mxu0 %vm421_vm1, %v4377_v59 }
 0x4fd   : > { %5138 = vmatmul.mubr.msk.f32.vlgmr.msra.gmra.mrb[32].mxu0 %vm660_vm2, %v6952_v56 }
 0x4fe   : > { %5140 = vmatprep.mubr.msk.f32.mxu0 %vm660_vm2, %v6959_v58  ;;  %5162 = vmatpush3.msk.msra.mxu0 %vm421_vm1, %v4377_v59 }
 0x501   : > { %5141 = vmatmul.mubr.msk.f32.gmra.mrb[34].mxu0 %vm660_vm2, %v6967_v60 }
 0x502   : > { %5143 = vmatprep.mubr.msk.f32.mxu0 %vm660_vm2, %v6974_v61 }
 0x505   : > { %5144 = vmatmul.mubr.msk.f32.gmra.mrb[36].mxu0 %vm660_vm2, %v6981_v10 }
 0x506   : > { %5146 = vmatprep.mubr.msk.f32.mxu0 %vm660_vm2, %v6988_v39 }
 0x509   : > { %5147 = vmatmul.mubr.msk.f32.gmra.mrb[38].mxu0 %vm660_vm2, %v6995_v11 }
 0x50a   : > { %5149 = vmatprep.mubr.msk.f32.mxu0 %vm660_vm2, %v7002_v45 }
 0x50d   : > { %5150 = vmatmul.mubr.msk.f32.gmra.mrb[40].mxu0 %vm660_vm2, %v7009_v13 }
 0x50e   : > { %5152 = vmatprep.mubr.msk.f32.mxu0 %vm660_vm2, %v7016_v14 }
 0x511   : > { %5153 = vmatmul.mubr.msk.f32.gmra.mrb[42].mxu0 %vm660_vm2, %v7023_v15 }
 0x512   : > { %5155 = vmatprep.mubr.msk.f32.mxu0 %vm660_vm2, %v7030_v16 }
 0x515   : > { %5156 = vmatmul.mubr.msk.f32.gmra.mrb[44].mxu0 %vm660_vm2, %v7037_v17 }
 0x516   : > { %5158 = vmatprep.mubr.msk.f32.mxu0 %vm660_vm2, %v7044_v19 }
 0x519   : > { %5159 = vmatmul.mubr.msk.f32.gmra.mrb[46].mxu0 %vm660_vm2, %v7051_v20 }
 0x51a   : > { %5163 = vmatprep.mubr.msk.f32.mxu0 %vm372_vm0, %v6815_v2 }
 0x51d   : > { %5164 = vmatmul.mubr.msk.f32.vlgmr.msra.gmra.mrb[32].mxu0 %vm372_vm0, %v6822_v3 }
 0x51e   : > { %5166 = vmatprep.mubr.msk.f32.mxu0 %vm372_vm0, %v6829_v4 }
 0x521   : > { %5167 = vmatmul.mubr.msk.f32.gmra.mrb[34].mxu0 %vm372_vm0, %v6836_v5 }
 0x522   : > { %5169 = vmatprep.mubr.msk.f32.mxu0 %vm372_vm0, %v6843_v6 }
 0x525   : > { %5170 = vmatmul.mubr.msk.f32.gmra.mrb[36].mxu0 %vm372_vm0, %v6850_v7 }
 0x526   : > { %5172 = vmatprep.mubr.msk.f32.mxu0 %vm372_vm0, %v6857_v9 }
 0x529   : > { %5173 = vmatmul.mubr.msk.f32.gmra.mrb[38].mxu0 %vm372_vm0, %v6864_v26 }
 0x52a   : > { %5175 = vmatprep.mubr.msk.f32.mxu0 %vm372_vm0, %v6871_v27 }
 0x52d   : > { %5176 = vmatmul.mubr.msk.f32.gmra.mrb[40].mxu0 %vm372_vm0, %v6878_v28 }
 0x52e   : > { %5178 = vmatprep.mubr.msk.f32.mxu0 %vm372_vm0, %v6885_v29 }
 0x531   : > { %5179 = vmatmul.mubr.msk.f32.gmra.mrb[42].mxu0 %vm372_vm0, %v6892_v30 }
 0x532   : > { %5181 = vmatprep.mubr.msk.f32.mxu0 %vm372_vm0, %v6899_v31 }
 0x535   : > { %5182 = vmatmul.mubr.msk.f32.gmra.mrb[44].mxu0 %vm372_vm0, %v6906_v32 }
 0x536   : > { %5184 = vmatprep.mubr.msk.f32.mxu0 %vm372_vm0, %v6913_v33 }
 0x539   : > { %5185 = vmatmul.mubr.msk.f32.gmra.mrb[46].mxu0 %vm372_vm0, %v6920_v62 }
 0x53a   : > { %5253 = vmatprep.mubr.msk.f32.mxu0 %vm660_vm2, %v6927_v0 }
 0x5f0   : > { %v5165_v40 = vpop.f32.mrb[32].mxu0 }
 0x5f1   : > { %v2180_v21 = vpop.f32.mrb[33].mxu0  ;;  %v4412_v24 = vmul.f32 -1.442695, %v5165_v40 }
 0x5f2   : > { %v4411_v47 = vmul.f32 -1.442695, %v2180_v21 }
 0x5f3   : > { %5888 = vpow2.f32 %v4412_v24 }
 0x5f4   : > { %v5168_v22 = vpop.f32.mrb[34].mxu0  ;;  %5890 = vpow2.f32 %v4411_v47 }
 0x5f5   : > { %v2190_v23 = vpop.f32.mrb[35].mxu0  ;;  %v4414_v25 = vmul.f32 -1.442695, %v5168_v22 }
 0x5f6   : > { %v4413_v12 = vmul.f32 -1.442695, %v2190_v23 }
 0x5f7   : > { %5892 = vpow2.f32 %v4414_v25 }
 0x5f8   : > { %v5171_v36 = vpop.f32.mrb[36].mxu0 }
 0x5f9   : > { %v4416_v41 = vmul.f32 -1.442695, %v5171_v36  ;;  %v2200_v38 = vpop.f32.mrb[37].mxu0 }
 0x5fa   : > { %v4415_v43 = vmul.f32 -1.442695, %v2200_v38 }
 0x5fb   : > { %5894 = vpow2.f32 %v4416_v41 }
 0x5fc   : > { %v5174_v57 = vpop.f32.mrb[38].mxu0  ;;  %5896 = vpow2.f32 %v4415_v43 }
 0x5fd   : > { %v2210_v42 = vpop.f32.mrb[39].mxu0  ;;  %v4418_v8 = vmul.f32 -1.442695, %v5174_v57  ;;  %v5889_v35 = vpop.eup %5888 }
 0x5fe   : > { %v4417_v48 = vmul.f32 -1.442695, %v2210_v42  ;;  %v5891_v52 = vpop.eup %5890  ;;  %v2308_v40 = vadd.f32 1.0, %v5889_v35 }
 0x5ff   : > { %v2307_v22 = vadd.f32 1.0, %v5891_v52 }
 0x600   : > { %v5177_v37 = vpop.f32.mrb[40].mxu0 }
 0x601   : > { %v4420_v46 = vmul.f32 -1.442695, %v5177_v37  ;;  %v2220_v34 = vpop.f32.mrb[41].mxu0  ;;  %v5893_v55 = vpop.eup %5892 }
 0x602   : > { %v4419_v49 = vmul.f32 -1.442695, %v2220_v34  ;;  %v2310_v47 = vadd.f32 1.0, %v5893_v55 }
 0x603   : > { %5898 = vpow2.f32 %v4420_v46 }
 0x604   : > { %5900 = vpow2.f32 %v4418_v8  ;;  %v5180_v51 = vpop.f32.mrb[42].mxu0 }
 0x605   : > { %v4422_v53 = vmul.f32 -1.442695, %v5180_v51  ;;  %v2230_v54 = vpop.f32.mrb[43].mxu0  ;;  %5902 = vpow2.f32 %v4419_v49  ;;  %v5895_v59 = vpop.eup %5894 }
 0x606   : > { %v4421_v50 = vmul.f32 -1.442695, %v2230_v54  ;;  %v5897_v21 = vpop.eup %5896  ;;  %v2312_v36 = vadd.f32 1.0, %v5895_v59 }
 0x607   : > { %5904 = vpow2.f32 %v4422_v53  ;;  %v2311_v41 = vadd.f32 1.0, %v5897_v21 }
 0x608   : > { %5906 = vpow2.f32 %v4417_v48  ;;  %v5183_v24 = vpop.f32.mrb[44].mxu0 }
 0x609   : > { %5908 = vpow2.f32 %v4413_v12  ;;  %v2240_v25 = vpop.f32.mrb[45].mxu0  ;;  %v4424_v43 = vmul.f32 -1.442695, %v5183_v24 }
 0x60a   : > { %5910 = vpow2.f32 %v4421_v50  ;;  %v4423_v37 = vmul.f32 -1.442695, %v2240_v25 }
 0x60b   : > { %5912 = vrcp.f32 %v2308_v40 }
 0x60c   : > { %5914 = vrcp.f32 %v2307_v22  ;;  %v5186_v23 = vpop.f32.mrb[46].mxu0 }
 0x60d   : > { %v5899_v38 = vpop.eup %5898  ;;  %5916 = vrcp.f32 %v2310_v47  ;;  %v2250_v57 = vpop.f32.mrb[47].mxu0  ;;  %v4426_v52 = vmul.f32 -1.442695, %v5186_v23 }
 0x60e   : > { %v5901_v42 = vpop.eup %5900  ;;  %5918 = vrcp.f32 %v2312_v36  ;;  %v2316_v8 = vadd.f32 1.0, %v5899_v38  ;;  %v4425_v54 = vmul.f32 -1.442695, %v2250_v57 }
 0x60f   : > { %5920 = vrcp.f32 %v2311_v41  ;;  %v5903_v46 = vpop.eup %5902  ;;  %v2314_v49 = vadd.f32 1.0, %v5901_v42 }
 0x610   : > { %5922 = vrcp.f32 %v2316_v8  ;;  %v2315_v35 = vadd.f32 1.0, %v5903_v46 }
 0x611   : > { %v5905_v34 = vpop.eup %5904  ;;  %5924 = vpow2.f32 %v4424_v43 }
 0x612   : > { %v5907_v48 = vpop.eup %5906  ;;  %v2318_v51 = vadd.f32 1.0, %v5905_v34  ;;  %5926 = vpow2.f32 %v4423_v37 }
 0x613   : > { %v5909_v12 = vpop.eup %5908  ;;  %5928 = vrcp.f32 %v2315_v35  ;;  %v2313_v50 = vadd.f32 1.0, %v5907_v48 }
 0x614   : > { %v5911_v53 = vpop.eup %5910  ;;  %5930 = vrcp.f32 %v2318_v51  ;;  %v2309_v22 = vadd.f32 1.0, %v5909_v12 }
 0x615   : > { %v5913_v55 = vpop.eup %5912  ;;  %5932 = vrcp.f32 %v2314_v49  ;;  %v2317_v59 = vadd.f32 1.0, %v5911_v53 }
 0x616   : > { %v5915_v40 = vpop.eup %5914  ;;  %5934 = vpow2.f32 %v4426_v52 }
 0x617   : > { %v5917_v21 = vpop.eup %5916  ;;  %5936 = vrcp.f32 %v2317_v59 }
 0x618   : > { %v5919_v24 = vpop.eup %5918  ;;  %5938 = vpow2.f32 %v4425_v54 }
 0x619   : > { %v5921_v47 = vpop.eup %5920  ;;  %5940 = vrcp.f32 %v2313_v50  ;;  %v2364_v37 = vmul.f32 %v5919_v24, %v6932_v18 }
 0x61a   : > { %v5923_v25 = vpop.eup %5922  ;;  %5942 = vrcp.f32 %v2309_v22  ;;  %v2363_v50 = vmul.f32 %v5921_v47, %v6937_v1 }
 0x61b   : > { %v5925_v36 = vpop.eup %5924  ;;  %v2356_v41 = vmul.f32 2.0, %v5923_v25 }
 0x61c   : > { %v5927_v23 = vpop.eup %5926  ;;  %v2320_v48 = vadd.f32 1.0, %v5925_v36 }
 0x61d   : > { %v5929_v38 = vpop.eup %5928  ;;  %v4428_v43 = vadd.f32 -1.0, %v2356_v41  ;;  %v2319_v53 = vadd.f32 1.0, %v5927_v23 }
 0x61e   : > { %v5931_v57 = vpop.eup %5930  ;;  %v2355_v42 = vmul.f32 2.0, %v5929_v38 }
 0x61f   : > { %v5933_v8 = vpop.eup %5932  ;;  %v2368_v46 = vmul.f32 %v5913_v55, %v4428_v43  ;;  %v2358_v34 = vmul.f32 2.0, %v5931_v57 }
 0x620   : > { %v5935_v49 = vpop.eup %5934  ;;  %v4427_v35 = vadd.f32 -1.0, %v2355_v42  ;;  %v2366_v18 = vmul.f32 %v5933_v8, %v6939_v63 }
 0x621   : > { %v5937_v51 = vpop.eup %5936  ;;  %v7090_v52 = vadd.f32 %v2368_v46, %v2364_v37  ;;  %v4430_v12 = vadd.f32 -1.0, %v2358_v34  ;;  %v2322_v36 = vadd.f32 1.0, %v5935_v49 }
 0x622   : > { %v5939_v54 = vpop.eup %5938  ;;  %v2367_v59 = vmul.f32 %v5915_v40, %v4427_v35  ;;  %v2357_v22 = vmul.f32 2.0, %v5937_v51 }
 0x623   : > { %v5941_v25 = vpop.eup %5940  ;;  %5944 = vtanh.f32 %v7090_v52  ;;  %v2370_v55 = vmul.f32 %v5917_v21, %v4430_v12  ;;  %v2321_v23 = vadd.f32 1.0, %v5939_v54 }
 0x624   : > { %v7095_v24 = vadd.f32 %v2367_v59, %v2363_v50  ;;  %v4429_v41 = vadd.f32 -1.0, %v2357_v22  ;;  %5946 = vrcp.f32 %v2320_v48  ;;  %v5943_v38 = vpop.eup %5942  ;;  %v2365_v1 = vmul.f32 %v5941_v25, %v6944_v44 }
 0x625   : > { %v7097_v43 = vadd.f32 %v2370_v55, %v2366_v18  ;;  %5948 = vrcp.f32 %v2319_v53  ;;  %v4431_v53 = vld [vmem:[%s6407_s20 + $0x28] sm:$0x7f] }
 0x626   : > { %5950 = vtanh.f32 %v7095_v24  ;;  %v2369_v40 = vmul.f32 %v5943_v38, %v4429_v41 }
 0x627   : > { %5952 = vtanh.f32 %v7097_v43 }
 0x628   : > { %v7102_v47 = vadd.f32 %v2369_v40, %v2365_v1  ;;  %5954 = vrcp.f32 %v2322_v36 }
 0x629   : > { %5956 = vrcp.f32 %v2321_v23 }
 0x62a   : > { %5958 = vtanh.f32 %v7102_v47 }
 0x62d   : > { %v5945_v63 = vpop.eup %5944 }
 0x62e   : > { %v5947_v21 = vpop.eup %5946 }
 0x62f   : > { %v5949_v57 = vpop.eup %5948  ;;  %v2380_v42 = vmul.f32 %v5947_v21, %v5945_v63 }
 0x630   : > { %v5951_v8 = vpop.eup %5950 }
 0x631   : > { %v5953_v37 = vpop.eup %5952  ;;  %v2379_v46 = vmul.f32 %v5951_v8, %v5949_v57 }
 0x632   : > { %v5955_v34 = vpop.eup %5954 }
 0x633   : > { %v5957_v49 = vpop.eup %5956  ;;  %v5436_v44 = vpack.c.bf16 %v2380_v42, %v2379_v46  ;;  %v2382_v35 = vmul.f32 %v5955_v34, %v5953_v37 }
 0x634   : > { %v5959_v48 = vpop.eup %5958 }
 0x635   : > { %5437 = vmatprep.subr.bf16.mxu1 %v5436_v44  ;;  %v2381_v51 = vmul.f32 %v5959_v48, %v5957_v49 }
 0x636   : > { %5439 = vmatpush3.bf16.msra.mxu1 %v5436_v44 }
 0x637   : > { %v5440_v12 = vpack.c.bf16 %v2382_v35, %v2381_v51 }
 0x639   : > { %5441 = vmatprep.subr.bf16.mxu1 %v5440_v12 }
 0x63a   : > { %5443 = vmatpush3.bf16.msra.mxu1 %v5440_v12 }
 0x63b   : > { %5219 = vmatprep.subr.msk.mxu1 %vm421_vm1, %v4431_v53 }
 0x63d   : > { %5196 = vmatmul.mubr.msk.f32.vlgmr.msra.gmra.mrb[32].mxu1 %vm660_vm2, %v6952_v56 }
 0x63e   : > { %5198 = vmatprep.mubr.msk.f32.mxu1 %vm660_vm2, %v6959_v58  ;;  %5220 = vmatpush3.msk.msra.mxu1 %vm421_vm1, %v4431_v53 }
 0x641   : > { %5199 = vmatmul.mubr.msk.f32.gmra.mrb[34].mxu1 %vm660_vm2, %v6967_v60 }
 0x642   : > { %5201 = vmatprep.mubr.msk.f32.mxu1 %vm660_vm2, %v6974_v61 }
 0x645   : > { %5202 = vmatmul.mubr.msk.f32.gmra.mrb[36].mxu1 %vm660_vm2, %v6981_v10 }
 0x646   : > { %5204 = vmatprep.mubr.msk.f32.mxu1 %vm660_vm2, %v6988_v39 }
 0x649   : > { %5205 = vmatmul.mubr.msk.f32.gmra.mrb[38].mxu1 %vm660_vm2, %v6995_v11 }
 0x64a   : > { %5207 = vmatprep.mubr.msk.f32.mxu1 %vm660_vm2, %v7002_v45 }
 0x64d   : > { %5208 = vmatmul.mubr.msk.f32.gmra.mrb[40].mxu1 %vm660_vm2, %v7009_v13 }
 0x64e   : > { %5210 = vmatprep.mubr.msk.f32.mxu1 %vm660_vm2, %v7016_v14 }
 0x651   : > { %5211 = vmatmul.mubr.msk.f32.gmra.mrb[42].mxu1 %vm660_vm2, %v7023_v15 }
 0x652   : > { %5213 = vmatprep.mubr.msk.f32.mxu1 %vm660_vm2, %v7030_v16 }
 0x655   : > { %5214 = vmatmul.mubr.msk.f32.gmra.mrb[44].mxu1 %vm660_vm2, %v7037_v17 }
 0x656   : > { %5216 = vmatprep.mubr.msk.f32.mxu1 %vm660_vm2, %v7044_v19 }
 0x659   : > { %5217 = vmatmul.mubr.msk.f32.gmra.mrb[46].mxu1 %vm660_vm2, %v7051_v20 }
 0x65a   : > { %5221 = vmatprep.mubr.msk.f32.mxu1 %vm372_vm0, %v6815_v2 }
 0x65d   : > { %5222 = vmatmul.mubr.msk.f32.vlgmr.msra.gmra.mrb[32].mxu1 %vm372_vm0, %v6822_v3 }
 0x65e   : > { %5224 = vmatprep.mubr.msk.f32.mxu1 %vm372_vm0, %v6829_v4 }
 0x661   : > { %5225 = vmatmul.mubr.msk.f32.gmra.mrb[34].mxu1 %vm372_vm0, %v6836_v5 }
 0x662   : > { %5227 = vmatprep.mubr.msk.f32.mxu1 %vm372_vm0, %v6843_v6 }
 0x665   : > { %5228 = vmatmul.mubr.msk.f32.gmra.mrb[36].mxu1 %vm372_vm0, %v6850_v7 }
 0x666   : > { %5230 = vmatprep.mubr.msk.f32.mxu1 %vm372_vm0, %v6857_v9 }
 0x669   : > { %5231 = vmatmul.mubr.msk.f32.gmra.mrb[38].mxu1 %vm372_vm0, %v6864_v26 }
 0x66a   : > { %5233 = vmatprep.mubr.msk.f32.mxu1 %vm372_vm0, %v6871_v27 }
 0x66d   : > { %5234 = vmatmul.mubr.msk.f32.gmra.mrb[40].mxu1 %vm372_vm0, %v6878_v28 }
 0x66e   : > { %5236 = vmatprep.mubr.msk.f32.mxu1 %vm372_vm0, %v6885_v29 }
 0x671   : > { %5237 = vmatmul.mubr.msk.f32.gmra.mrb[42].mxu1 %vm372_vm0, %v6892_v30 }
 0x672   : > { %5239 = vmatprep.mubr.msk.f32.mxu1 %vm372_vm0, %v6899_v31 }
 0x675   : > { %5240 = vmatmul.mubr.msk.f32.gmra.mrb[44].mxu1 %vm372_vm0, %v6906_v32 }
 0x676   : > { %5242 = vmatprep.mubr.msk.f32.mxu1 %vm372_vm0, %v6913_v33 }
 0x679   : > { %5243 = vmatmul.mubr.msk.f32.gmra.mrb[46].mxu1 %vm372_vm0, %v6920_v62 }
 0x67a   : > { %5311 = vmatprep.mubr.msk.f32.mxu1 %vm660_vm2, %v6927_v0 }
 0x730   : > { %v5223_v2 = vpop.f32.mrb[32].mxu1 }
 0x731   : > { %v2599_v3 = vpop.f32.mrb[33].mxu1  ;;  %v4466_v6 = vmul.f32 -1.442695, %v5223_v2 }
 0x732   : > { %v4465_v7 = vmul.f32 -1.442695, %v2599_v3 }
 0x733   : > { %5960 = vpow2.f32 %v4466_v6 }
 0x734   : > { %v5226_v4 = vpop.f32.mrb[34].mxu1  ;;  %5962 = vpow2.f32 %v4465_v7 }
 0x735   : > { %v2609_v5 = vpop.f32.mrb[35].mxu1  ;;  %v4468_v9 = vmul.f32 -1.442695, %v5226_v4 }
 0x736   : > { %v4467_v18 = vmul.f32 -1.442695, %v2609_v5 }
 0x737   : > { %5964 = vpow2.f32 %v4468_v9 }
 0x738   : > { %v5229_v26 = vpop.f32.mrb[36].mxu1 }
 0x739   : > { %v4470_v27 = vmul.f32 -1.442695, %v5229_v26  ;;  %v2619_v28 = vpop.f32.mrb[37].mxu1 }
 0x73a   : > { %v4469_v29 = vmul.f32 -1.442695, %v2619_v28 }
 0x73b   : > { %5966 = vpow2.f32 %v4470_v27 }
 0x73c   : > { %v5232_v30 = vpop.f32.mrb[38].mxu1  ;;  %5968 = vpow2.f32 %v4469_v29 }
 0x73d   : > { %v2629_v31 = vpop.f32.mrb[39].mxu1  ;;  %v4472_v32 = vmul.f32 -1.442695, %v5232_v30  ;;  %v5961_v50 = vpop.eup %5960 }
 0x73e   : > { %v4471_v59 = vmul.f32 -1.442695, %v2629_v31  ;;  %v5963_v25 = vpop.eup %5962  ;;  %v2727_v1 = vadd.f32 1.0, %v5961_v50 }
 0x73f   : > { %v2726_v63 = vadd.f32 1.0, %v5963_v25 }
 0x740   : > { %v5235_v33 = vpop.f32.mrb[40].mxu1 }
 0x741   : > { %v4474_v62 = vmul.f32 -1.442695, %v5235_v33  ;;  %v2639_v0 = vpop.f32.mrb[41].mxu1  ;;  %v5965_v36 = vpop.eup %5964 }
 0x742   : > { %v4473_v54 = vmul.f32 -1.442695, %v2639_v0  ;;  %v2729_v57 = vadd.f32 1.0, %v5965_v36 }
 0x743   : > { %5970 = vpow2.f32 %v4474_v62 }
 0x744   : > { %5972 = vpow2.f32 %v4472_v32  ;;  %v5238_v22 = vpop.f32.mrb[42].mxu1 }
 0x745   : > { %v4476_v55 = vmul.f32 -1.442695, %v5238_v22  ;;  %v2649_v41 = vpop.f32.mrb[43].mxu1  ;;  %5974 = vpow2.f32 %v4473_v54  ;;  %v5967_v23 = vpop.eup %5966 }
 0x746   : > { %v4475_v38 = vmul.f32 -1.442695, %v2649_v41  ;;  %v5969_v40 = vpop.eup %5968  ;;  %v2731_v8 = vadd.f32 1.0, %v5967_v23 }
 0x747   : > { %5976 = vpow2.f32 %v4476_v55  ;;  %v2730_v37 = vadd.f32 1.0, %v5969_v40 }
 0x748   : > { %5978 = vpow2.f32 %v4471_v59  ;;  %v5241_v21 = vpop.f32.mrb[44].mxu1 }
 0x749   : > { %5980 = vpow2.f32 %v4467_v18  ;;  %v2659_v42 = vpop.f32.mrb[45].mxu1  ;;  %v4478_v49 = vmul.f32 -1.442695, %v5241_v21 }
 0x74a   : > { %5982 = vpow2.f32 %v4475_v38  ;;  %v4477_v51 = vmul.f32 -1.442695, %v2659_v42 }
 0x74b   : > { %5984 = vrcp.f32 %v2727_v1 }
 0x74c   : > { %5986 = vrcp.f32 %v2726_v63  ;;  %v5244_v46 = vpop.f32.mrb[46].mxu1 }
 0x74d   : > { %v5971_v34 = vpop.eup %5970  ;;  %5988 = vrcp.f32 %v2729_v57  ;;  %v2669_v44 = vpop.f32.mrb[47].mxu1  ;;  %v4480_v6 = vmul.f32 -1.442695, %v5244_v46 }
 0x74e   : > { %v5973_v35 = vpop.eup %5972  ;;  %5990 = vrcp.f32 %v2731_v8  ;;  %v2735_v48 = vadd.f32 1.0, %v5971_v34  ;;  %v4479_v26 = vmul.f32 -1.442695, %v2669_v44 }
 0x74f   : > { %5992 = vrcp.f32 %v2730_v37  ;;  %v5975_v12 = vpop.eup %5974  ;;  %v2733_v2 = vadd.f32 1.0, %v5973_v35 }
 0x750   : > { %5994 = vrcp.f32 %v2735_v48  ;;  %v2734_v3 = vadd.f32 1.0, %v5975_v12 }
 0x751   : > { %v5977_v53 = vpop.eup %5976  ;;  %5996 = vpow2.f32 %v4478_v49 }
 0x752   : > { %v5979_v4 = vpop.eup %5978  ;;  %v2737_v5 = vadd.f32 1.0, %v5977_v53  ;;  %5998 = vpow2.f32 %v4477_v51 }
 0x753   : > { %v5981_v7 = vpop.eup %5980  ;;  %6000 = vrcp.f32 %v2734_v3  ;;  %v2732_v28 = vadd.f32 1.0, %v5979_v4 }
 0x754   : > { %v5983_v9 = vpop.eup %5982  ;;  %6002 = vrcp.f32 %v2737_v5  ;;  %v2728_v32 = vadd.f32 1.0, %v5981_v7 }
 0x755   : > { %v5985_v27 = vpop.eup %5984  ;;  %6004 = vrcp.f32 %v2733_v2  ;;  %v2736_v29 = vadd.f32 1.0, %v5983_v9 }
 0x756   : > { %v5987_v30 = vpop.eup %5986  ;;  %6006 = vpow2.f32 %v4480_v6 }
 0x757   : > { %v5989_v31 = vpop.eup %5988  ;;  %6008 = vrcp.f32 %v2736_v29 }
 0x758   : > { %v5991_v33 = vpop.eup %5990  ;;  %6010 = vpow2.f32 %v4479_v26 }
 0x759   : > { %v5993_v62 = vpop.eup %5992  ;;  %6012 = vrcp.f32 %v2732_v28  ;;  %v2783_v36 = vmul.f32 %v5991_v33, %v7090_v52 }
 0x75a   : > { %v5995_v0 = vpop.eup %5994  ;;  %6014 = vrcp.f32 %v2728_v32  ;;  %v2782_v46 = vmul.f32 %v5993_v62, %v7095_v24 }
 0x75b   : > { %v5997_v54 = vpop.eup %5996  ;;  %v2775_v50 = vmul.f32 2.0, %v5995_v0  ;;  %v4485_v0 = vld [vmem:[%s6407_s20 + $0x30] sm:$0x7f] }
 0x75c   : > { %v5999_v59 = vpop.eup %5998  ;;  %v2739_v63 = vadd.f32 1.0, %v5997_v54  ;;  %v7329_v54 = vld [vmem:[%s7575_s1 + $0x78] sm:$0xff] }
 0x75d   : > { %v6001_v22 = vpop.eup %6000  ;;  %v4482_v25 = vadd.f32 -1.0, %v2775_v50  ;;  %v2738_v8 = vadd.f32 1.0, %v5999_v59 }
 0x75e   : > { %v6003_v18 = vpop.eup %6002  ;;  %v2774_v55 = vmul.f32 2.0, %v6001_v22 }
 0x75f   : > { %v6005_v41 = vpop.eup %6004  ;;  %v2787_v38 = vmul.f32 %v5985_v27, %v4482_v25  ;;  %v2777_v23 = vmul.f32 2.0, %v6003_v18 }
 0x760   : > { %v6007_v1 = vpop.eup %6006  ;;  %v4481_v40 = vadd.f32 -1.0, %v2774_v55  ;;  %v2785_v52 = vmul.f32 %v6005_v41, %v7097_v43 }
 0x761   : > { %v6009_v21 = vpop.eup %6008  ;;  %v7173_v57 = vadd.f32 %v2787_v38, %v2783_v36  ;;  %v4484_v42 = vadd.f32 -1.0, %v2777_v23  ;;  %v2741_v12 = vadd.f32 1.0, %v6007_v1 }
 0x762   : > { %v6011_v37 = vpop.eup %6010  ;;  %v2786_v34 = vmul.f32 %v5987_v30, %v4481_v40  ;;  %v2776_v49 = vmul.f32 2.0, %v6009_v21 }
 0x763   : > { %v6013_v44 = vpop.eup %6012  ;;  %6016 = vtanh.f32 %v7173_v57  ;;  %v2789_v35 = vmul.f32 %v5989_v31, %v4484_v42  ;;  %v2740_v3 = vadd.f32 1.0, %v6011_v37 }
 0x764   : > { %v7178_v48 = vadd.f32 %v2786_v34, %v2782_v46  ;;  %v4483_v51 = vadd.f32 -1.0, %v2776_v49  ;;  %6018 = vrcp.f32 %v2739_v63  ;;  %v6015_v53 = vpop.eup %6014  ;;  %v2784_v24 = vmul.f32 %v6013_v44, %v7102_v47 }
 0x765   : > { %v7180_v2 = vadd.f32 %v2789_v35, %v2785_v52  ;;  %6020 = vrcp.f32 %v2738_v8 }
 0x766   : > { %6022 = vtanh.f32 %v7178_v48  ;;  %v2788_v4 = vmul.f32 %v6015_v53, %v4483_v51 }
 0x767   : > { %6024 = vtanh.f32 %v7180_v2 }
 0x768   : > { %v7185_v5 = vadd.f32 %v2788_v4, %v2784_v24  ;;  %6026 = vrcp.f32 %v2741_v12 }
 0x769   : > { %6028 = vrcp.f32 %v2740_v3 }
 0x76a   : > { %6030 = vtanh.f32 %v7185_v5 }
 0x76d   : > { %v6017_v43 = vpop.eup %6016 }
 0x76e   : > { %v6019_v6 = vpop.eup %6018 }
 0x76f   : > { %v6021_v7 = vpop.eup %6020  ;;  %v2799_v9 = vmul.f32 %v6019_v6, %v6017_v43 }
 0x770   : > { %v6023_v26 = vpop.eup %6022 }
 0x771   : > { %v6025_v27 = vpop.eup %6024  ;;  %v2798_v28 = vmul.f32 %v6023_v26, %v6021_v7 }
 0x772   : > { %v6027_v29 = vpop.eup %6026 }
 0x773   : > { %v6029_v30 = vpop.eup %6028  ;;  %v5444_v47 = vpack.c.bf16 %v2799_v9, %v2798_v28  ;;  %v2801_v31 = vmul.f32 %v6027_v29, %v6025_v27 }
 0x774   : > { %v6031_v32 = vpop.eup %6030 }
 0x775   : > { %5445 = vmatprep.subr.bf16.mxu0 %v5444_v47  ;;  %v2800_v33 = vmul.f32 %v6031_v32, %v6029_v30 }
 0x776   : > { %5447 = vmatpush3.bf16.msra.mxu0 %v5444_v47 }
 0x777   : > { %v5448_v62 = vpack.c.bf16 %v2801_v31, %v2800_v33 }
 0x779   : > { %5449 = vmatprep.subr.bf16.mxu0 %v5448_v62 }
 0x77a   : > { %5451 = vmatpush3.bf16.msra.mxu0 %v5448_v62 }
 0x77b   : > { %5277 = vmatprep.subr.msk.mxu0 %vm421_vm1, %v4485_v0 }
 0x77d   : > { %5254 = vmatmul.mubr.msk.f32.vlgmr.msra.gmra.mrb[48].mxu0 %vm660_vm2, %v6952_v56  ;;  %v7224_v56 = vld [vmem:[%s7575_s1] sm:$0xff] }
 0x77e   : > { %5256 = vmatprep.mubr.msk.f32.mxu0 %vm660_vm2, %v6959_v58  ;;  %5278 = vmatpush3.msk.msra.mxu0 %vm421_vm1, %v4485_v0  ;;  %v7231_v58 = vld [vmem:[%s7575_s1 + $0x8] sm:$0xff] }
 0x781   : > { %5257 = vmatmul.mubr.msk.f32.gmra.mrb[50].mxu0 %vm660_vm2, %v6967_v60  ;;  %v7238_v60 = vld [vmem:[%s7575_s1 + $0x10] sm:$0xff] }
 0x782   : > { %5259 = vmatprep.mubr.msk.f32.mxu0 %vm660_vm2, %v6974_v61  ;;  %v7245_v61 = vld [vmem:[%s7575_s1 + $0x18] sm:$0xff] }
 0x785   : > { %5260 = vmatmul.mubr.msk.f32.gmra.mrb[52].mxu0 %vm660_vm2, %v6981_v10  ;;  %v7252_v10 = vld [vmem:[%s7575_s1 + $0x20] sm:$0xff] }
 0x786   : > { %5262 = vmatprep.mubr.msk.f32.mxu0 %vm660_vm2, %v6988_v39  ;;  %v7259_v39 = vld [vmem:[%s7575_s1 + $0x28] sm:$0xff] }
 0x789   : > { %5263 = vmatmul.mubr.msk.f32.gmra.mrb[54].mxu0 %vm660_vm2, %v6995_v11  ;;  %v7266_v11 = vld [vmem:[%s7575_s1 + $0x30] sm:$0xff] }
 0x78a   : > { %5265 = vmatprep.mubr.msk.f32.mxu0 %vm660_vm2, %v7002_v45  ;;  %v7273_v45 = vld [vmem:[%s7575_s1 + $0x38] sm:$0xff] }
 0x78d   : > { %5266 = vmatmul.mubr.msk.f32.gmra.mrb[56].mxu0 %vm660_vm2, %v7009_v13  ;;  %v7280_v13 = vld [vmem:[%s7575_s1 + $0x40] sm:$0xff] }
 0x78e   : > { %5268 = vmatprep.mubr.msk.f32.mxu0 %vm660_vm2, %v7016_v14  ;;  %v7287_v14 = vld [vmem:[%s7575_s1 + $0x48] sm:$0xff] }
 0x791   : > { %5269 = vmatmul.mubr.msk.f32.gmra.mrb[58].mxu0 %vm660_vm2, %v7023_v15  ;;  %v7294_v15 = vld [vmem:[%s7575_s1 + $0x50] sm:$0xff] }
 0x792   : > { %5271 = vmatprep.mubr.msk.f32.mxu0 %vm660_vm2, %v7030_v16  ;;  %v7301_v16 = vld [vmem:[%s7575_s1 + $0x58] sm:$0xff] }
 0x795   : > { %5272 = vmatmul.mubr.msk.f32.gmra.mrb[60].mxu0 %vm660_vm2, %v7037_v17  ;;  %v7308_v17 = vld [vmem:[%s7575_s1 + $0x60] sm:$0xff] }
 0x796   : > { %5274 = vmatprep.mubr.msk.f32.mxu0 %vm660_vm2, %v7044_v19  ;;  %v7315_v19 = vld [vmem:[%s7575_s1 + $0x68] sm:$0xff] }
 0x799   : > { %5275 = vmatmul.mubr.msk.f32.gmra.mrb[62].mxu0 %vm660_vm2, %v7051_v20  ;;  %v7322_v20 = vld [vmem:[%s7575_s1 + $0x70] sm:$0xff] }
 0x79a   : > { %5279 = vmatprep.mubr.msk.f32.mxu0 %vm372_vm0, %v7224_v56 }
 0x79d   : > { %5280 = vmatmul.mubr.msk.f32.vlgmr.msra.gmra.mrb[48].mxu0 %vm372_vm0, %v7231_v58 }
 0x79e   : > { %5282 = vmatprep.mubr.msk.f32.mxu0 %vm372_vm0, %v7238_v60 }
 0x7a1   : > { %5283 = vmatmul.mubr.msk.f32.gmra.mrb[50].mxu0 %vm372_vm0, %v7245_v61 }
 0x7a2   : > { %5285 = vmatprep.mubr.msk.f32.mxu0 %vm372_vm0, %v7252_v10 }
 0x7a5   : > { %5286 = vmatmul.mubr.msk.f32.gmra.mrb[52].mxu0 %vm372_vm0, %v7259_v39 }
 0x7a6   : > { %5288 = vmatprep.mubr.msk.f32.mxu0 %vm372_vm0, %v7266_v11 }
 0x7a9   : > { %5289 = vmatmul.mubr.msk.f32.gmra.mrb[54].mxu0 %vm372_vm0, %v7273_v45 }
 0x7aa   : > { %5291 = vmatprep.mubr.msk.f32.mxu0 %vm372_vm0, %v7280_v13 }
 0x7ad   : > { %5292 = vmatmul.mubr.msk.f32.gmra.mrb[56].mxu0 %vm372_vm0, %v7287_v14 }
 0x7ae   : > { %5294 = vmatprep.mubr.msk.f32.mxu0 %vm372_vm0, %v7294_v15 }
 0x7b1   : > { %5295 = vmatmul.mubr.msk.f32.gmra.mrb[58].mxu0 %vm372_vm0, %v7301_v16 }
 0x7b2   : > { %5297 = vmatprep.mubr.msk.f32.mxu0 %vm372_vm0, %v7308_v17 }
 0x7b5   : > { %5298 = vmatmul.mubr.msk.f32.gmra.mrb[60].mxu0 %vm372_vm0, %v7315_v19 }
 0x7b6   : > { %5300 = vmatprep.mubr.msk.f32.mxu0 %vm372_vm0, %v7322_v20 }
 0x7b9   : > { %5301 = vmatmul.mubr.msk.f32.gmra.mrb[62].mxu0 %vm372_vm0, %v7329_v54 }
 0x870   : > { %v5281_v50 = vpop.f32.mrb[48].mxu0 }
 0x871   : > { %v3018_v59 = vpop.f32.mrb[49].mxu0  ;;  %v4520_v18 = vmul.f32 -1.442695, %v5281_v50 }
 0x872   : > { %v4519_v55 = vmul.f32 -1.442695, %v3018_v59 }
 0x873   : > { %6032 = vpow2.f32 %v4520_v18 }
 0x874   : > { %v5284_v22 = vpop.f32.mrb[50].mxu0  ;;  %6034 = vpow2.f32 %v4519_v55 }
 0x875   : > { %v3028_v25 = vpop.f32.mrb[51].mxu0  ;;  %v4522_v41 = vmul.f32 -1.442695, %v5284_v22 }
 0x876   : > { %v4521_v35 = vmul.f32 -1.442695, %v3028_v25 }
 0x877   : > { %6036 = vpow2.f32 %v4522_v41 }
 0x878   : > { %v5287_v36 = vpop.f32.mrb[52].mxu0 }
 0x879   : > { %v4524_v38 = vmul.f32 -1.442695, %v5287_v36  ;;  %v3038_v23 = vpop.f32.mrb[53].mxu0 }
 0x87a   : > { %v4523_v1 = vmul.f32 -1.442695, %v3038_v23 }
 0x87b   : > { %6038 = vpow2.f32 %v4524_v38 }
 0x87c   : > { %v5290_v40 = vpop.f32.mrb[54].mxu0  ;;  %6040 = vpow2.f32 %v4523_v1 }
 0x87d   : > { %v3048_v63 = vpop.f32.mrb[55].mxu0  ;;  %v4526_v21 = vmul.f32 -1.442695, %v5290_v40  ;;  %v6033_v34 = vpop.eup %6032 }
 0x87e   : > { %v4525_v49 = vmul.f32 -1.442695, %v3048_v63  ;;  %v6035_v52 = vpop.eup %6034  ;;  %v3146_v4 = vadd.f32 1.0, %v6033_v34 }
 0x87f   : > { %v3145_v6 = vadd.f32 1.0, %v6035_v52 }
 0x880   : > { %v5293_v42 = vpop.f32.mrb[56].mxu0 }
 0x881   : > { %v4528_v8 = vmul.f32 -1.442695, %v5293_v42  ;;  %v3058_v37 = vpop.f32.mrb[57].mxu0  ;;  %v6037_v53 = vpop.eup %6036 }
 0x882   : > { %v4527_v46 = vmul.f32 -1.442695, %v3058_v37  ;;  %v3148_v9 = vadd.f32 1.0, %v6037_v53 }
 0x883   : > { %6042 = vpow2.f32 %v4528_v8 }
 0x884   : > { %6044 = vpow2.f32 %v4526_v21  ;;  %v5296_v44 = vpop.f32.mrb[58].mxu0 }
 0x885   : > { %v4530_v51 = vmul.f32 -1.442695, %v5296_v44  ;;  %v3068_v12 = vpop.f32.mrb[59].mxu0  ;;  %6046 = vpow2.f32 %v4527_v46  ;;  %v6039_v24 = vpop.eup %6038 }
 0x886   : > { %v4529_v3 = vmul.f32 -1.442695, %v3068_v12  ;;  %v6041_v43 = vpop.eup %6040  ;;  %v3150_v27 = vadd.f32 1.0, %v6039_v24 }
 0x887   : > { %6048 = vpow2.f32 %v4530_v51  ;;  %v3149_v28 = vadd.f32 1.0, %v6041_v43 }
 0x888   : > { %6050 = vpow2.f32 %v4525_v49  ;;  %v5299_v7 = vpop.f32.mrb[60].mxu0 }
 0x889   : > { %6052 = vpow2.f32 %v4521_v35  ;;  %v3078_v26 = vpop.f32.mrb[61].mxu0  ;;  %v4532_v47 = vmul.f32 -1.442695, %v5299_v7 }
 0x88a   : > { %6054 = vpow2.f32 %v4529_v3  ;;  %v4531_v62 = vmul.f32 -1.442695, %v3078_v26 }
 0x88b   : > { %6056 = vrcp.f32 %v3146_v4 }
 0x88c   : > { %6058 = vrcp.f32 %v3145_v6  ;;  %v5302_v29 = vpop.f32.mrb[62].mxu0 }
 0x88d   : > { %v6043_v30 = vpop.eup %6042  ;;  %6060 = vrcp.f32 %v3148_v9  ;;  %v3088_v31 = vpop.f32.mrb[63].mxu0  ;;  %v4534_v55 = vmul.f32 -1.442695, %v5302_v29 }
 0x88e   : > { %v6045_v32 = vpop.eup %6044  ;;  %6062 = vrcp.f32 %v3150_v27  ;;  %v3154_v33 = vadd.f32 1.0, %v6043_v30  ;;  %v4533_v38 = vmul.f32 -1.442695, %v3088_v31 }
 0x88f   : > { %6064 = vrcp.f32 %v3149_v28  ;;  %v6047_v0 = vpop.eup %6046  ;;  %v3152_v59 = vadd.f32 1.0, %v6045_v32 }
 0x890   : > { %6066 = vrcp.f32 %v3154_v33  ;;  %v3153_v22 = vadd.f32 1.0, %v6047_v0 }
 0x891   : > { %v6049_v50 = vpop.eup %6048  ;;  %6068 = vpow2.f32 %v4532_v47 }
 0x892   : > { %v6051_v25 = vpop.eup %6050  ;;  %v3156_v18 = vadd.f32 1.0, %v6049_v50  ;;  %6070 = vpow2.f32 %v4531_v62 }
 0x893   : > { %v6053_v41 = vpop.eup %6052  ;;  %6072 = vrcp.f32 %v3153_v22  ;;  %v3151_v1 = vadd.f32 1.0, %v6051_v25 }
 0x894   : > { %v6055_v36 = vpop.eup %6054  ;;  %6074 = vrcp.f32 %v3156_v18  ;;  %v3147_v42 = vadd.f32 1.0, %v6053_v41 }
 0x895   : > { %v6057_v23 = vpop.eup %6056  ;;  %6076 = vrcp.f32 %v3152_v59  ;;  %v3155_v40 = vadd.f32 1.0, %v6055_v36 }
 0x896   : > { %v6059_v63 = vpop.eup %6058  ;;  %6078 = vpow2.f32 %v4534_v55 }
 0x897   : > { %v6061_v21 = vpop.eup %6060  ;;  %6080 = vrcp.f32 %v3155_v40 }
 0x898   : > { %v6063_v8 = vpop.eup %6062  ;;  %6082 = vpow2.f32 %v4533_v38 }
 0x899   : > { %v6065_v37 = vpop.eup %6064  ;;  %6084 = vrcp.f32 %v3151_v1  ;;  %v3202_v3 = vmul.f32 %v6063_v8, %v7173_v57 }
 0x89a   : > { %v6067_v46 = vpop.eup %6066  ;;  %6086 = vrcp.f32 %v3147_v42  ;;  %v3201_v30 = vmul.f32 %v6065_v37, %v7178_v48 }
 0x89b   : > { %v6069_v34 = vpop.eup %6068  ;;  %v3194_v49 = vmul.f32 2.0, %v6067_v46 }
 0x89c   : > { %v6071_v44 = vpop.eup %6070  ;;  %v3158_v7 = vadd.f32 1.0, %v6069_v34  ;;  %v4539_v34 = vld [vmem:[%s6407_s20 + $0x38] sm:$0x7f] }
 0x89d   : > { %v6073_v52 = vpop.eup %6072  ;;  %v4536_v35 = vadd.f32 -1.0, %v3194_v49  ;;  %v3157_v28 = vadd.f32 1.0, %v6071_v44  ;;  %v6280_v49 = vld [vmem:[%s7576_s2 + $0x8] sm:$0xff]  ;;  %v6281_v44 = vld [vmem:[%s7576_s2 + $0x10] sm:$0xff] }
 0x89e   : > { %v6075_v51 = vpop.eup %6074  ;;  %v3193_v12 = vmul.f32 2.0, %v6073_v52  ;;  %v6282_v52 = vld [vmem:[%s7576_s2 + $0x18] sm:$0xff] }
 0x89f   : > { %v6077_v53 = vpop.eup %6076  ;;  %v3206_v24 = vmul.f32 %v6057_v23, %v4536_v35  ;;  %v3196_v4 = vmul.f32 2.0, %v6075_v51  ;;  %v6283_v35 = vld [vmem:[%s7576_s2 + $0x20] sm:$0xff]  ;;  %v6284_v51 = vld [vmem:[%s7576_s2 + $0x28] sm:$0xff] }
 0x8a0   : > { %v6079_v43 = vpop.eup %6078  ;;  %v4535_v6 = vadd.f32 -1.0, %v3193_v12  ;;  %v3204_v57 = vmul.f32 %v6077_v53, %v7180_v2  ;;  %v6285_v12 = vld [vmem:[%s7576_s2 + $0x30] sm:$0xff]  ;;  %v6286_v53 = vld [vmem:[%s7576_s2 + $0x38] sm:$0xff] }
 0x8a1   : > { %v6081_v9 = vpop.eup %6080  ;;  %v7334_v26 = vadd.f32 %v3206_v24, %v3202_v3  ;;  %v4538_v27 = vadd.f32 -1.0, %v3196_v4  ;;  %v3160_v50 = vadd.f32 1.0, %v6079_v43  ;;  %v6287_v3 = vld [vmem:[%s7576_s2 + $0x40] sm:$0xff]  ;;  %v6288_v24 = vld [vmem:[%s7576_s2 + $0x48] sm:$0xff]  ;;  %v6289_v4 = vld [vmem:[%s7576_s2 + $0x50] sm:$0xff] }
 0x8a2   : > { %v6083_v29 = vpop.eup %6082  ;;  %v3205_v47 = vmul.f32 %v6059_v63, %v4535_v6  ;;  %v3195_v31 = vmul.f32 2.0, %v6081_v9  ;;  %v6290_v43 = vld [vmem:[%s7576_s2 + $0x58] sm:$0xff]  ;;  %v6291_v6 = vld [vmem:[%s7576_s2 + $0x60] sm:$0xff]  ;;  %v6293_v9 = vld [vmem:[%s7576_s2 + $0x70] sm:$0xff] }
 0x8a3   : > { %v6085_v32 = vpop.eup %6084  ;;  %6088 = vtanh.f32 %v7334_v26  ;;  %v3208_v33 = vmul.f32 %v6061_v21, %v4538_v27  ;;  %v3159_v25 = vadd.f32 1.0, %v6083_v29  ;;  %v6294_v27 = vld [vmem:[%s7576_s2 + $0x78] sm:$0xff] }
 0x8a4   : > { %v7339_v62 = vadd.f32 %v3205_v47, %v3201_v30  ;;  %v4537_v0 = vadd.f32 -1.0, %v3195_v31  ;;  %6090 = vrcp.f32 %v3158_v7  ;;  %v6087_v59 = vpop.eup %6086  ;;  %v3203_v48 = vmul.f32 %v6085_v32, %v7185_v5  ;;  %v6292_v7 = vld [vmem:[%s7576_s2 + $0x68] sm:$0xff] }
 0x8a5   : > { %v7341_v22 = vadd.f32 %v3208_v33, %v3204_v57  ;;  %6092 = vrcp.f32 %v3157_v28 }
 0x8a6   : > { %6094 = vtanh.f32 %v7339_v62  ;;  %v3207_v18 = vmul.f32 %v6087_v59, %v4537_v0 }
 0x8a7   : > { %6096 = vtanh.f32 %v7341_v22 }
 0x8a8   : > { %v7346_v55 = vadd.f32 %v3207_v18, %v3203_v48  ;;  %6098 = vrcp.f32 %v3160_v50 }
 0x8a9   : > { %6100 = vrcp.f32 %v3159_v25 }
 0x8aa   : > { %6102 = vtanh.f32 %v7346_v55 }
 0x8ad   : > { %v6089_v2 = vpop.eup %6088 }
 0x8ae   : > { %v6091_v41 = vpop.eup %6090 }
 0x8af   : > { %v6093_v36 = vpop.eup %6092  ;;  %v3218_v38 = vmul.f32 %v6091_v41, %v6089_v2 }
 0x8b0   : > { %v6095_v23 = vpop.eup %6094 }
 0x8b1   : > { %v6097_v1 = vpop.eup %6096  ;;  %v3217_v40 = vmul.f32 %v6095_v23, %v6093_v36 }
 0x8b2   : > { %v6099_v63 = vpop.eup %6098 }
 0x8b3   : > { %v6101_v21 = vpop.eup %6100  ;;  %v5452_v5 = vpack.c.bf16 %v3218_v38, %v3217_v40  ;;  %v3220_v42 = vmul.f32 %v6099_v63, %v6097_v1 }
 0x8b4   : > { %v6103_v8 = vpop.eup %6102 }
 0x8b5   : > { %5453 = vmatprep.subr.bf16.mxu1 %v5452_v5  ;;  %v3219_v37 = vmul.f32 %v6103_v8, %v6101_v21 }
 0x8b6   : > { %5455 = vmatpush3.bf16.msra.mxu1 %v5452_v5 }
 0x8b7   : > { %v5456_v46 = vpack.c.bf16 %v3220_v42, %v3219_v37 }
 0x8b9   : > { %5457 = vmatprep.subr.bf16.mxu1 %v5456_v46 }
 0x8ba   : > { %5459 = vmatpush3.bf16.msra.mxu1 %v5456_v46 }
 0x8bb   : > { %5335 = vmatprep.subr.msk.mxu1 %vm421_vm1, %v4539_v34 }
 0x8bd   : > { %5312 = vmatmul.mubr.msk.f32.vlgmr.msra.gmra.mrb[48].mxu1 %vm660_vm2, %v6280_v49 }
 0x8be   : > { %5314 = vmatprep.mubr.msk.f32.mxu1 %vm660_vm2, %v6281_v44  ;;  %5336 = vmatpush3.msk.msra.mxu1 %vm421_vm1, %v4539_v34 }
 0x8c1   : > { %5315 = vmatmul.mubr.msk.f32.gmra.mrb[50].mxu1 %vm660_vm2, %v6282_v52 }
 0x8c2   : > { %5317 = vmatprep.mubr.msk.f32.mxu1 %vm660_vm2, %v6283_v35 }
 0x8c5   : > { %5318 = vmatmul.mubr.msk.f32.gmra.mrb[52].mxu1 %vm660_vm2, %v6284_v51 }
 0x8c6   : > { %5320 = vmatprep.mubr.msk.f32.mxu1 %vm660_vm2, %v6285_v12 }
 0x8c9   : > { %5321 = vmatmul.mubr.msk.f32.gmra.mrb[54].mxu1 %vm660_vm2, %v6286_v53 }
 0x8ca   : > { %5323 = vmatprep.mubr.msk.f32.mxu1 %vm660_vm2, %v6287_v3 }
 0x8cd   : > { %5324 = vmatmul.mubr.msk.f32.gmra.mrb[56].mxu1 %vm660_vm2, %v6288_v24 }
 0x8ce   : > { %5326 = vmatprep.mubr.msk.f32.mxu1 %vm660_vm2, %v6289_v4 }
 0x8d1   : > { %5327 = vmatmul.mubr.msk.f32.gmra.mrb[58].mxu1 %vm660_vm2, %v6290_v43 }
 0x8d2   : > { %5329 = vmatprep.mubr.msk.f32.mxu1 %vm660_vm2, %v6291_v6 }
 0x8d5   : > { %5330 = vmatmul.mubr.msk.f32.gmra.mrb[60].mxu1 %vm660_vm2, %v6292_v7 }
 0x8d6   : > { %5332 = vmatprep.mubr.msk.f32.mxu1 %vm660_vm2, %v6293_v9 }
 0x8d9   : > { %5333 = vmatmul.mubr.msk.f32.gmra.mrb[62].mxu1 %vm660_vm2, %v6294_v27 }
 0x8da   : > { %5337 = vmatprep.mubr.msk.f32.mxu1 %vm372_vm0, %v7224_v56  ;;  %v3640_v56 = vld [vmem:[%s7577_s3] sm:$0xff] }
 0x8db   : > { %5369 = vmatprep.mubr.msk.f32.mxu0 %vm660_vm2, %v3640_v56 }
 0x8dd   : > { %5338 = vmatmul.mubr.msk.f32.vlgmr.msra.gmra.mrb[48].mxu1 %vm372_vm0, %v7231_v58  ;;  %v3664_v58 = vld [vmem:[%s7578_s4 + $0x40] sm:$0xff] }
 0x8de   : > { %5340 = vmatprep.mubr.msk.f32.mxu1 %vm372_vm0, %v7238_v60  ;;  %v3656_v60 = vld [vmem:[%s7578_s4] sm:$0xff] }
 0x8e1   : > { %5341 = vmatmul.mubr.msk.f32.gmra.mrb[50].mxu1 %vm372_vm0, %v7245_v61  ;;  %v6319_v61 = vmov 0  }
 0x8e2   : > { %5343 = vmatprep.mubr.msk.f32.mxu1 %vm372_vm0, %v7252_v10  ;;  %5614 = vset.pattern.permute.xlu0 %v6319_v61  ;;  %v3665_v10 = vld [vmem:[%s7578_s4 + $0x48] sm:$0xff] }
 0x8e3   : > { %5615 = vset.pattern.permute.xlu1 %v6319_v61  ;;  %3710 = vperm.xlu0 %5614, %v3664_v58  }
 0x8e4   : > { %3674 = vperm.xlu1 %5615, %v3656_v60  }
 0x8e5   : > { %5344 = vmatmul.mubr.msk.f32.gmra.mrb[52].mxu1 %vm372_vm0, %v7259_v39  ;;  %v3657_v39 = vld [vmem:[%s7578_s4 + $0x8] sm:$0xff] }
 0x8e6   : > { %5346 = vmatprep.mubr.msk.f32.mxu1 %vm372_vm0, %v7266_v11  ;;  %v3666_v11 = vld [vmem:[%s7578_s4 + $0x50] sm:$0xff] }
 0x8e7   : > { %3715 = vperm.xlu0 %5614, %v3665_v10  }
 0x8e8   : > { %3679 = vperm.xlu1 %5615, %v3657_v39  }
 0x8e9   : > { %5347 = vmatmul.mubr.msk.f32.gmra.mrb[54].mxu1 %vm372_vm0, %v7273_v45  ;;  %v3667_v45 = vld [vmem:[%s7578_s4 + $0x58] sm:$0xff] }
 0x8ea   : > { %5349 = vmatprep.mubr.msk.f32.mxu1 %vm372_vm0, %v7280_v13  ;;  %v3658_v13 = vld [vmem:[%s7578_s4 + $0x10] sm:$0xff] }
 0x8eb   : > { %3720 = vperm.xlu0 %5614, %v3666_v11  }
 0x8ec   : > { %3725 = vperm.xlu1 %5615, %v3667_v45  }
 0x8ed   : > { %5350 = vmatmul.mubr.msk.f32.gmra.mrb[56].mxu1 %vm372_vm0, %v7287_v14  ;;  %v3659_v14 = vld [vmem:[%s7578_s4 + $0x18] sm:$0xff] }
 0x8ee   : > { %5352 = vmatprep.mubr.msk.f32.mxu1 %vm372_vm0, %v7294_v15  ;;  %v3668_v15 = vld [vmem:[%s7578_s4 + $0x60] sm:$0xff] }
 0x8ef   : > { %3684 = vperm.xlu0 %5614, %v3658_v13  }
 0x8f0   : > { %3689 = vperm.xlu1 %5615, %v3659_v14  }
 0x8f1   : > { %5353 = vmatmul.mubr.msk.f32.gmra.mrb[58].mxu1 %vm372_vm0, %v7301_v16  ;;  %v3669_v16 = vld [vmem:[%s7578_s4 + $0x68] sm:$0xff] }
 0x8f2   : > { %5355 = vmatprep.mubr.msk.f32.mxu1 %vm372_vm0, %v7308_v17  ;;  %v3670_v17 = vld [vmem:[%s7578_s4 + $0x70] sm:$0xff] }
 0x8f3   : > { %3730 = vperm.xlu0 %5614, %v3668_v15  }
 0x8f4   : > { %3735 = vperm.xlu1 %5615, %v3669_v16  }
 0x8f5   : > { %5356 = vmatmul.mubr.msk.f32.gmra.mrb[60].mxu1 %vm372_vm0, %v7315_v19  ;;  %v3671_v19 = vld [vmem:[%s7578_s4 + $0x78] sm:$0xff] }
 0x8f6   : > { %5358 = vmatprep.mubr.msk.f32.mxu1 %vm372_vm0, %v7322_v20 }
 0x8f7   : > { %3740 = vperm.xlu0 %5614, %v3670_v17  }
 0x8f8   : > { %3745 = vperm.xlu1 %5615, %v3671_v19  }
 0x8f9   : > { %5359 = vmatmul.mubr.msk.f32.gmra.mrb[62].mxu1 %vm372_vm0, %v7329_v54  ;;  %v4034_v54 = vld [vmem:[%s7580_s6] sm:$0x3f] }
 0x8fb   : > { %4037 = vperm.xlu0 %5614, %v4034_v54  }
 0x9b0   : > { %v5339_v20 = vpop.f32.mrb[48].mxu1 }
 0x9b1   : > { %v3437_v28 = vpop.f32.mrb[49].mxu1  ;;  %v4574_v47 = vmul.f32 -1.442695, %v5339_v20 }
 0x9b2   : > { %v4573_v31 = vmul.f32 -1.442695, %v3437_v28 }
 0x9b3   : > { %6104 = vpow2.f32 %v4574_v47 }
 0x9b4   : > { %v5342_v29 = vpop.f32.mrb[50].mxu1  ;;  %6106 = vpow2.f32 %v4573_v31 }
 0x9b5   : > { %v3447_v30 = vpop.f32.mrb[51].mxu1  ;;  %v4576_v32 = vmul.f32 -1.442695, %v5342_v29 }
 0x9b6   : > { %v4575_v63 = vmul.f32 -1.442695, %v3447_v30 }
 0x9b7   : > { %6108 = vpow2.f32 %v4576_v32 }
 0x9b8   : > { %v5345_v57 = vpop.f32.mrb[52].mxu1 }
 0x9b9   : > { %v4578_v33 = vmul.f32 -1.442695, %v5345_v57  ;;  %v3457_v0 = vpop.f32.mrb[53].mxu1 }
 0x9ba   : > { %v4577_v25 = vmul.f32 -1.442695, %v3457_v0 }
 0x9bb   : > { %6110 = vpow2.f32 %v4578_v33 }
 0x9bc   : > { %v5348_v50 = vpop.f32.mrb[54].mxu1 }
 0x9bd   : > { %v3467_v59 = vpop.f32.mrb[55].mxu1  ;;  %v4580_v18 = vmul.f32 -1.442695, %v5348_v50  ;;  %v6105_v38 = vpop.eup %6104 }
 0x9be   : > { %v4579_v23 = vmul.f32 -1.442695, %v3467_v59  ;;  %v6107_v40 = vpop.eup %6106  ;;  %v3565_v46 = vadd.f32 1.0, %v6105_v38 }
 0x9bf   : > { %v3564_v34 = vadd.f32 1.0, %v6107_v40 }
 0x9c0   : > { %v5351_v48 = vpop.f32.mrb[56].mxu1 }
 0x9c1   : > { %v4582_v2 = vmul.f32 -1.442695, %v5351_v48  ;;  %v3477_v41 = vpop.f32.mrb[57].mxu1  ;;  %v6109_v42 = vpop.eup %6108 }
 0x9c2   : > { %v4581_v36 = vmul.f32 -1.442695, %v3477_v41  ;;  %v3567_v44 = vadd.f32 1.0, %v6109_v42 }
 0x9c3   : > { %6112 = vpow2.f32 %v4582_v2 }
 0x9c4   : > { %6114 = vpow2.f32 %v4577_v25  ;;  %v5354_v1 = vpop.f32.mrb[58].mxu1 }
 0x9c5   : > { %6116 = vpow2.f32 %v4580_v18  ;;  %v4584_v21 = vmul.f32 -1.442695, %v5354_v1  ;;  %v3487_v5 = vpop.f32.mrb[59].mxu1  ;;  %v6111_v37 = vpop.eup %6110 }
 0x9c6   : > { %6118 = vpow2.f32 %v4581_v36  ;;  %v4583_v8 = vmul.f32 -1.442695, %v3487_v5  ;;  %v3569_v35 = vadd.f32 1.0, %v6111_v37 }
 0x9c7   : > { %6120 = vpow2.f32 %v4584_v21 }
 0x9c8   : > { %6122 = vpow2.f32 %v4579_v23  ;;  %v5357_v49 = vpop.f32.mrb[60].mxu1 }
 0x9c9   : > { %6124 = vpow2.f32 %v4575_v63  ;;  %v3497_v52 = vpop.f32.mrb[61].mxu1  ;;  %v4586_v51 = vmul.f32 -1.442695, %v5357_v49 }
 0x9ca   : > { %6126 = vpow2.f32 %v4583_v8  ;;  %v4585_v3 = vmul.f32 -1.442695, %v3497_v52 }
 0x9cb   : > { %6128 = vrcp.f32 %v3565_v46 }
 0x9cc   : > { %6130 = vrcp.f32 %v3564_v34  ;;  %v5360_v12 = vpop.f32.mrb[62].mxu1 }
 0x9cd   : > { %v6113_v53 = vpop.eup %6112  ;;  %6132 = vrcp.f32 %v3567_v44  ;;  %v3507_v24 = vpop.f32.mrb[63].mxu1  ;;  %v4588_v6 = vmul.f32 -1.442695, %v5360_v12 }
 0x9ce   : > { %v6115_v4 = vpop.eup %6114  ;;  %6134 = vrcp.f32 %v3569_v35  ;;  %v3573_v43 = vadd.f32 1.0, %v6113_v53  ;;  %v4587_v45 = vmul.f32 -1.442695, %v3507_v24 }
 0x9cf   : > { %v6117_v7 = vpop.eup %6116  ;;  %6136 = vpow2.f32 %v4586_v51  ;;  %v3568_v56 = vadd.f32 1.0, %v6115_v4 }
 0x9d0   : > { %v6119_v9 = vpop.eup %6118  ;;  %6138 = vrcp.f32 %v3573_v43  ;;  %v3571_v61 = vadd.f32 1.0, %v6117_v7 }
 0x9d1   : > { %v6121_v27 = vpop.eup %6120  ;;  %v3572_v58 = vadd.f32 1.0, %v6119_v9  ;;  %6140 = vpow2.f32 %v4585_v3 }
 0x9d2   : > { %v6123_v60 = vpop.eup %6122  ;;  %v3575_v10 = vadd.f32 1.0, %v6121_v27  ;;  %6142 = vpow2.f32 %v4588_v6 }
 0x9d3   : > { %v6125_v39 = vpop.eup %6124  ;;  %6144 = vrcp.f32 %v3572_v58  ;;  %v3570_v14 = vadd.f32 1.0, %v6123_v60  ;;  %v3641_v58 = vld [vmem:[%s7577_s3 + $0x8] sm:$0xff]  ;;  %v3642_v60 = vld [vmem:[%s7577_s3 + $0x10] sm:$0xff] }
 0x9d4   : > { %v6127_v11 = vpop.eup %6126  ;;  %6146 = vrcp.f32 %v3575_v10  ;;  %v3566_v19 = vadd.f32 1.0, %v6125_v39  ;;  %v3644_v10 = vld [vmem:[%s7577_s3 + $0x20] sm:$0xff]  ;;  %v3645_v39 = vld [vmem:[%s7577_s3 + $0x28] sm:$0xff] }
 0x9d5   : > { %v6129_v13 = vpop.eup %6128  ;;  %6148 = vrcp.f32 %v3568_v56  ;;  %v3574_v15 = vadd.f32 1.0, %v6127_v11  ;;  %v3646_v11 = vld [vmem:[%s7577_s3 + $0x30] sm:$0xff] }
 0x9d6   : > { %v6131_v16 = vpop.eup %6130  ;;  %6150 = vrcp.f32 %v3571_v61  ;;  %v3643_v61 = vld [vmem:[%s7577_s3 + $0x18] sm:$0xff] }
 0x9d7   : > { %v6133_v17 = vpop.eup %6132  ;;  %6152 = vrcp.f32 %v3574_v15  ;;  %v3650_v15 = vld [vmem:[%s7577_s3 + $0x50] sm:$0xff] }
 0x9d8   : > { %v6135_v20 = vpop.eup %6134  ;;  %6154 = vpow2.f32 %v4587_v45  ;;  %v3647_v45 = vld [vmem:[%s7577_s3 + $0x38] sm:$0xff] }
 0x9d9   : > { %v6137_v54 = vpop.eup %6136  ;;  %6156 = vrcp.f32 %v3570_v14  ;;  %v3621_v59 = vmul.f32 %v6135_v20, %v7334_v26  ;;  %v3649_v14 = vld [vmem:[%s7577_s3 + $0x48] sm:$0xff]  ;;  %v3654_v20 = vld [vmem:[%s7577_s3 + $0x70] sm:$0xff] }
 0x9da   : > { %v6139_v28 = vpop.eup %6138  ;;  %6158 = vrcp.f32 %v3566_v19  ;;  %v3577_v0 = vadd.f32 1.0, %v6137_v54  ;;  %v3653_v19 = vld [vmem:[%s7577_s3 + $0x68] sm:$0xff]  ;;  %v3655_v54 = vld [vmem:[%s7577_s3 + $0x78] sm:$0xff] }
 0x9db   : > { %v6141_v29 = vpop.eup %6140  ;;  %v3613_v30 = vmul.f32 2.0, %v6139_v28  ;;  %v6320_v28 = vmov 0.0|0.0  }
 0x9dc   : > { %v6143_v47 = vpop.eup %6142  ;;  %v3576_v41 = vadd.f32 1.0, %v6141_v29  ;;  %6160 = vrcp.f32 %v3577_v0  ;;  %v6322_v29 = vmov 0.0  }
 0x9dd   : > { %v6145_v31 = vpop.eup %6144  ;;  %v4590_v32 = vadd.f32 -1.0, %v3613_v30  ;;  %v3579_v1 = vadd.f32 1.0, %v6143_v47  ;;  %v3675_v30 = vpop.permute.xlu1 %3674 }
 0x9de   : > { %v6147_v57 = vpop.eup %6146  ;;  %v3612_v33 = vmul.f32 2.0, %v6145_v31  ;;  %v3711_v47 = vpop.permute.xlu0 %3710 }
 0x9df   : > { %v6149_v50 = vpop.eup %6148  ;;  %v3625_v25 = vmul.f32 %v6129_v13, %v4590_v32  ;;  %v3615_v48 = vmul.f32 2.0, %v6147_v57  ;;  %v3648_v13 = vld [vmem:[%s7577_s3 + $0x40] sm:$0xff] }
 0x9e0   : > { %v6151_v18 = vpop.eup %6150  ;;  %v4589_v2 = vadd.f32 -1.0, %v3612_v33  ;;  %v3620_v63 = vmul.f32 %v6149_v50, %v7339_v62 }
 0x9e1   : > { %v6153_v36 = vpop.eup %6152  ;;  %v3629_v38 = vadd.f32 %v3625_v25, %v3621_v59  ;;  %v4592_v23 = vadd.f32 -1.0, %v3615_v48  ;;  %v3623_v8 = vmul.f32 %v6151_v18, %v7341_v22  ;;  %v3680_v31 = vpop.permute.xlu1 %3679 }
 0x9e2   : > { %v6155_v40 = vpop.eup %6154  ;;  %v3624_v21 = vmul.f32 %v6131_v16, %v4589_v2  ;;  %v3614_v5 = vmul.f32 2.0, %v6153_v36  ;;  %v3651_v16 = vld [vmem:[%s7577_s3 + $0x58] sm:$0xff]  ;;  %v3716_v33 = vpop.permute.xlu0 %3715 }
 0x9e3   : > { %v6157_v42 = vpop.eup %6156  ;;  %6162 = vtanh.f32 %v3629_v38  ;;  %v3627_v26 = vmul.f32 %v6133_v17, %v4592_v23  ;;  %v3578_v44 = vadd.f32 1.0, %v6155_v40  ;;  %v3652_v17 = vld [vmem:[%s7577_s3 + $0x60] sm:$0xff] }
 0x9e4   : > { %v3628_v37 = vadd.f32 %v3624_v21, %v3620_v63  ;;  %v4591_v46 = vadd.f32 -1.0, %v3614_v5  ;;  %6164 = vrcp.f32 %v3576_v41  ;;  %v6159_v34 = vpop.eup %6158  ;;  %v3622_v52 = vmul.f32 %v6157_v42, %v7346_v55 }
 0x9e5   : > { %v3631_v49 = vadd.f32 %v3627_v26, %v3623_v8  ;;  %6166 = vrcp.f32 %v3579_v1  ;;  %v3726_v50 = vpop.permute.xlu1 %3725 }
 0x9e6   : > { %6168 = vtanh.f32 %v3628_v37  ;;  %v3626_v35 = vmul.f32 %v6159_v34, %v4591_v46  ;;  %v6161_v51 = vpop.eup %6160  ;;  %v3721_v48 = vpop.permute.xlu0 %3720 }
 0x9e7   : > { %6170 = vtanh.f32 %v3631_v49 }
 0x9e8   : > { %v3630_v62 = vadd.f32 %v3626_v35, %v3622_v52  ;;  %6172 = vrcp.f32 %v3578_v44 }
 0x9e9   : > { %v3690_v36 = vpop.permute.xlu1 %3689 }
 0x9ea   : > { %6174 = vtanh.f32 %v3630_v62  ;;  %v3685_v40 = vpop.permute.xlu0 %3684 }
 0x9ed   : > { %v6163_v12 = vpop.eup %6162 }
 0x9ee   : > { %v6165_v53 = vpop.eup %6164  ;;  %v3637_v22 = vmul.f32 %v6163_v12, %v6161_v51  ;;  %v3736_v51 = vpop.permute.xlu1 %3735 }
 0x9ef   : > { %v6167_v3 = vpop.eup %6166 }
 0x9f0   : > { %v6169_v24 = vpop.eup %6168 }
 0x9f1   : > { %v6171_v4 = vpop.eup %6170  ;;  %v3636_v43 = vmul.f32 %v6169_v24, %v6165_v53  ;;  %v3731_v53 = vpop.permute.xlu0 %3730 }
 0x9f2   : > { %v3639_v6 = vmul.f32 %v6171_v4, %v6167_v3  ;;  %v6173_v7 = vpop.eup %6172 }
 0x9f3   : > { %v5460_v9 = vpack.c.bf16 %v3637_v22, %v3636_v43 }
 0x9f4   : > { %v6175_v27 = vpop.eup %6174 }
 0x9f5   : > { %5461 = vmatprep.subr.bf16.mxu0 %v5460_v9  ;;  %v3638_v56 = vmul.f32 %v6175_v27, %v6173_v7  ;;  %v3746_v27 = vpop.permute.xlu1 %3745 }
 0x9f6   : > { %5463 = vmatpush3.bf16.msra.mxu0 %v5460_v9 }
 0x9f7   : > { %v5464_v55 = vpack.c.bf16 %v3639_v6, %v3638_v56 }
 0x9f9   : > { %5465 = vmatprep.subr.bf16.mxu0 %v5464_v55 }
 0x9fa   : > { %5467 = vmatpush3.bf16.msra.mxu0 %v5464_v55 }
 0x9fb   : > { %5468 = vmatprep.subr.bf16.mxu0 %v6320_v28 }
 0x9fd   : > { %5370 = vmatmul.mubr.msk.f32.vlgmr.msra.gmra.mrb[64].mxu0 %vm660_vm2, %v3641_v58  ;;  %v3741_v58 = vpop.permute.xlu0 %3740 }
 0x9fe   : > { %5372 = vmatprep.mubr.msk.f32.mxu0 %vm660_vm2, %v3642_v60 }
 0xa01   : > { %5373 = vmatmul.mubr.msk.f32.gmra.mrb[66].mxu0 %vm660_vm2, %v3643_v61 }
 0xa02   : > { %5375 = vmatprep.mubr.msk.f32.mxu0 %vm660_vm2, %v3644_v10 }
 0xa05   : > { %5376 = vmatmul.mubr.msk.f32.gmra.mrb[68].mxu0 %vm660_vm2, %v3645_v39 }
 0xa06   : > { %5378 = vmatprep.mubr.msk.f32.mxu0 %vm660_vm2, %v3646_v11 }
 0xa09   : > { %5379 = vmatmul.mubr.msk.f32.gmra.mrb[70].mxu0 %vm660_vm2, %v3647_v45 }
 0xa0a   : > { %5381 = vmatprep.mubr.msk.f32.mxu0 %vm660_vm2, %v3648_v13 }
 0xa0d   : > { %5382 = vmatmul.mubr.msk.f32.gmra.mrb[72].mxu0 %vm660_vm2, %v3649_v14 }
 0xa0e   : > { %5384 = vmatprep.mubr.msk.f32.mxu0 %vm660_vm2, %v3650_v15 }
 0xa11   : > { %5385 = vmatmul.mubr.msk.f32.gmra.mrb[74].mxu0 %vm660_vm2, %v3651_v16 }
 0xa12   : > { %5387 = vmatprep.mubr.msk.f32.mxu0 %vm660_vm2, %v3652_v17 }
 0xa15   : > { %5388 = vmatmul.mubr.msk.f32.gmra.mrb[76].mxu0 %vm660_vm2, %v3653_v19 }
 0xa16   : > { %5390 = vmatprep.mubr.msk.f32.mxu0 %vm660_vm2, %v3654_v20 }
 0xa19   : > { %5391 = vmatmul.mubr.msk.f32.gmra.mrb[78].mxu0 %vm660_vm2, %v3655_v54 }
 0xa1a   : > { %5401 = vmatprep.mubr.msk.f32.mxu0 %vm6321_vm3, %v6322_v29 }
 0xad0   : > { %v5371_v32 = vpop.f32.mrb[64].mxu0 }
 0xad1   : > { %v3862_v57 = vpop.f32.mrb[65].mxu0  ;;  %v3868_v25 = vadd.f32 %v5371_v32, %v3680_v31 }
 0xad2   : > { %v3863_v38 = vadd.f32 %v3862_v57, %v3675_v30 }
 0xad3   : > { %v4610_v41 = vmul.f32 -1.442695, %v3868_v25 }
 0xad4   : > { %v5374_v0 = vpop.f32.mrb[66].mxu0  ;;  %v4609_v5 = vmul.f32 -1.442695, %v3863_v38 }
 0xad5   : > { %v3872_v59 = vpop.f32.mrb[67].mxu0  ;;  %6176 = vpow2.f32 %v4610_v41  ;;  %v3878_v63 = vadd.f32 %v5374_v0, %v3690_v36 }
 0xad6   : > { %v3873_v21 = vadd.f32 %v3872_v59, %v3685_v40  ;;  %6178 = vpow2.f32 %v4609_v5 }
 0xad7   : > { %v4612_v37 = vmul.f32 -1.442695, %v3878_v63 }
 0xad8   : > { %v5377_v18 = vpop.f32.mrb[68].mxu0  ;;  %v4611_v34 = vmul.f32 -1.442695, %v3873_v21 }
 0xad9   : > { %v3882_v2 = vpop.f32.mrb[69].mxu0 }
 0xadc   : > { %v5380_v23 = vpop.f32.mrb[70].mxu0 }
 0xadd   : > { %v3890_v1 = vpop.f32.mrb[71].mxu0 }
 0xadf   : > { %v6177_v3 = vpop.eup %6176 }
 0xae0   : > { %v5383_v42 = vpop.f32.mrb[72].mxu0  ;;  %v3974_v9 = vadd.f32 1.0, %v6177_v3  ;;  %v6179_v39 = vpop.eup %6178 }
 0xae1   : > { %v3904_v8 = vadd.f32 %v5383_v42, %v3716_v33  ;;  %v3898_v26 = vpop.f32.mrb[73].mxu0 }
 0xae2   : > { %v3899_v46 = vadd.f32 %v3898_v26, %v3711_v47  ;;  %v3973_v47 = vadd.f32 1.0, %v6179_v39  ;;  %v4029_v39 = vld [vmem:[%s7579_s5] sm:$0x3f] }
 0xae3   : > { %v4614_v49 = vmul.f32 -1.442695, %v3904_v8 }
 0xae4   : > { %v4613_v44 = vmul.f32 -1.442695, %v3899_v46  ;;  %v5386_v52 = vpop.f32.mrb[74].mxu0 }
 0xae5   : > { %6180 = vpow2.f32 %v4614_v49  ;;  %v3914_v35 = vadd.f32 %v5386_v52, %v3726_v50  ;;  %v3908_v62 = vpop.f32.mrb[75].mxu0 }
 0xae6   : > { %6182 = vpow2.f32 %v4612_v37  ;;  %v3909_v12 = vadd.f32 %v3908_v62, %v3721_v48 }
 0xae7   : > { %6184 = vpow2.f32 %v4611_v34  ;;  %v4616_v22 = vmul.f32 -1.442695, %v3914_v35 }
 0xae8   : > { %6186 = vpow2.f32 %v4613_v44  ;;  %v4615_v24 = vmul.f32 -1.442695, %v3909_v12  ;;  %v5389_v4 = vpop.f32.mrb[76].mxu0 }
 0xae9   : > { %6188 = vpow2.f32 %v4616_v22  ;;  %v3924_v43 = vadd.f32 %v5389_v4, %v3736_v51  ;;  %v3918_v6 = vpop.f32.mrb[77].mxu0 }
 0xaea   : > { %6190 = vpow2.f32 %v4615_v24  ;;  %v3919_v7 = vadd.f32 %v3918_v6, %v3731_v53 }
 0xaeb   : > { %v4618_v56 = vmul.f32 -1.442695, %v3924_v43  ;;  %6192 = vrcp.f32 %v3974_v9 }
 0xaec   : > { %v5392_v55 = vpop.f32.mrb[78].mxu0  ;;  %v4617_v60 = vmul.f32 -1.442695, %v3919_v7 }
 0xaed   : > { %v3934_v61 = vadd.f32 %v5392_v55, %v3746_v27  ;;  %v3928_v10 = vpop.f32.mrb[79].mxu0  ;;  %6194 = vpow2.f32 %v4618_v56 }
 0xaee   : > { %v3929_v11 = vadd.f32 %v3928_v10, %v3741_v58  ;;  %6196 = vpow2.f32 %v4617_v60 }
 0xaef   : > { %v6181_v45 = vpop.eup %6180  ;;  %v4620_v13 = vmul.f32 -1.442695, %v3934_v61 }
 0xaf0   : > { %v6183_v14 = vpop.eup %6182  ;;  %v3978_v15 = vadd.f32 1.0, %v6181_v45  ;;  %v4619_v16 = vmul.f32 -1.442695, %v3929_v11  ;;  %v4038_v11 = vpop.permute.xlu0 %4037 }
 0xaf1   : > { %v6185_v17 = vpop.eup %6184  ;;  %v3976_v32 = vadd.f32 1.0, %v6183_v14 }
 0xaf2   : > { %v6187_v19 = vpop.eup %6186  ;;  %6198 = vrcp.f32 %v3978_v15  ;;  %v3975_v57 = vadd.f32 1.0, %v6185_v17 }
 0xaf3   : > { %v6189_v20 = vpop.eup %6188  ;;  %v3977_v54 = vadd.f32 1.0, %v6187_v19  ;;  %6200 = vpow2.f32 %v4620_v13 }
 0xaf4   : > { %v6191_v29 = vpop.eup %6190  ;;  %v3980_v30 = vadd.f32 1.0, %v6189_v20  ;;  %6202 = vpow2.f32 %v4619_v16 }
 0xaf5   : > { %6204 = vrcp.f32 %v3977_v54  ;;  %v3979_v31 = vadd.f32 1.0, %v6191_v29  ;;  %v6193_v33 = vpop.eup %6192 }
 0xaf6   : > { %6206 = vrcp.f32 %v3980_v30 }
 0xaf7   : > { %6208 = vrcp.f32 %v3979_v31  ;;  %v6195_v0 = vpop.eup %6194 }
 0xaf8   : > { %6210 = vrcp.f32 %v3973_v47  ;;  %v6197_v50 = vpop.eup %6196  ;;  %v3982_v18 = vadd.f32 1.0, %v6195_v0 }
 0xaf9   : > { %6212 = vrcp.f32 %v3976_v32  ;;  %v3981_v41 = vadd.f32 1.0, %v6197_v50 }
 0xafa   : > { %6214 = vrcp.f32 %v3975_v57 }
 0xafb   : > { %6216 = vrcp.f32 %v3982_v18 }
 0xafc   : > { %v6199_v59 = vpop.eup %6198  ;;  %6218 = vrcp.f32 %v3981_v41 }
 0xafd   : > { %v6201_v25 = vpop.eup %6200  ;;  %v4010_v48 = vmul.f32 2.0, %v6199_v59 }
 0xafe   : > { %v6203_v2 = vpop.eup %6202  ;;  %v3984_v40 = vadd.f32 1.0, %v6201_v25 }
 0xaff   : > { %v6205_v36 = vpop.eup %6204  ;;  %v4622_v38 = vadd.f32 -1.0, %v4010_v48  ;;  %v3983_v42 = vadd.f32 1.0, %v6203_v2 }
 0xb00   : > { %v6207_v23 = vpop.eup %6206  ;;  %v4009_v1 = vmul.f32 2.0, %v6205_v36 }
 0xb01   : > { %v6209_v63 = vpop.eup %6208  ;;  %v4018_v21 = vmul.f32 %v6193_v33, %v4622_v38  ;;  %v4012_v5 = vmul.f32 2.0, %v6207_v23 }
 0xb02   : > { %v4621_v8 = vadd.f32 -1.0, %v4009_v1  ;;  %v4011_v26 = vmul.f32 2.0, %v6209_v63  ;;  %v6211_v37 = vpop.eup %6210 }
 0xb03   : > { %6220 = vtanh.f32 %v4018_v21  ;;  %v4624_v46 = vadd.f32 -1.0, %v4012_v5  ;;  %v6213_v34 = vpop.eup %6212 }
 0xb04   : > { %v4017_v49 = vmul.f32 %v6211_v37, %v4621_v8  ;;  %v4623_v44 = vadd.f32 -1.0, %v4011_v26  ;;  %6222 = vrcp.f32 %v3984_v40  ;;  %v6215_v52 = vpop.eup %6214 }
 0xb05   : > { %v4020_v35 = vmul.f32 %v6213_v34, %v4624_v46  ;;  %6224 = vrcp.f32 %v3983_v42  ;;  %v6217_v51 = vpop.eup %6216 }
 0xb06   : > { %6226 = vtanh.f32 %v4017_v49  ;;  %v4019_v62 = vmul.f32 %v6215_v52, %v4623_v44  ;;  %v6219_v12 = vpop.eup %6218 }
 0xb07   : > { %6228 = vtanh.f32 %v4020_v35 }
 0xb08   : > { %6230 = vtanh.f32 %v4019_v62 }
 0xb0d   : > { %v6221_v53 = vpop.eup %6220 }
 0xb0e   : > { %v6223_v22 = vpop.eup %6222  ;;  %v4026_v3 = vmul.f32 %v6221_v53, %v6217_v51 }
 0xb0f   : > { %v6225_v24 = vpop.eup %6224 }
 0xb10   : > { %v6227_v4 = vpop.eup %6226  ;;  %v4031_v7 = vmax.f32 %v4026_v3, 0.0 }
 0xb11   : > { %v6229_v43 = vpop.eup %6228  ;;  %v4025_v6 = vmul.f32 %v6227_v4, %v6219_v12 }
 0xb12   : > { %v6231_v9 = vpop.eup %6230  ;;  %v4028_v27 = vmul.f32 %v6229_v43, %v6223_v22 }
 0xb13   : > { %v4030_v56 = vmax.f32 %v4025_v6, 0.0  ;;  %v4027_v55 = vmul.f32 %v6231_v9, %v6225_v24 }
 0xb14   : > { %v4033_v58 = vmax.f32 %v4028_v27, 0.0 }
 0xb15   : > { %v5469_v60 = vpack.c.bf16 %v4031_v7, %v4030_v56  ;;  %v4032_v61 = vmax.f32 %v4027_v55, 0.0 }
 0xb17   : > { %5470 = vmatpush3.bf16.msra.mxu0 %v5469_v60  ;;  %v5472_v10 = vpack.c.bf16 %v4033_v58, %v4032_v61 }
 0xb18   : > { %5471 = vmatprep.subr.bf16.mxu0 %v6320_v28 }
 0xb1b   : > { %5473 = vmatpush3.bf16.msra.mxu0 %v5472_v10 }
 0xb1e   : > { %5402 = vmatmul.mubr.msk.f32.vlgmr.msra.gmra.mrb[80].mxu0 %vm660_vm2, %v4029_v39 }
 0xbf1   : > { %v4109_v45 = vpop.f32.mrb[80].mxu0 }
 0xbf2   : > { %v4110_v13 = vadd.f32 %v4109_v45, %v4038_v11  ;;  %v5403_v28 = vpop.f32.mrb[81].mxu0 }
 0xbf4   : > { %4113 = vst [vmem:[%s338_s11] sm:$0x3f] %v4110_v13 }
 0xbf5 PF: > { %p14_p9 = scmp.ge.s32.totalorder %s6380_s28, 4   ;;  %s7582_s24 = smov %s6313_s25 }
 0xbf6   : > { %s7583_s25 = smov %s6389_s8  ;;  %s7584_s26 = smov %s6380_s28 }
 0xbf7   :  { %16 = sbr.rel (!%p14_p9) target bundleno = 2 (0x2), region = 128 }

</bundles_post_ra>
